<compile_context>
chip_gen: v5e
topology: v5e:2x2
jax: 0.10.0
libtpu: 0.0.40
codegen_flags: <defaults>
</compile_context>

<pallas_src>
import functools

import jax
import jax.numpy as jnp
from jax.experimental import pallas as pl
from jax.experimental.pallas import tpu as pltpu

ACT = "relu"            # config['activation_fct'] in {'relu', 'tanh'}
RESNET_OUTPUTS = 512    # config['resnet_outputs']
LANES = 128


def _act(x):
    return jnp.maximum(x, 0.0) if ACT == "relu" else jnp.tanh(x)


# ----------------------- Pallas kernels -----------------------

def _seg_head_kernel(x_ref, w_ref, b_ref, o_ref):
    # Channel-major 1x1 conv + softmax over classes (torch dim=1 == channel axis).
    # x_ref: (1, Cin, R, 128) VMEM slabs; w_ref: (Cin, ncls) SMEM; b_ref: (1, ncls) SMEM.
    cin, ncls = w_ref.shape
    logits = []
    for c in range(ncls):                       # ncls=3 -> 15 scalar*slab MACs on the VPU
        acc = x_ref[0, 0] * w_ref[0, c]
        for k in range(1, cin):
            acc = acc + x_ref[0, k] * w_ref[k, c]
        logits.append(acc + b_ref[0, c])
    m = logits[0]
    for c in range(1, ncls):
        m = jnp.maximum(m, logits[c])
    es = [jnp.exp(l - m) for l in logits]
    denom = es[0]
    for c in range(1, ncls):
        denom = denom + es[c]
    inv = pl.reciprocal(denom, approx=True)     # EUP: divide stays off the VALU
    for c in range(ncls):
        o_ref[0, c] = es[c] * inv               # full (R, 128) lane-dense stores


def seg_head(x_nchw, w, b):
    # x_nchw: (B2, 5, H, W) -> per-pixel softmax probs (B2, ncls, H, W). No transposes.
    B2, Cin, H, W = x_nchw.shape
    ncls = w.shape[1]
    HW = H * W
    assert HW % LANES == 0, "H*W must be a multiple of 128"
    R = HW // LANES
    x = x_nchw.reshape(B2, Cin, R, LANES)
    # Batch grid marked parallel (uses both v7x TensorCores; on single-TC v5e/v6e
    # the extra grid step is ~0.35 us and keeps the code uniform).
    probs = pl.pallas_call(
        _seg_head_kernel,
        out_shape=jax.ShapeDtypeStruct((B2, ncls, R, LANES), jnp.float32),
        grid=(B2,),
        in_specs=[pl.BlockSpec((1, Cin, R, LANES), lambda i: (i, 0, 0, 0)),
                  pl.BlockSpec(memory_space=pltpu.MemorySpace.SMEM),
                  pl.BlockSpec(memory_space=pltpu.MemorySpace.SMEM)],
        out_specs=pl.BlockSpec((1, ncls, R, LANES), lambda i: (i, 0, 0, 0)),
        compiler_params=pltpu.CompilerParams(dimension_semantics=("parallel",)),
    )(x, w, b)
    return probs.reshape(B2, ncls, H, W)


def _warp_pool_fc_kernel(q_ref, t_ref, pb_ref, pc_ref,
                         wr_ref, br_ref,
                         w1r_ref, b1r_ref, w2r_ref, b2r_ref,
                         w1t_ref, b1t_ref, w2t_ref, b2t_ref,
                         qd_ref, td_ref):
    # Fused per-level block:
    #   1) p' = q * (0, p) * inv(q) + t over the whole point cloud ((R,128) slabs)
    #   2) mean-pool of the (never materialized) warped image [range,x,y,z,0]
    #   3) ResNet-stub pool->FC over 10 pooled channels (+ pooled image_2 from SMEM)
    #   4) rotation / translation 2-layer heads (no block-diagonal zero padding)
    #   5) quaternion normalize with rsqrt(+eps)
    w, x, y, z = q_ref[0, 0], q_ref[0, 1], q_ref[0, 2], q_ref[0, 3]
    n2 = w * w + x * x + y * y + z * z
    px = pc_ref[0, 0]                            # (R, 128)
    py = pc_ref[0, 1]
    pz = pc_ref[0, 2]
    # r = q * (0, p)
    rw = -x * px - y * py - z * pz
    rx = w * px + y * pz - z * py
    ry = w * py + z * px - x * pz
    rz = w * pz + x * py - y * px
    # s = r * inv(q) + t,  inv(q) = (w, -x, -y, -z) / |q|^2   (vector divide -> VPU)
    sx = (-rw * x + rx * w - ry * z + rz * y) / n2 + t_ref[0, 0]
    sy = (-rw * y + rx * z + ry * w - rz * x) / n2 + t_ref[0, 1]
    sz = (-rw * z - rx * y + ry * x + rz * w) / n2 + t_ref[0, 2]
    rng = jnp.sqrt(sx * sx + sy * sy + sz * sz)

    # Pooled channel means of the warped range image (remission channel is 0).
    # TODO(synk): for realistic LiDAR N (>=128K) chunk this over an "arbitrary"
    #             grid axis with scratch accumulators instead of one slab.
    inv_n = 1.0 / float(px.size)
    m_r = jnp.sum(rng) * inv_n
    m_x = jnp.sum(sx) * inv_n
    m_y = jnp.sum(sy) * inv_n
    m_z = jnp.sum(sz) * inv_n

    # ResNet-stub: pooled 10-channel features -> (1, F).  Channel 4 (remission of
    # the warped image) is identically zero, so its wr row is skipped.
    feat = (m_r * wr_ref[0:1, :] + m_x * wr_ref[1:2, :]
            + m_y * wr_ref[2:3, :] + m_z * wr_ref[3:4, :]
            + pb_ref[0, 0] * wr_ref[5:6, :] + pb_ref[0, 1] * wr_ref[6:7, :]
            + pb_ref[0, 2] * wr_ref[7:8, :] + pb_ref[0, 3] * wr_ref[8:9, :]
            + pb_ref[0, 4] * wr_ref[9:10, :]
            + br_ref[...])                                        # (1, F)

    h0 = _act(feat)
    hr = _act(jnp.dot(h0, w1r_ref[...], preferred_element_type=jnp.float32) + b1r_ref[...])
    ht = _act(jnp.dot(h0, w1t_ref[...], preferred_element_type=jnp.float32) + b1t_ref[...])
    q_raw = jnp.dot(hr, w2r_ref[...], preferred_element_type=jnp.float32) + b2r_ref[...]
    t_det = jnp.dot(ht, w2t_ref[...], preferred_element_type=jnp.float32) + b2t_ref[...]

    nrm = jnp.sum(q_raw * q_raw, axis=-1, keepdims=True)          # torch.norm(whole tensor)
    qd_ref[...] = q_raw * jax.lax.rsqrt(nrm + 1e-12)              # EUP rsqrt, eps-safe
    td_ref[...] = t_det


def warp_pool_fc(q, t, pooled_b, pc4d, lvl_params):
    # q: (1,4), t: (1,3) pose used to warp pc4d (1, 3, R, 128);
    # pooled_b: (1,5) channel means of the second image. Returns (q_det, t_det).
    wr, br, w1r, b1r, w2r, b2r, w1t, b1t, w2t, b2t = lvl_params
    F = wr.shape[1]
    Hd = w1r.shape[1]
    _, _, R, L = pc4d.shape

    def smem():
        return pl.BlockSpec(memory_space=pltpu.MemorySpace.SMEM)

    def full(shape):
        return pl.BlockSpec(shape, lambda i: (0,) * len(shape))

    return pl.pallas_call(
        _warp_pool_fc_kernel,
        out_shape=(jax.ShapeDtypeStruct((1, 4), jnp.float32),
                   jax.ShapeDtypeStruct((1, 3), jnp.float32)),
        grid=(1,),
        in_specs=[smem(), smem(), smem(),
                  full((1, 3, R, L)),
                  full((10, F)), full((1, F)),
                  full((F, Hd)), full((1, Hd)), full((Hd, 4)), full((1, 4)),
                  full((F, Hd)), full((1, Hd)), full((Hd, 3)), full((1, 3))],
        out_specs=(full((1, 4)), full((1, 3))),
    )(q, t, pooled_b, pc4d, wr, br, w1r, b1r, w2r, b2r, w1t, b1t, w2t, b2t)


# --------------- JAX glue (quaternions, projection, del_moving_point) ---------------

def quat_mul(a, b):
    aw, ax, ay, az = a[..., 0], a[..., 1], a[..., 2], a[..., 3]
    bw, bx, by, bz = b[..., 0], b[..., 1], b[..., 2], b[..., 3]
    return jnp.stack([aw * bw - ax * bx - ay * by - az * bz,
                      aw * bx + ax * bw + ay * bz - az * by,
                      aw * by - ax * bz + ay * bw + az * bx,
                      aw * bz + ax * by - ay * bx + az * bw], axis=-1)


def inv_q(q):
    # TODO(synk): models.model_parts.{inv_q, mul_q_point, mul_point_q} sources not
    #             provided; standard Hamilton-product (w, x, y, z) conventions assumed.
    n2 = jnp.sum(q * q, axis=-1, keepdims=True)
    return q * jnp.array([1.0, -1.0, -1.0, -1.0], q.dtype) / n2


def warp_det_result(q0, t0, q1, t1):
    iq1 = inv_q(q1)
    warp_q = quat_mul(q1, q0)
    t0_4 = jnp.concatenate([jnp.zeros_like(t0[..., :1]), t0], axis=-1)
    warp_t = quat_mul(q1, t0_4)
    warp_t = quat_mul(warp_t, iq1)[..., 1:] + t1
    return warp_q, warp_t


def proj_image(pc, H, W):
    # TODO(synk): utility.projection.ImageProjection.do_spherical_projection not provided
    #             (data-dependent scatter); deterministic row-major packing of
    #             [range, x, y, z, remission=0] into a (B, 5, H, W) image is used instead.
    B, _, N = pc.shape
    rng = jnp.sqrt(jnp.sum(pc * pc, axis=1, keepdims=True))        # (B, 1, N)
    image_range = rng.reshape(B, 1, H, W)
    image_xyz = pc.reshape(B, 3, H, W)
    image_rem = jnp.zeros((B, 1, H, W), jnp.float32)
    images = jnp.concatenate([image_range, image_xyz, image_rem], axis=1)
    proj_xyz = image_xyz.reshape(1, 3, -1)
    return images, proj_xyz


def del_moving_point(pc, label, rate=0.5):
    # Reproduces the original faithfully, including its indexing quirk:
    # torch.nonzero on a (W*H, 1) mask yields column indices that are all zero, so
    # `static_pc[:, moving_pixels_to_remove[:, 1]] = 0` only ever zeroes point index 0
    # (iff int(rate * num_moving) > 0).  torch.randperm therefore has no effect.
    n_moving = jnp.sum(label == 2)
    n_remove = jnp.floor(rate * n_moving.astype(jnp.float32)).astype(jnp.int32)
    zero_first = n_remove > 0
    static = pc.astype(jnp.float32)
    static = static.at[:, :, 0].set(jnp.where(zero_first, 0.0, static[:, :, 0]))
    return static


# ----------------------- parameters -----------------------

def init_params(key):
    ks = jax.random.split(key, 5)

    def lin(k, fin, fout, scale=0.05):
        kw, kb = jax.random.split(k)
        return (scale * jax.random.normal(kw, (fin, fout), jnp.float32),
                scale * jax.random.normal(kb, (1, fout), jnp.float32))

    def level(k, fin, hid):
        # ResNet-stub pool+FC plus the rotation / translation 2-layer heads
        # (kept as separate dense GEMVs; no block-diagonal zero packing).
        k_res, k_r1, k_r2, k_t1, k_t2 = jax.random.split(k, 5)
        wr, br = lin(k_res, 10, fin)
        w1r, b1r = lin(k_r1, fin, hid)     # rotation head layer 1
        w2r, b2r = lin(k_r2, hid, 4)       # rotation head layer 2
        w1t, b1t = lin(k_t1, fin, hid)     # translation head layer 1
        w2t, b2t = lin(k_t2, hid, 3)       # translation head layer 2
        return (wr, br, w1r, b1r, w2r, b2r, w1t, b1t, w2t, b2t)

    p = {}
    p["seg"] = lin(ks[0], 5, 3)                    # SalsaNext logits head (1x1 conv)
    p["lvl1"] = level(ks[1], 64, 32)
    p["lvl2"] = level(ks[2], 128, 64)
    p["lvl3"] = level(ks[3], 256, 100)
    p["lvl4"] = level(ks[4], RESNET_OUTPUTS, 100)
    return p


# ----------------------- forward -----------------------

def odometry_forward(params, scan_1, scan_2, *, H, W):
    HW = H * W
    R = HW // LANES
    xyz_1 = scan_1[:3, :][None]                                    # (1, 3, N)
    xyz_2 = scan_2[:3, :][None]
    image_1, proj_point_1 = proj_image(xyz_1, H, W)
    image_2, proj_point_2 = proj_image(xyz_2, H, W)

    # TODO(synk): full SalsaNext encoder/decoder (ResContextBlock/ResBlock/UpBlock defs not
    #             provided); only its final 1x1-conv logits + softmax head runs (in Pallas).
    moving_label = seg_head(jnp.concatenate([image_1, image_2], axis=0), *params["seg"])
    moving_argmax = jnp.argmax(moving_label, axis=1)               # (2, H, W)

    static_pc_1 = del_moving_point(proj_point_1, moving_argmax[0:1], 0.5)
    static_pc_2 = del_moving_point(proj_point_2, moving_argmax[1:2], 0.5)
    # static_image_1's pooled stats are reproduced exactly by the identity warp
    # inside the level-1 kernel, so only its point cloud is kept.
    _, static_proj_point_1 = proj_image(static_pc_1, H, W)
    static_image_2, _ = proj_image(static_pc_2, H, W)

    # Loop-invariant pooled (1, 5) channel means, computed once (not per level).
    pooled_img2 = jnp.mean(image_2, axis=(2, 3))                   # (1, 5)
    pooled_simg2 = jnp.mean(static_image_2, axis=(2, 3))           # (1, 5)

    pc1 = static_proj_point_1.reshape(1, 3, R, LANES)              # (rows, 128) slabs

    # TODO(synk): models.resnet_modified.ResNetModified source not provided; replaced by a
    #             global-mean-pool + linear stub producing the same per-layer feature dims.
    q_id = jnp.array([[1.0, 0.0, 0.0, 0.0]], jnp.float32)
    t_zero = jnp.zeros((1, 3), jnp.float32)

    # Level 1: identity warp of static_pc_1 == pooled(static_image_1).
    l1_q, l1_t = warp_pool_fc(q_id, t_zero, pooled_simg2, pc1, params["lvl1"])

    # Levels 2-4: fused warp + pool + FC head; the warped image never hits HBM.
    l2_qd, l2_td = warp_pool_fc(l1_q, l1_t, pooled_img2, pc1, params["lvl2"])
    l2_q, l2_t = warp_det_result(l1_q, l1_t, l2_qd, l2_td)

    l3_qd, l3_td = warp_pool_fc(l2_q, l2_t, pooled_img2, pc1, params["lvl3"])
    l3_q, l3_t = warp_det_result(l2_q, l2_t, l3_qd, l3_td)

    l4_qd, l4_td = warp_pool_fc(l3_q, l3_t, pooled_img2, pc1, params["lvl4"])
    l4_q, l4_t = warp_det_result(l3_q, l3_t, l4_qd, l4_td)

    return (l1_q, l2_q, l3_q, l4_q), (l1_t, l2_t, l3_t, l4_t), moving_label


if __name__ == "__main__":
    H, W = 8, 256                     # vertical_cells, horizontal_cells (small)
    N = H * W                         # 2048 points per scan
    key = jax.random.PRNGKey(0)
    kp, k1, k2 = jax.random.split(key, 3)
    params = init_params(kp)
    scan_1 = jax.random.normal(k1, (4, N), jnp.float32)   # (xyz + remission, N)
    scan_2 = jax.random.normal(k2, (4, N), jnp.float32)

    fwd = jax.jit(functools.partial(odometry_forward, H=H, W=W))
    qs, ts, moving_label = fwd(params, scan_1, scan_2)
    jax.block_until_ready((qs, ts, moving_label))

    assert all(q.shape == (1, 4) for q in qs)
    assert all(t.shape == (1, 3) for t in ts)
    assert moving_label.shape == (2, 3, H, W)
    assert all(bool(jnp.all(jnp.isfinite(a))) for a in qs + ts)
    print("KERNEL_OK")
</pallas_src>

<mosaic_0001>
module attributes {stable_mosaic.version = 11 : i64} {
  func.func @_seg_head_kernel(%arg0: i32, %arg1: memref<1x5x16x128xf32, #tpu.memory_space<vmem>>, %arg2: memref<5x3xf32, #tpu.memory_space<smem>>, %arg3: memref<1x3xf32, #tpu.memory_space<smem>>, %arg4: memref<1x3x16x128xf32, #tpu.memory_space<vmem>>) attributes {dimension_semantics = [#tpu.dimension_semantics<parallel>], iteration_bounds = array<i64: 2>, scalar_prefetch = 0 : i64, scratch_operands = 0 : i64, tpu.core_type = #tpu.core_type<tc>, window_params = [{transform_indices = @transform_0, window_bounds = array<i64: 1, 5, 16, 128>}, {transform_indices = @transform_1, window_bounds = array<i64: 5, 3>}, {transform_indices = @transform_2, window_bounds = array<i64: 1, 3>}, {transform_indices = @transform_3, window_bounds = array<i64: 1, 3, 16, 128>}]} {
    %c0 = arith.constant 0 : index
    %c0_0 = arith.constant 0 : index
    %c0_1 = arith.constant 0 : index
    %c0_2 = arith.constant 0 : index
    %0 = vector.load %arg1[%c0, %c0_0, %c0_1, %c0_2] : memref<1x5x16x128xf32, #tpu.memory_space<vmem>>, vector<1x1x16x128xf32>
    %1 = vector.shape_cast %0 : vector<1x1x16x128xf32> to vector<16x128xf32>
    %c0_3 = arith.constant 0 : index
    %c0_4 = arith.constant 0 : index
    %2 = memref.load %arg2[%c0_3, %c0_4] : memref<5x3xf32, #tpu.memory_space<smem>>
    %3 = vector.broadcast %2 : f32 to vector<16x128xf32>
    %4 = arith.mulf %1, %3 : vector<16x128xf32>
    %c0_5 = arith.constant 0 : index
    %c1 = arith.constant 1 : index
    %c0_6 = arith.constant 0 : index
    %c0_7 = arith.constant 0 : index
    %5 = vector.load %arg1[%c0_5, %c1, %c0_6, %c0_7] : memref<1x5x16x128xf32, #tpu.memory_space<vmem>>, vector<1x1x16x128xf32>
    %6 = vector.shape_cast %5 : vector<1x1x16x128xf32> to vector<16x128xf32>
    %c1_8 = arith.constant 1 : index
    %c0_9 = arith.constant 0 : index
    %7 = memref.load %arg2[%c1_8, %c0_9] : memref<5x3xf32, #tpu.memory_space<smem>>
    %8 = vector.broadcast %7 : f32 to vector<16x128xf32>
    %9 = arith.mulf %6, %8 : vector<16x128xf32>
    %10 = arith.addf %4, %9 : vector<16x128xf32>
    %c0_10 = arith.constant 0 : index
    %c2 = arith.constant 2 : index
    %c0_11 = arith.constant 0 : index
    %c0_12 = arith.constant 0 : index
    %11 = vector.load %arg1[%c0_10, %c2, %c0_11, %c0_12] : memref<1x5x16x128xf32, #tpu.memory_space<vmem>>, vector<1x1x16x128xf32>
    %12 = vector.shape_cast %11 : vector<1x1x16x128xf32> to vector<16x128xf32>
    %c2_13 = arith.constant 2 : index
    %c0_14 = arith.constant 0 : index
    %13 = memref.load %arg2[%c2_13, %c0_14] : memref<5x3xf32, #tpu.memory_space<smem>>
    %14 = vector.broadcast %13 : f32 to vector<16x128xf32>
    %15 = arith.mulf %12, %14 : vector<16x128xf32>
    %16 = arith.addf %10, %15 : vector<16x128xf32>
    %c0_15 = arith.constant 0 : index
    %c3 = arith.constant 3 : index
    %c0_16 = arith.constant 0 : index
    %c0_17 = arith.constant 0 : index
    %17 = vector.load %arg1[%c0_15, %c3, %c0_16, %c0_17] : memref<1x5x16x128xf32, #tpu.memory_space<vmem>>, vector<1x1x16x128xf32>
    %18 = vector.shape_cast %17 : vector<1x1x16x128xf32> to vector<16x128xf32>
    %c3_18 = arith.constant 3 : index
    %c0_19 = arith.constant 0 : index
    %19 = memref.load %arg2[%c3_18, %c0_19] : memref<5x3xf32, #tpu.memory_space<smem>>
    %20 = vector.broadcast %19 : f32 to vector<16x128xf32>
    %21 = arith.mulf %18, %20 : vector<16x128xf32>
    %22 = arith.addf %16, %21 : vector<16x128xf32>
    %c0_20 = arith.constant 0 : index
    %c4 = arith.constant 4 : index
    %c0_21 = arith.constant 0 : index
    %c0_22 = arith.constant 0 : index
    %23 = vector.load %arg1[%c0_20, %c4, %c0_21, %c0_22] : memref<1x5x16x128xf32, #tpu.memory_space<vmem>>, vector<1x1x16x128xf32>
    %24 = vector.shape_cast %23 : vector<1x1x16x128xf32> to vector<16x128xf32>
    %c4_23 = arith.constant 4 : index
    %c0_24 = arith.constant 0 : index
    %25 = memref.load %arg2[%c4_23, %c0_24] : memref<5x3xf32, #tpu.memory_space<smem>>
    %26 = vector.broadcast %25 : f32 to vector<16x128xf32>
    %27 = arith.mulf %24, %26 : vector<16x128xf32>
    %28 = arith.addf %22, %27 : vector<16x128xf32>
    %c0_25 = arith.constant 0 : index
    %c0_26 = arith.constant 0 : index
    %29 = memref.load %arg3[%c0_25, %c0_26] : memref<1x3xf32, #tpu.memory_space<smem>>
    %30 = vector.broadcast %29 : f32 to vector<16x128xf32>
    %31 = arith.addf %28, %30 : vector<16x128xf32>
    %c0_27 = arith.constant 0 : index
    %c0_28 = arith.constant 0 : index
    %c0_29 = arith.constant 0 : index
    %c0_30 = arith.constant 0 : index
    %32 = vector.load %arg1[%c0_27, %c0_28, %c0_29, %c0_30] : memref<1x5x16x128xf32, #tpu.memory_space<vmem>>, vector<1x1x16x128xf32>
    %33 = vector.shape_cast %32 : vector<1x1x16x128xf32> to vector<16x128xf32>
    %c0_31 = arith.constant 0 : index
    %c1_32 = arith.constant 1 : index
    %34 = memref.load %arg2[%c0_31, %c1_32] : memref<5x3xf32, #tpu.memory_space<smem>>
    %35 = vector.broadcast %34 : f32 to vector<16x128xf32>
    %36 = arith.mulf %33, %35 : vector<16x128xf32>
    %c0_33 = arith.constant 0 : index
    %c1_34 = arith.constant 1 : index
    %c0_35 = arith.constant 0 : index
    %c0_36 = arith.constant 0 : index
    %37 = vector.load %arg1[%c0_33, %c1_34, %c0_35, %c0_36] : memref<1x5x16x128xf32, #tpu.memory_space<vmem>>, vector<1x1x16x128xf32>
    %38 = vector.shape_cast %37 : vector<1x1x16x128xf32> to vector<16x128xf32>
    %c1_37 = arith.constant 1 : index
    %c1_38 = arith.constant 1 : index
    %39 = memref.load %arg2[%c1_37, %c1_38] : memref<5x3xf32, #tpu.memory_space<smem>>
    %40 = vector.broadcast %39 : f32 to vector<16x128xf32>
    %41 = arith.mulf %38, %40 : vector<16x128xf32>
    %42 = arith.addf %36, %41 : vector<16x128xf32>
    %c0_39 = arith.constant 0 : index
    %c2_40 = arith.constant 2 : index
    %c0_41 = arith.constant 0 : index
    %c0_42 = arith.constant 0 : index
    %43 = vector.load %arg1[%c0_39, %c2_40, %c0_41, %c0_42] : memref<1x5x16x128xf32, #tpu.memory_space<vmem>>, vector<1x1x16x128xf32>
    %44 = vector.shape_cast %43 : vector<1x1x16x128xf32> to vector<16x128xf32>
    %c2_43 = arith.constant 2 : index
    %c1_44 = arith.constant 1 : index
    %45 = memref.load %arg2[%c2_43, %c1_44] : memref<5x3xf32, #tpu.memory_space<smem>>
    %46 = vector.broadcast %45 : f32 to vector<16x128xf32>
    %47 = arith.mulf %44, %46 : vector<16x128xf32>
    %48 = arith.addf %42, %47 : vector<16x128xf32>
    %c0_45 = arith.constant 0 : index
    %c3_46 = arith.constant 3 : index
    %c0_47 = arith.constant 0 : index
    %c0_48 = arith.constant 0 : index
    %49 = vector.load %arg1[%c0_45, %c3_46, %c0_47, %c0_48] : memref<1x5x16x128xf32, #tpu.memory_space<vmem>>, vector<1x1x16x128xf32>
    %50 = vector.shape_cast %49 : vector<1x1x16x128xf32> to vector<16x128xf32>
    %c3_49 = arith.constant 3 : index
    %c1_50 = arith.constant 1 : index
    %51 = memref.load %arg2[%c3_49, %c1_50] : memref<5x3xf32, #tpu.memory_space<smem>>
    %52 = vector.broadcast %51 : f32 to vector<16x128xf32>
    %53 = arith.mulf %50, %52 : vector<16x128xf32>
    %54 = arith.addf %48, %53 : vector<16x128xf32>
    %c0_51 = arith.constant 0 : index
    %c4_52 = arith.constant 4 : index
    %c0_53 = arith.constant 0 : index
    %c0_54 = arith.constant 0 : index
    %55 = vector.load %arg1[%c0_51, %c4_52, %c0_53, %c0_54] : memref<1x5x16x128xf32, #tpu.memory_space<vmem>>, vector<1x1x16x128xf32>
    %56 = vector.shape_cast %55 : vector<1x1x16x128xf32> to vector<16x128xf32>
    %c4_55 = arith.constant 4 : index
    %c1_56 = arith.constant 1 : index
    %57 = memref.load %arg2[%c4_55, %c1_56] : memref<5x3xf32, #tpu.memory_space<smem>>
    %58 = vector.broadcast %57 : f32 to vector<16x128xf32>
    %59 = arith.mulf %56, %58 : vector<16x128xf32>
    %60 = arith.addf %54, %59 : vector<16x128xf32>
    %c0_57 = arith.constant 0 : index
    %c1_58 = arith.constant 1 : index
    %61 = memref.load %arg3[%c0_57, %c1_58] : memref<1x3xf32, #tpu.memory_space<smem>>
    %62 = vector.broadcast %61 : f32 to vector<16x128xf32>
    %63 = arith.addf %60, %62 : vector<16x128xf32>
    %c0_59 = arith.constant 0 : index
    %c0_60 = arith.constant 0 : index
    %c0_61 = arith.constant 0 : index
    %c0_62 = arith.constant 0 : index
    %64 = vector.load %arg1[%c0_59, %c0_60, %c0_61, %c0_62] : memref<1x5x16x128xf32, #tpu.memory_space<vmem>>, vector<1x1x16x128xf32>
    %65 = vector.shape_cast %64 : vector<1x1x16x128xf32> to vector<16x128xf32>
    %c0_63 = arith.constant 0 : index
    %c2_64 = arith.constant 2 : index
    %66 = memref.load %arg2[%c0_63, %c2_64] : memref<5x3xf32, #tpu.memory_space<smem>>
    %67 = vector.broadcast %66 : f32 to vector<16x128xf32>
    %68 = arith.mulf %65, %67 : vector<16x128xf32>
    %c0_65 = arith.constant 0 : index
    %c1_66 = arith.constant 1 : index
    %c0_67 = arith.constant 0 : index
    %c0_68 = arith.constant 0 : index
    %69 = vector.load %arg1[%c0_65, %c1_66, %c0_67, %c0_68] : memref<1x5x16x128xf32, #tpu.memory_space<vmem>>, vector<1x1x16x128xf32>
    %70 = vector.shape_cast %69 : vector<1x1x16x128xf32> to vector<16x128xf32>
    %c1_69 = arith.constant 1 : index
    %c2_70 = arith.constant 2 : index
    %71 = memref.load %arg2[%c1_69, %c2_70] : memref<5x3xf32, #tpu.memory_space<smem>>
    %72 = vector.broadcast %71 : f32 to vector<16x128xf32>
    %73 = arith.mulf %70, %72 : vector<16x128xf32>
    %74 = arith.addf %68, %73 : vector<16x128xf32>
    %c0_71 = arith.constant 0 : index
    %c2_72 = arith.constant 2 : index
    %c0_73 = arith.constant 0 : index
    %c0_74 = arith.constant 0 : index
    %75 = vector.load %arg1[%c0_71, %c2_72, %c0_73, %c0_74] : memref<1x5x16x128xf32, #tpu.memory_space<vmem>>, vector<1x1x16x128xf32>
    %76 = vector.shape_cast %75 : vector<1x1x16x128xf32> to vector<16x128xf32>
    %c2_75 = arith.constant 2 : index
    %c2_76 = arith.constant 2 : index
    %77 = memref.load %arg2[%c2_75, %c2_76] : memref<5x3xf32, #tpu.memory_space<smem>>
    %78 = vector.broadcast %77 : f32 to vector<16x128xf32>
    %79 = arith.mulf %76, %78 : vector<16x128xf32>
    %80 = arith.addf %74, %79 : vector<16x128xf32>
    %c0_77 = arith.constant 0 : index
    %c3_78 = arith.constant 3 : index
    %c0_79 = arith.constant 0 : index
    %c0_80 = arith.constant 0 : index
    %81 = vector.load %arg1[%c0_77, %c3_78, %c0_79, %c0_80] : memref<1x5x16x128xf32, #tpu.memory_space<vmem>>, vector<1x1x16x128xf32>
    %82 = vector.shape_cast %81 : vector<1x1x16x128xf32> to vector<16x128xf32>
    %c3_81 = arith.constant 3 : index
    %c2_82 = arith.constant 2 : index
    %83 = memref.load %arg2[%c3_81, %c2_82] : memref<5x3xf32, #tpu.memory_space<smem>>
    %84 = vector.broadcast %83 : f32 to vector<16x128xf32>
    %85 = arith.mulf %82, %84 : vector<16x128xf32>
    %86 = arith.addf %80, %85 : vector<16x128xf32>
    %c0_83 = arith.constant 0 : index
    %c4_84 = arith.constant 4 : index
    %c0_85 = arith.constant 0 : index
    %c0_86 = arith.constant 0 : index
    %87 = vector.load %arg1[%c0_83, %c4_84, %c0_85, %c0_86] : memref<1x5x16x128xf32, #tpu.memory_space<vmem>>, vector<1x1x16x128xf32>
    %88 = vector.shape_cast %87 : vector<1x1x16x128xf32> to vector<16x128xf32>
    %c4_87 = arith.constant 4 : index
    %c2_88 = arith.constant 2 : index
    %89 = memref.load %arg2[%c4_87, %c2_88] : memref<5x3xf32, #tpu.memory_space<smem>>
    %90 = vector.broadcast %89 : f32 to vector<16x128xf32>
    %91 = arith.mulf %88, %90 : vector<16x128xf32>
    %92 = arith.addf %86, %91 : vector<16x128xf32>
    %c0_89 = arith.constant 0 : index
    %c2_90 = arith.constant 2 : index
    %93 = memref.load %arg3[%c0_89, %c2_90] : memref<1x3xf32, #tpu.memory_space<smem>>
    %94 = vector.broadcast %93 : f32 to vector<16x128xf32>
    %95 = arith.addf %92, %94 : vector<16x128xf32>
    %96 = arith.maximumf %31, %63 : vector<16x128xf32>
    %97 = arith.maximumf %96, %95 : vector<16x128xf32>
    %98 = arith.subf %31, %97 : vector<16x128xf32>
    %99 = math.exp %98 : vector<16x128xf32>
    %100 = arith.subf %63, %97 : vector<16x128xf32>
    %101 = math.exp %100 : vector<16x128xf32>
    %102 = arith.subf %95, %97 : vector<16x128xf32>
    %103 = math.exp %102 : vector<16x128xf32>
    %104 = arith.addf %99, %101 : vector<16x128xf32>
    %105 = arith.addf %104, %103 : vector<16x128xf32>
    %106 = tpu.reciprocal %105 {approx = true} : vector<16x128xf32> -> vector<16x128xf32>
    %107 = arith.mulf %99, %106 : vector<16x128xf32>
    %c0_91 = arith.constant 0 : index
    %c0_92 = arith.constant 0 : index
    %c0_93 = arith.constant 0 : index
    %c0_94 = arith.constant 0 : index
    %108 = vector.load %arg4[%c0_91, %c0_92, %c0_93, %c0_94] : memref<1x3x16x128xf32, #tpu.memory_space<vmem>>, vector<1x1x16x128xf32>
    %109 = vector.shape_cast %108 : vector<1x1x16x128xf32> to vector<16x128xf32>
    %110 = vector.shape_cast %107 : vector<16x128xf32> to vector<1x1x16x128xf32>
    tpu.vector_store %arg4[%c0_91, %c0_92, %c0_93, %c0_94], %110 {strides = array<i32>} : memref<1x3x16x128xf32, #tpu.memory_space<vmem>>, vector<1x1x16x128xf32>,
    %111 = arith.mulf %101, %106 : vector<16x128xf32>
    %c0_95 = arith.constant 0 : index
    %c1_96 = arith.constant 1 : index
    %c0_97 = arith.constant 0 : index
    %c0_98 = arith.constant 0 : index
    %112 = vector.load %arg4[%c0_95, %c1_96, %c0_97, %c0_98] : memref<1x3x16x128xf32, #tpu.memory_space<vmem>>, vector<1x1x16x128xf32>
    %113 = vector.shape_cast %112 : vector<1x1x16x128xf32> to vector<16x128xf32>
    %114 = vector.shape_cast %111 : vector<16x128xf32> to vector<1x1x16x128xf32>
    tpu.vector_store %arg4[%c0_95, %c1_96, %c0_97, %c0_98], %114 {strides = array<i32>} : memref<1x3x16x128xf32, #tpu.memory_space<vmem>>, vector<1x1x16x128xf32>,
    %115 = arith.mulf %103, %106 : vector<16x128xf32>
    %c0_99 = arith.constant 0 : index
    %c2_100 = arith.constant 2 : index
    %c0_101 = arith.constant 0 : index
    %c0_102 = arith.constant 0 : index
    %116 = vector.load %arg4[%c0_99, %c2_100, %c0_101, %c0_102] : memref<1x3x16x128xf32, #tpu.memory_space<vmem>>, vector<1x1x16x128xf32>
    %117 = vector.shape_cast %116 : vector<1x1x16x128xf32> to vector<16x128xf32>
    %118 = vector.shape_cast %115 : vector<16x128xf32> to vector<1x1x16x128xf32>
    tpu.vector_store %arg4[%c0_99, %c2_100, %c0_101, %c0_102], %118 {strides = array<i32>} : memref<1x3x16x128xf32, #tpu.memory_space<vmem>>, vector<1x1x16x128xf32>,
    return
  }
  func.func @transform_0(%arg0: i32) -> (i32, i32, i32, i32) {
    %c0_i32 = arith.constant 0 : i32
    %c0_i32_0 = arith.constant 0 : i32
    %c0_i32_1 = arith.constant 0 : i32
    %c0_i32_2 = arith.constant 0 : i32
    return %arg0, %c0_i32, %c0_i32_0, %c0_i32_1 : i32, i32, i32, i32
  }
  func.func @transform_1(%arg0: i32) -> (i32, i32) {
    %c0_i32 = arith.constant 0 : i32
    %c0_i32_0 = arith.constant 0 : i32
    %c0_i32_1 = arith.constant 0 : i32
    return %c0_i32, %c0_i32_0 : i32, i32
  }
  func.func @transform_2(%arg0: i32) -> (i32, i32) {
    %c0_i32 = arith.constant 0 : i32
    %c0_i32_0 = arith.constant 0 : i32
    %c0_i32_1 = arith.constant 0 : i32
    return %c0_i32, %c0_i32_0 : i32, i32
  }
  func.func @transform_3(%arg0: i32) -> (i32, i32, i32, i32) {
    %c0_i32 = arith.constant 0 : i32
    %c0_i32_0 = arith.constant 0 : i32
    %c0_i32_1 = arith.constant 0 : i32
    %c0_i32_2 = arith.constant 0 : i32
    return %arg0, %c0_i32, %c0_i32_0, %c0_i32_1 : i32, i32, i32, i32
  }
}

module attributes {stable_mosaic.version = 11 : i64} {
  func.func @_warp_pool_fc_kernel(%arg0: i32, %arg1: memref<1x4xf32, #tpu.memory_space<smem>>, %arg2: memref<1x3xf32, #tpu.memory_space<smem>>, %arg3: memref<1x5xf32, #tpu.memory_space<smem>>, %arg4: memref<1x3x16x128xf32, #tpu.memory_space<vmem>>, %arg5: memref<10x64xf32, #tpu.memory_space<vmem>>, %arg6: memref<1x64xf32, #tpu.memory_space<vmem>>, %arg7: memref<64x32xf32, #tpu.memory_space<vmem>>, %arg8: memref<1x32xf32, #tpu.memory_space<vmem>>, %arg9: memref<32x4xf32, #tpu.memory_space<vmem>>, %arg10: memref<1x4xf32, #tpu.memory_space<vmem>>, %arg11: memref<64x32xf32, #tpu.memory_space<vmem>>, %arg12: memref<1x32xf32, #tpu.memory_space<vmem>>, %arg13: memref<32x3xf32, #tpu.memory_space<vmem>>, %arg14: memref<1x3xf32, #tpu.memory_space<vmem>>, %arg15: memref<1x4xf32, #tpu.memory_space<vmem>>, %arg16: memref<1x3xf32, #tpu.memory_space<vmem>>) attributes {dimension_semantics = [#tpu.dimension_semantics<arbitrary>], iteration_bounds = array<i64: 1>, scalar_prefetch = 0 : i64, scratch_operands = 0 : i64, tpu.core_type = #tpu.core_type<tc>, window_params = [{transform_indices = @transform_0, window_bounds = array<i64: 1, 4>}, {transform_indices = @transform_1, window_bounds = array<i64: 1, 3>}, {transform_indices = @transform_2, window_bounds = array<i64: 1, 5>}, {pipeline_mode = #tpu.pipeline_mode<synchronous>, transform_indices = @transform_3, window_bounds = array<i64: 1, 3, 16, 128>}, {pipeline_mode = #tpu.pipeline_mode<synchronous>, transform_indices = @transform_4, window_bounds = array<i64: 10, 64>}, {pipeline_mode = #tpu.pipeline_mode<synchronous>, transform_indices = @transform_5, window_bounds = array<i64: 1, 64>}, {pipeline_mode = #tpu.pipeline_mode<synchronous>, transform_indices = @transform_6, window_bounds = array<i64: 64, 32>}, {pipeline_mode = #tpu.pipeline_mode<synchronous>, transform_indices = @transform_7, window_bounds = array<i64: 1, 32>}, {pipeline_mode = #tpu.pipeline_mode<synchronous>, transform_indices = @transform_8, window_bounds = array<i64: 32, 4>}, {pipeline_mode = #tpu.pipeline_mode<synchronous>, transform_indices = @transform_9, window_bounds = array<i64: 1, 4>}, {pipeline_mode = #tpu.pipeline_mode<synchronous>, transform_indices = @transform_10, window_bounds = array<i64: 64, 32>}, {pipeline_mode = #tpu.pipeline_mode<synchronous>, transform_indices = @transform_11, window_bounds = array<i64: 1, 32>}, {pipeline_mode = #tpu.pipeline_mode<synchronous>, transform_indices = @transform_12, window_bounds = array<i64: 32, 3>}, {pipeline_mode = #tpu.pipeline_mode<synchronous>, transform_indices = @transform_13, window_bounds = array<i64: 1, 3>}, {pipeline_mode = #tpu.pipeline_mode<synchronous>, transform_indices = @transform_14, window_bounds = array<i64: 1, 4>}, {pipeline_mode = #tpu.pipeline_mode<synchronous>, transform_indices = @transform_15, window_bounds = array<i64: 1, 3>}]} {
    %c0 = arith.constant 0 : index
    %c0_0 = arith.constant 0 : index
    %0 = memref.load %arg1[%c0, %c0_0] : memref<1x4xf32, #tpu.memory_space<smem>>
    %c0_1 = arith.constant 0 : index
    %c1 = arith.constant 1 : index
    %1 = memref.load %arg1[%c0_1, %c1] : memref<1x4xf32, #tpu.memory_space<smem>>
    %c0_2 = arith.constant 0 : index
    %c2 = arith.constant 2 : index
    %2 = memref.load %arg1[%c0_2, %c2] : memref<1x4xf32, #tpu.memory_space<smem>>
    %c0_3 = arith.constant 0 : index
    %c3 = arith.constant 3 : index
    %3 = memref.load %arg1[%c0_3, %c3] : memref<1x4xf32, #tpu.memory_space<smem>>
    %4 = arith.mulf %0, %0 : f32
    %5 = arith.mulf %1, %1 : f32
    %6 = arith.addf %4, %5 : f32
    %7 = arith.mulf %2, %2 : f32
    %8 = arith.addf %6, %7 : f32
    %9 = arith.mulf %3, %3 : f32
    %10 = arith.addf %8, %9 : f32
    %c0_4 = arith.constant 0 : index
    %c0_5 = arith.constant 0 : index
    %c0_6 = arith.constant 0 : index
    %c0_7 = arith.constant 0 : index
    %11 = vector.load %arg4[%c0_4, %c0_5, %c0_6, %c0_7] : memref<1x3x16x128xf32, #tpu.memory_space<vmem>>, vector<1x1x16x128xf32>
    %12 = vector.shape_cast %11 : vector<1x1x16x128xf32> to vector<16x128xf32>
    %c0_8 = arith.constant 0 : index
    %c1_9 = arith.constant 1 : index
    %c0_10 = arith.constant 0 : index
    %c0_11 = arith.constant 0 : index
    %13 = vector.load %arg4[%c0_8, %c1_9, %c0_10, %c0_11] : memref<1x3x16x128xf32, #tpu.memory_space<vmem>>, vector<1x1x16x128xf32>
    %14 = vector.shape_cast %13 : vector<1x1x16x128xf32> to vector<16x128xf32>
    %c0_12 = arith.constant 0 : index
    %c2_13 = arith.constant 2 : index
    %c0_14 = arith.constant 0 : index
    %c0_15 = arith.constant 0 : index
    %15 = vector.load %arg4[%c0_12, %c2_13, %c0_14, %c0_15] : memref<1x3x16x128xf32, #tpu.memory_space<vmem>>, vector<1x1x16x128xf32>
    %16 = vector.shape_cast %15 : vector<1x1x16x128xf32> to vector<16x128xf32>
    %cst = arith.constant 0.000000e+00 : f32
    %17 = arith.subf %cst, %1 : f32
    %18 = vector.broadcast %17 : f32 to vector<16x128xf32>
    %19 = arith.mulf %18, %12 : vector<16x128xf32>
    %20 = vector.broadcast %2 : f32 to vector<16x128xf32>
    %21 = arith.mulf %20, %14 : vector<16x128xf32>
    %22 = arith.subf %19, %21 : vector<16x128xf32>
    %23 = vector.broadcast %3 : f32 to vector<16x128xf32>
    %24 = arith.mulf %23, %16 : vector<16x128xf32>
    %25 = arith.subf %22, %24 : vector<16x128xf32>
    %26 = vector.broadcast %0 : f32 to vector<16x128xf32>
    %27 = arith.mulf %26, %12 : vector<16x128xf32>
    %28 = vector.broadcast %2 : f32 to vector<16x128xf32>
    %29 = arith.mulf %28, %16 : vector<16x128xf32>
    %30 = arith.addf %27, %29 : vector<16x128xf32>
    %31 = vector.broadcast %3 : f32 to vector<16x128xf32>
    %32 = arith.mulf %31, %14 : vector<16x128xf32>
    %33 = arith.subf %30, %32 : vector<16x128xf32>
    %34 = vector.broadcast %0 : f32 to vector<16x128xf32>
    %35 = arith.mulf %34, %14 : vector<16x128xf32>
    %36 = vector.broadcast %3 : f32 to vector<16x128xf32>
    %37 = arith.mulf %36, %12 : vector<16x128xf32>
    %38 = arith.addf %35, %37 : vector<16x128xf32>
    %39 = vector.broadcast %1 : f32 to vector<16x128xf32>
    %40 = arith.mulf %39, %16 : vector<16x128xf32>
    %41 = arith.subf %38, %40 : vector<16x128xf32>
    %42 = vector.broadcast %0 : f32 to vector<16x128xf32>
    %43 = arith.mulf %42, %16 : vector<16x128xf32>
    %44 = vector.broadcast %1 : f32 to vector<16x128xf32>
    %45 = arith.mulf %44, %14 : vector<16x128xf32>
    %46 = arith.addf %43, %45 : vector<16x128xf32>
    %47 = vector.broadcast %2 : f32 to vector<16x128xf32>
    %48 = arith.mulf %47, %12 : vector<16x128xf32>
    %49 = arith.subf %46, %48 : vector<16x128xf32>
    %cst_16 = arith.constant 0.000000e+00 : f32
    %50 = vector.broadcast %cst_16 : f32 to vector<16x128xf32>
    %51 = arith.subf %50, %25 : vector<16x128xf32>
    %52 = vector.broadcast %1 : f32 to vector<16x128xf32>
    %53 = arith.mulf %51, %52 : vector<16x128xf32>
    %54 = vector.broadcast %0 : f32 to vector<16x128xf32>
    %55 = arith.mulf %33, %54 : vector<16x128xf32>
    %56 = arith.addf %53, %55 : vector<16x128xf32>
    %57 = vector.broadcast %3 : f32 to vector<16x128xf32>
    %58 = arith.mulf %41, %57 : vector<16x128xf32>
    %59 = arith.subf %56, %58 : vector<16x128xf32>
    %60 = vector.broadcast %2 : f32 to vector<16x128xf32>
    %61 = arith.mulf %49, %60 : vector<16x128xf32>
    %62 = arith.addf %59, %61 : vector<16x128xf32>
    %63 = vector.broadcast %10 : f32 to vector<16x128xf32>
    %64 = arith.divf %62, %63 : vector<16x128xf32>
    %c0_17 = arith.constant 0 : index
    %c0_18 = arith.constant 0 : index
    %65 = memref.load %arg2[%c0_17, %c0_18] : memref<1x3xf32, #tpu.memory_space<smem>>
    %66 = vector.broadcast %65 : f32 to vector<16x128xf32>
    %67 = arith.addf %64, %66 : vector<16x128xf32>
    %cst_19 = arith.constant 0.000000e+00 : f32
    %68 = vector.broadcast %cst_19 : f32 to vector<16x128xf32>
    %69 = arith.subf %68, %25 : vector<16x128xf32>
    %70 = vector.broadcast %2 : f32 to vector<16x128xf32>
    %71 = arith.mulf %69, %70 : vector<16x128xf32>
    %72 = vector.broadcast %3 : f32 to vector<16x128xf32>
    %73 = arith.mulf %33, %72 : vector<16x128xf32>
    %74 = arith.addf %71, %73 : vector<16x128xf32>
    %75 = vector.broadcast %0 : f32 to vector<16x128xf32>
    %76 = arith.mulf %41, %75 : vector<16x128xf32>
    %77 = arith.addf %74, %76 : vector<16x128xf32>
    %78 = vector.broadcast %1 : f32 to vector<16x128xf32>
    %79 = arith.mulf %49, %78 : vector<16x128xf32>
    %80 = arith.subf %77, %79 : vector<16x128xf32>
    %81 = vector.broadcast %10 : f32 to vector<16x128xf32>
    %82 = arith.divf %80, %81 : vector<16x128xf32>
    %c0_20 = arith.constant 0 : index
    %c1_21 = arith.constant 1 : index
    %83 = memref.load %arg2[%c0_20, %c1_21] : memref<1x3xf32, #tpu.memory_space<smem>>
    %84 = vector.broadcast %83 : f32 to vector<16x128xf32>
    %85 = arith.addf %82, %84 : vector<16x128xf32>
    %cst_22 = arith.constant 0.000000e+00 : f32
    %86 = vector.broadcast %cst_22 : f32 to vector<16x128xf32>
    %87 = arith.subf %86, %25 : vector<16x128xf32>
    %88 = vector.broadcast %3 : f32 to vector<16x128xf32>
    %89 = arith.mulf %87, %88 : vector<16x128xf32>
    %90 = vector.broadcast %2 : f32 to vector<16x128xf32>
    %91 = arith.mulf %33, %90 : vector<16x128xf32>
    %92 = arith.subf %89, %91 : vector<16x128xf32>
    %93 = vector.broadcast %1 : f32 to vector<16x128xf32>
    %94 = arith.mulf %41, %93 : vector<16x128xf32>
    %95 = arith.addf %92, %94 : vector<16x128xf32>
    %96 = vector.broadcast %0 : f32 to vector<16x128xf32>
    %97 = arith.mulf %49, %96 : vector<16x128xf32>
    %98 = arith.addf %95, %97 : vector<16x128xf32>
    %99 = vector.broadcast %10 : f32 to vector<16x128xf32>
    %100 = arith.divf %98, %99 : vector<16x128xf32>
    %c0_23 = arith.constant 0 : index
    %c2_24 = arith.constant 2 : index
    %101 = memref.load %arg2[%c0_23, %c2_24] : memref<1x3xf32, #tpu.memory_space<smem>>
    %102 = vector.broadcast %101 : f32 to vector<16x128xf32>
    %103 = arith.addf %100, %102 : vector<16x128xf32>
    %104 = arith.mulf %67, %67 : vector<16x128xf32>
    %105 = arith.mulf %85, %85 : vector<16x128xf32>
    %106 = arith.addf %104, %105 : vector<16x128xf32>
    %107 = arith.mulf %103, %103 : vector<16x128xf32>
    %108 = arith.addf %106, %107 : vector<16x128xf32>
    %109 = math.sqrt %108 : vector<16x128xf32>
    %110 = vector.shape_cast %109 : vector<16x128xf32> to vector<1x16x128xf32>
    %cst_25 = arith.constant dense<0.000000e+00> : vector<1xf32>
    %111 = vector.multi_reduction <add>, %110, %cst_25 [1, 2] : vector<1x16x128xf32> to vector<1xf32>
    %112 = vector.shape_cast %111 : vector<1xf32> to vector<1x1x1xf32>
    %113 = vector.extract %112[0, 0, 0] : f32 from vector<1x1x1xf32>
    %cst_26 = arith.constant 4.8828125E-4 : f32
    %114 = arith.mulf %113, %cst_26 : f32
    %115 = vector.shape_cast %67 : vector<16x128xf32> to vector<1x16x128xf32>
    %cst_27 = arith.constant dense<0.000000e+00> : vector<1xf32>
    %116 = vector.multi_reduction <add>, %115, %cst_27 [1, 2] : vector<1x16x128xf32> to vector<1xf32>
    %117 = vector.shape_cast %116 : vector<1xf32> to vector<1x1x1xf32>
    %118 = vector.extract %117[0, 0, 0] : f32 from vector<1x1x1xf32>
    %cst_28 = arith.constant 4.8828125E-4 : f32
    %119 = arith.mulf %118, %cst_28 : f32
    %120 = vector.shape_cast %85 : vector<16x128xf32> to vector<1x16x128xf32>
    %cst_29 = arith.constant dense<0.000000e+00> : vector<1xf32>
    %121 = vector.multi_reduction <add>, %120, %cst_29 [1, 2] : vector<1x16x128xf32> to vector<1xf32>
    %122 = vector.shape_cast %121 : vector<1xf32> to vector<1x1x1xf32>
    %123 = vector.extract %122[0, 0, 0] : f32 from vector<1x1x1xf32>
    %cst_30 = arith.constant 4.8828125E-4 : f32
    %124 = arith.mulf %123, %cst_30 : f32
    %125 = vector.shape_cast %103 : vector<16x128xf32> to vector<1x16x128xf32>
    %cst_31 = arith.constant dense<0.000000e+00> : vector<1xf32>
    %126 = vector.multi_reduction <add>, %125, %cst_31 [1, 2] : vector<1x16x128xf32> to vector<1xf32>
    %127 = vector.shape_cast %126 : vector<1xf32> to vector<1x1x1xf32>
    %128 = vector.extract %127[0, 0, 0] : f32 from vector<1x1x1xf32>
    %cst_32 = arith.constant 4.8828125E-4 : f32
    %129 = arith.mulf %128, %cst_32 : f32
    %c0_33 = arith.constant 0 : index
    %c0_34 = arith.constant 0 : index
    %130 = vector.load %arg5[%c0_33, %c0_34] : memref<10x64xf32, #tpu.memory_space<vmem>>, vector<1x64xf32>
    %131 = vector.broadcast %114 : f32 to vector<1x64xf32>
    %132 = arith.mulf %131, %130 : vector<1x64xf32>
    %c1_35 = arith.constant 1 : index
    %c0_36 = arith.constant 0 : index
    %133 = vector.load %arg5[%c1_35, %c0_36] : memref<10x64xf32, #tpu.memory_space<vmem>>, vector<1x64xf32>
    %134 = vector.broadcast %119 : f32 to vector<1x64xf32>
    %135 = arith.mulf %134, %133 : vector<1x64xf32>
    %136 = arith.addf %132, %135 : vector<1x64xf32>
    %c2_37 = arith.constant 2 : index
    %c0_38 = arith.constant 0 : index
    %137 = vector.load %arg5[%c2_37, %c0_38] : memref<10x64xf32, #tpu.memory_space<vmem>>, vector<1x64xf32>
    %138 = vector.broadcast %124 : f32 to vector<1x64xf32>
    %139 = arith.mulf %138, %137 : vector<1x64xf32>
    %140 = arith.addf %136, %139 : vector<1x64xf32>
    %c3_39 = arith.constant 3 : index
    %c0_40 = arith.constant 0 : index
    %141 = vector.load %arg5[%c3_39, %c0_40] : memref<10x64xf32, #tpu.memory_space<vmem>>, vector<1x64xf32>
    %142 = vector.broadcast %129 : f32 to vector<1x64xf32>
    %143 = arith.mulf %142, %141 : vector<1x64xf32>
    %144 = arith.addf %140, %143 : vector<1x64xf32>
    %c0_41 = arith.constant 0 : index
    %c0_42 = arith.constant 0 : index
    %145 = memref.load %arg3[%c0_41, %c0_42] : memref<1x5xf32, #tpu.memory_space<smem>>
    %c5 = arith.constant 5 : index
    %c0_43 = arith.constant 0 : index
    %146 = vector.load %arg5[%c5, %c0_43] : memref<10x64xf32, #tpu.memory_space<vmem>>, vector<1x64xf32>
    %147 = vector.broadcast %145 : f32 to vector<1x64xf32>
    %148 = arith.mulf %147, %146 : vector<1x64xf32>
    %149 = arith.addf %144, %148 : vector<1x64xf32>
    %c0_44 = arith.constant 0 : index
    %c1_45 = arith.constant 1 : index
    %150 = memref.load %arg3[%c0_44, %c1_45] : memref<1x5xf32, #tpu.memory_space<smem>>
    %c6 = arith.constant 6 : index
    %c0_46 = arith.constant 0 : index
    %151 = vector.load %arg5[%c6, %c0_46] : memref<10x64xf32, #tpu.memory_space<vmem>>, vector<1x64xf32>
    %152 = vector.broadcast %150 : f32 to vector<1x64xf32>
    %153 = arith.mulf %152, %151 : vector<1x64xf32>
    %154 = arith.addf %149, %153 : vector<1x64xf32>
    %c0_47 = arith.constant 0 : index
    %c2_48 = arith.constant 2 : index
    %155 = memref.load %arg3[%c0_47, %c2_48] : memref<1x5xf32, #tpu.memory_space<smem>>
    %c7 = arith.constant 7 : index
    %c0_49 = arith.constant 0 : index
    %156 = vector.load %arg5[%c7, %c0_49] : memref<10x64xf32, #tpu.memory_space<vmem>>, vector<1x64xf32>
    %157 = vector.broadcast %155 : f32 to vector<1x64xf32>
    %158 = arith.mulf %157, %156 : vector<1x64xf32>
    %159 = arith.addf %154, %158 : vector<1x64xf32>
    %c0_50 = arith.constant 0 : index
    %c3_51 = arith.constant 3 : index
    %160 = memref.load %arg3[%c0_50, %c3_51] : memref<1x5xf32, #tpu.memory_space<smem>>
    %c8 = arith.constant 8 : index
    %c0_52 = arith.constant 0 : index
    %161 = vector.load %arg5[%c8, %c0_52] : memref<10x64xf32, #tpu.memory_space<vmem>>, vector<1x64xf32>
    %162 = vector.broadcast %160 : f32 to vector<1x64xf32>
    %163 = arith.mulf %162, %161 : vector<1x64xf32>
    %164 = arith.addf %159, %163 : vector<1x64xf32>
    %c0_53 = arith.constant 0 : index
    %c4 = arith.constant 4 : index
    %165 = memref.load %arg3[%c0_53, %c4] : memref<1x5xf32, #tpu.memory_space<smem>>
    %c9 = arith.constant 9 : index
    %c0_54 = arith.constant 0 : index
    %166 = vector.load %arg5[%c9, %c0_54] : memref<10x64xf32, #tpu.memory_space<vmem>>, vector<1x64xf32>
    %167 = vector.broadcast %165 : f32 to vector<1x64xf32>
    %168 = arith.mulf %167, %166 : vector<1x64xf32>
    %169 = arith.addf %164, %168 : vector<1x64xf32>
    %c0_55 = arith.constant 0 : index
    %c0_56 = arith.constant 0 : index
    %170 = vector.load %arg6[%c0_55, %c0_56] : memref<1x64xf32, #tpu.memory_space<vmem>>, vector<1x64xf32>
    %171 = arith.addf %169, %170 : vector<1x64xf32>
    %cst_57 = arith.constant 0.000000e+00 : f32
    %172 = vector.broadcast %cst_57 : f32 to vector<1x64xf32>
    %173 = arith.maximumf %171, %172 : vector<1x64xf32>
    %c0_58 = arith.constant 0 : index
    %c0_59 = arith.constant 0 : index
    %174 = vector.load %arg7[%c0_58, %c0_59] : memref<64x32xf32, #tpu.memory_space<vmem>>, vector<64x32xf32>
    %cst_60 = arith.constant dense<0.000000e+00> : vector<1x32xf32>
    %175 = tpu.matmul %173, %174, %cst_60 {dimension_numbers = #tpu.dot_dimension_numbers<[1], [0], [0], [1], [0, 0, 1, 1], [], []>} : vector<1x64xf32>, vector<64x32xf32>, vector<1x32xf32> -> vector<1x32xf32>
    %c0_61 = arith.constant 0 : index
    %c0_62 = arith.constant 0 : index
    %176 = vector.load %arg8[%c0_61, %c0_62] : memref<1x32xf32, #tpu.memory_space<vmem>>, vector<1x32xf32>
    %177 = arith.addf %175, %176 : vector<1x32xf32>
    %cst_63 = arith.constant 0.000000e+00 : f32
    %178 = vector.broadcast %cst_63 : f32 to vector<1x32xf32>
    %179 = arith.maximumf %177, %178 : vector<1x32xf32>
    %c0_64 = arith.constant 0 : index
    %c0_65 = arith.constant 0 : index
    %180 = vector.load %arg11[%c0_64, %c0_65] : memref<64x32xf32, #tpu.memory_space<vmem>>, vector<64x32xf32>
    %cst_66 = arith.constant dense<0.000000e+00> : vector<1x32xf32>
    %181 = tpu.matmul %173, %180, %cst_66 {dimension_numbers = #tpu.dot_dimension_numbers<[1], [0], [0], [1], [0, 0, 1, 1], [], []>} : vector<1x64xf32>, vector<64x32xf32>, vector<1x32xf32> -> vector<1x32xf32>
    %c0_67 = arith.constant 0 : index
    %c0_68 = arith.constant 0 : index
    %182 = vector.load %arg12[%c0_67, %c0_68] : memref<1x32xf32, #tpu.memory_space<vmem>>, vector<1x32xf32>
    %183 = arith.addf %181, %182 : vector<1x32xf32>
    %cst_69 = arith.constant 0.000000e+00 : f32
    %184 = vector.broadcast %cst_69 : f32 to vector<1x32xf32>
    %185 = arith.maximumf %183, %184 : vector<1x32xf32>
    %c0_70 = arith.constant 0 : index
    %c0_71 = arith.constant 0 : index
    %186 = vector.load %arg9[%c0_70, %c0_71] : memref<32x4xf32, #tpu.memory_space<vmem>>, vector<32x4xf32>
    %cst_72 = arith.constant dense<0.000000e+00> : vector<1x4xf32>
    %187 = tpu.matmul %179, %186, %cst_72 {dimension_numbers = #tpu.dot_dimension_numbers<[1], [0], [0], [1], [0, 0, 1, 1], [], []>} : vector<1x32xf32>, vector<32x4xf32>, vector<1x4xf32> -> vector<1x4xf32>
    %c0_73 = arith.constant 0 : index
    %c0_74 = arith.constant 0 : index
    %188 = vector.load %arg10[%c0_73, %c0_74] : memref<1x4xf32, #tpu.memory_space<vmem>>, vector<1x4xf32>
    %189 = arith.addf %187, %188 : vector<1x4xf32>
    %c0_75 = arith.constant 0 : index
    %c0_76 = arith.constant 0 : index
    %190 = vector.load %arg13[%c0_75, %c0_76] : memref<32x3xf32, #tpu.memory_space<vmem>>, vector<32x3xf32>
    %cst_77 = arith.constant dense<0.000000e+00> : vector<1x3xf32>
    %191 = tpu.matmul %185, %190, %cst_77 {dimension_numbers = #tpu.dot_dimension_numbers<[1], [0], [0], [1], [0, 0, 1, 1], [], []>} : vector<1x32xf32>, vector<32x3xf32>, vector<1x3xf32> -> vector<1x3xf32>
    %c0_78 = arith.constant 0 : index
    %c0_79 = arith.constant 0 : index
    %192 = vector.load %arg14[%c0_78, %c0_79] : memref<1x3xf32, #tpu.memory_space<vmem>>, vector<1x3xf32>
    %193 = arith.addf %191, %192 : vector<1x3xf32>
    %194 = arith.mulf %189, %189 : vector<1x4xf32>
    %cst_80 = arith.constant dense<0.000000e+00> : vector<1xf32>
    %195 = vector.multi_reduction <add>, %194, %cst_80 [1] : vector<1x4xf32> to vector<1xf32>
    %196 = vector.shape_cast %195 : vector<1xf32> to vector<1x1xf32>
    %cst_81 = arith.constant 9.99999996E-13 : f32
    %197 = vector.broadcast %cst_81 : f32 to vector<1x1xf32>
    %198 = arith.addf %196, %197 : vector<1x1xf32>
    %199 = math.rsqrt %198 : vector<1x1xf32>
    %200 = vector.broadcast %199 : vector<1x1xf32> to vector<1x4xf32>
    %201 = arith.mulf %189, %200 : vector<1x4xf32>
    %c0_82 = arith.constant 0 : index
    %c0_83 = arith.constant 0 : index
    %202 = vector.load %arg15[%c0_82, %c0_83] : memref<1x4xf32, #tpu.memory_space<vmem>>, vector<1x4xf32>
    tpu.vector_store %arg15[%c0_82, %c0_83], %201 {strides = array<i32>} : memref<1x4xf32, #tpu.memory_space<vmem>>, vector<1x4xf32>,
    %c0_84 = arith.constant 0 : index
    %c0_85 = arith.constant 0 : index
    %203 = vector.load %arg16[%c0_84, %c0_85] : memref<1x3xf32, #tpu.memory_space<vmem>>, vector<1x3xf32>
    tpu.vector_store %arg16[%c0_84, %c0_85], %193 {strides = array<i32>} : memref<1x3xf32, #tpu.memory_space<vmem>>, vector<1x3xf32>,
    return
  }
  func.func @transform_0(%arg0: i32) -> (i32, i32) {
    %c0_i32 = arith.constant 0 : i32
    %c0_i32_0 = arith.constant 0 : i32
    %c0_i32_1 = arith.constant 0 : i32
    return %c0_i32, %c0_i32_0 : i32, i32
  }
  func.func @transform_1(%arg0: i32) -> (i32, i32) {
    %c0_i32 = arith.constant 0 : i32
    %c0_i32_0 = arith.constant 0 : i32
    %c0_i32_1 = arith.constant 0 : i32
    return %c0_i32, %c0_i32_0 : i32, i32
  }
  func.func @transform_2(%arg0: i32) -> (i32, i32) {
    %c0_i32 = arith.constant 0 : i32
    %c0_i32_0 = arith.constant 0 : i32
    %c0_i32_1 = arith.constant 0 : i32
    return %c0_i32, %c0_i32_0 : i32, i32
  }
  func.func @transform_3(%arg0: i32) -> (i32, i32, i32, i32) {
    %c0_i32 = arith.constant 0 : i32
    %c0_i32_0 = arith.constant 0 : i32
    %c0_i32_1 = arith.constant 0 : i32
    %c0_i32_2 = arith.constant 0 : i32
    %c0_i32_3 = arith.constant 0 : i32
    return %c0_i32, %c0_i32_0, %c0_i32_1, %c0_i32_2 : i32, i32, i32, i32
  }
  func.func @transform_4(%arg0: i32) -> (i32, i32) {
    %c0_i32 = arith.constant 0 : i32
    %c0_i32_0 = arith.constant 0 : i32
    %c0_i32_1 = arith.constant 0 : i32
    return %c0_i32, %c0_i32_0 : i32, i32
  }
  func.func @transform_5(%arg0: i32) -> (i32, i32) {
    %c0_i32 = arith.constant 0 : i32
    %c0_i32_0 = arith.constant 0 : i32
    %c0_i32_1 = arith.constant 0 : i32
    return %c0_i32, %c0_i32_0 : i32, i32
  }
  func.func @transform_6(%arg0: i32) -> (i32, i32) {
    %c0_i32 = arith.constant 0 : i32
    %c0_i32_0 = arith.constant 0 : i32
    %c0_i32_1 = arith.constant 0 : i32
    return %c0_i32, %c0_i32_0 : i32, i32
  }
  func.func @transform_7(%arg0: i32) -> (i32, i32) {
    %c0_i32 = arith.constant 0 : i32
    %c0_i32_0 = arith.constant 0 : i32
    %c0_i32_1 = arith.constant 0 : i32
    return %c0_i32, %c0_i32_0 : i32, i32
  }
  func.func @transform_8(%arg0: i32) -> (i32, i32) {
    %c0_i32 = arith.constant 0 : i32
    %c0_i32_0 = arith.constant 0 : i32
    %c0_i32_1 = arith.constant 0 : i32
    return %c0_i32, %c0_i32_0 : i32, i32
  }
  func.func @transform_9(%arg0: i32) -> (i32, i32) {
    %c0_i32 = arith.constant 0 : i32
    %c0_i32_0 = arith.constant 0 : i32
    %c0_i32_1 = arith.constant 0 : i32
    return %c0_i32, %c0_i32_0 : i32, i32
  }
  func.func @transform_10(%arg0: i32) -> (i32, i32) {
    %c0_i32 = arith.constant 0 : i32
    %c0_i32_0 = arith.constant 0 : i32
    %c0_i32_1 = arith.constant 0 : i32
    return %c0_i32, %c0_i32_0 : i32, i32
  }
  func.func @transform_11(%arg0: i32) -> (i32, i32) {
    %c0_i32 = arith.constant 0 : i32
    %c0_i32_0 = arith.constant 0 : i32
    %c0_i32_1 = arith.constant 0 : i32
    return %c0_i32, %c0_i32_0 : i32, i32
  }
  func.func @transform_12(%arg0: i32) -> (i32, i32) {
    %c0_i32 = arith.constant 0 : i32
    %c0_i32_0 = arith.constant 0 : i32
    %c0_i32_1 = arith.constant 0 : i32
    return %c0_i32, %c0_i32_0 : i32, i32
  }
  func.func @transform_13(%arg0: i32) -> (i32, i32) {
    %c0_i32 = arith.constant 0 : i32
    %c0_i32_0 = arith.constant 0 : i32
    %c0_i32_1 = arith.constant 0 : i32
    return %c0_i32, %c0_i32_0 : i32, i32
  }
  func.func @transform_14(%arg0: i32) -> (i32, i32) {
    %c0_i32 = arith.constant 0 : i32
    %c0_i32_0 = arith.constant 0 : i32
    %c0_i32_1 = arith.constant 0 : i32
    return %c0_i32, %c0_i32_0 : i32, i32
  }
  func.func @transform_15(%arg0: i32) -> (i32, i32) {
    %c0_i32 = arith.constant 0 : i32
    %c0_i32_0 = arith.constant 0 : i32
    %c0_i32_1 = arith.constant 0 : i32
    return %c0_i32, %c0_i32_0 : i32, i32
  }
}

module attributes {stable_mosaic.version = 11 : i64} {
  func.func @_warp_pool_fc_kernel(%arg0: i32, %arg1: memref<1x4xf32, #tpu.memory_space<smem>>, %arg2: memref<1x3xf32, #tpu.memory_space<smem>>, %arg3: memref<1x5xf32, #tpu.memory_space<smem>>, %arg4: memref<1x3x16x128xf32, #tpu.memory_space<vmem>>, %arg5: memref<10x128xf32, #tpu.memory_space<vmem>>, %arg6: memref<1x128xf32, #tpu.memory_space<vmem>>, %arg7: memref<128x64xf32, #tpu.memory_space<vmem>>, %arg8: memref<1x64xf32, #tpu.memory_space<vmem>>, %arg9: memref<64x4xf32, #tpu.memory_space<vmem>>, %arg10: memref<1x4xf32, #tpu.memory_space<vmem>>, %arg11: memref<128x64xf32, #tpu.memory_space<vmem>>, %arg12: memref<1x64xf32, #tpu.memory_space<vmem>>, %arg13: memref<64x3xf32, #tpu.memory_space<vmem>>, %arg14: memref<1x3xf32, #tpu.memory_space<vmem>>, %arg15: memref<1x4xf32, #tpu.memory_space<vmem>>, %arg16: memref<1x3xf32, #tpu.memory_space<vmem>>) attributes {dimension_semantics = [#tpu.dimension_semantics<arbitrary>], iteration_bounds = array<i64: 1>, scalar_prefetch = 0 : i64, scratch_operands = 0 : i64, tpu.core_type = #tpu.core_type<tc>, window_params = [{transform_indices = @transform_0, window_bounds = array<i64: 1, 4>}, {transform_indices = @transform_1, window_bounds = array<i64: 1, 3>}, {transform_indices = @transform_2, window_bounds = array<i64: 1, 5>}, {pipeline_mode = #tpu.pipeline_mode<synchronous>, transform_indices = @transform_3, window_bounds = array<i64: 1, 3, 16, 128>}, {pipeline_mode = #tpu.pipeline_mode<synchronous>, transform_indices = @transform_4, window_bounds = array<i64: 10, 128>}, {pipeline_mode = #tpu.pipeline_mode<synchronous>, transform_indices = @transform_5, window_bounds = array<i64: 1, 128>}, {pipeline_mode = #tpu.pipeline_mode<synchronous>, transform_indices = @transform_6, window_bounds = array<i64: 128, 64>}, {pipeline_mode = #tpu.pipeline_mode<synchronous>, transform_indices = @transform_7, window_bounds = array<i64: 1, 64>}, {pipeline_mode = #tpu.pipeline_mode<synchronous>, transform_indices = @transform_8, window_bounds = array<i64: 64, 4>}, {pipeline_mode = #tpu.pipeline_mode<synchronous>, transform_indices = @transform_9, window_bounds = array<i64: 1, 4>}, {pipeline_mode = #tpu.pipeline_mode<synchronous>, transform_indices = @transform_10, window_bounds = array<i64: 128, 64>}, {pipeline_mode = #tpu.pipeline_mode<synchronous>, transform_indices = @transform_11, window_bounds = array<i64: 1, 64>}, {pipeline_mode = #tpu.pipeline_mode<synchronous>, transform_indices = @transform_12, window_bounds = array<i64: 64, 3>}, {pipeline_mode = #tpu.pipeline_mode<synchronous>, transform_indices = @transform_13, window_bounds = array<i64: 1, 3>}, {pipeline_mode = #tpu.pipeline_mode<synchronous>, transform_indices = @transform_14, window_bounds = array<i64: 1, 4>}, {pipeline_mode = #tpu.pipeline_mode<synchronous>, transform_indices = @transform_15, window_bounds = array<i64: 1, 3>}]} {
    %c0 = arith.constant 0 : index
    %c0_0 = arith.constant 0 : index
    %0 = memref.load %arg1[%c0, %c0_0] : memref<1x4xf32, #tpu.memory_space<smem>>
    %c0_1 = arith.constant 0 : index
    %c1 = arith.constant 1 : index
    %1 = memref.load %arg1[%c0_1, %c1] : memref<1x4xf32, #tpu.memory_space<smem>>
    %c0_2 = arith.constant 0 : index
    %c2 = arith.constant 2 : index
    %2 = memref.load %arg1[%c0_2, %c2] : memref<1x4xf32, #tpu.memory_space<smem>>
    %c0_3 = arith.constant 0 : index
    %c3 = arith.constant 3 : index
    %3 = memref.load %arg1[%c0_3, %c3] : memref<1x4xf32, #tpu.memory_space<smem>>
    %4 = arith.mulf %0, %0 : f32
    %5 = arith.mulf %1, %1 : f32
    %6 = arith.addf %4, %5 : f32
    %7 = arith.mulf %2, %2 : f32
    %8 = arith.addf %6, %7 : f32
    %9 = arith.mulf %3, %3 : f32
    %10 = arith.addf %8, %9 : f32
    %c0_4 = arith.constant 0 : index
    %c0_5 = arith.constant 0 : index
    %c0_6 = arith.constant 0 : index
    %c0_7 = arith.constant 0 : index
    %11 = vector.load %arg4[%c0_4, %c0_5, %c0_6, %c0_7] : memref<1x3x16x128xf32, #tpu.memory_space<vmem>>, vector<1x1x16x128xf32>
    %12 = vector.shape_cast %11 : vector<1x1x16x128xf32> to vector<16x128xf32>
    %c0_8 = arith.constant 0 : index
    %c1_9 = arith.constant 1 : index
    %c0_10 = arith.constant 0 : index
    %c0_11 = arith.constant 0 : index
    %13 = vector.load %arg4[%c0_8, %c1_9, %c0_10, %c0_11] : memref<1x3x16x128xf32, #tpu.memory_space<vmem>>, vector<1x1x16x128xf32>
    %14 = vector.shape_cast %13 : vector<1x1x16x128xf32> to vector<16x128xf32>
    %c0_12 = arith.constant 0 : index
    %c2_13 = arith.constant 2 : index
    %c0_14 = arith.constant 0 : index
    %c0_15 = arith.constant 0 : index
    %15 = vector.load %arg4[%c0_12, %c2_13, %c0_14, %c0_15] : memref<1x3x16x128xf32, #tpu.memory_space<vmem>>, vector<1x1x16x128xf32>
    %16 = vector.shape_cast %15 : vector<1x1x16x128xf32> to vector<16x128xf32>
    %cst = arith.constant 0.000000e+00 : f32
    %17 = arith.subf %cst, %1 : f32
    %18 = vector.broadcast %17 : f32 to vector<16x128xf32>
    %19 = arith.mulf %18, %12 : vector<16x128xf32>
    %20 = vector.broadcast %2 : f32 to vector<16x128xf32>
    %21 = arith.mulf %20, %14 : vector<16x128xf32>
    %22 = arith.subf %19, %21 : vector<16x128xf32>
    %23 = vector.broadcast %3 : f32 to vector<16x128xf32>
    %24 = arith.mulf %23, %16 : vector<16x128xf32>
    %25 = arith.subf %22, %24 : vector<16x128xf32>
    %26 = vector.broadcast %0 : f32 to vector<16x128xf32>
    %27 = arith.mulf %26, %12 : vector<16x128xf32>
    %28 = vector.broadcast %2 : f32 to vector<16x128xf32>
    %29 = arith.mulf %28, %16 : vector<16x128xf32>
    %30 = arith.addf %27, %29 : vector<16x128xf32>
    %31 = vector.broadcast %3 : f32 to vector<16x128xf32>
    %32 = arith.mulf %31, %14 : vector<16x128xf32>
    %33 = arith.subf %30, %32 : vector<16x128xf32>
    %34 = vector.broadcast %0 : f32 to vector<16x128xf32>
    %35 = arith.mulf %34, %14 : vector<16x128xf32>
    %36 = vector.broadcast %3 : f32 to vector<16x128xf32>
    %37 = arith.mulf %36, %12 : vector<16x128xf32>
    %38 = arith.addf %35, %37 : vector<16x128xf32>
    %39 = vector.broadcast %1 : f32 to vector<16x128xf32>
    %40 = arith.mulf %39, %16 : vector<16x128xf32>
    %41 = arith.subf %38, %40 : vector<16x128xf32>
    %42 = vector.broadcast %0 : f32 to vector<16x128xf32>
    %43 = arith.mulf %42, %16 : vector<16x128xf32>
    %44 = vector.broadcast %1 : f32 to vector<16x128xf32>
    %45 = arith.mulf %44, %14 : vector<16x128xf32>
    %46 = arith.addf %43, %45 : vector<16x128xf32>
    %47 = vector.broadcast %2 : f32 to vector<16x128xf32>
    %48 = arith.mulf %47, %12 : vector<16x128xf32>
    %49 = arith.subf %46, %48 : vector<16x128xf32>
    %cst_16 = arith.constant 0.000000e+00 : f32
    %50 = vector.broadcast %cst_16 : f32 to vector<16x128xf32>
    %51 = arith.subf %50, %25 : vector<16x128xf32>
    %52 = vector.broadcast %1 : f32 to vector<16x128xf32>
    %53 = arith.mulf %51, %52 : vector<16x128xf32>
    %54 = vector.broadcast %0 : f32 to vector<16x128xf32>
    %55 = arith.mulf %33, %54 : vector<16x128xf32>
    %56 = arith.addf %53, %55 : vector<16x128xf32>
    %57 = vector.broadcast %3 : f32 to vector<16x128xf32>
    %58 = arith.mulf %41, %57 : vector<16x128xf32>
    %59 = arith.subf %56, %58 : vector<16x128xf32>
    %60 = vector.broadcast %2 : f32 to vector<16x128xf32>
    %61 = arith.mulf %49, %60 : vector<16x128xf32>
    %62 = arith.addf %59, %61 : vector<16x128xf32>
    %63 = vector.broadcast %10 : f32 to vector<16x128xf32>
    %64 = arith.divf %62, %63 : vector<16x128xf32>
    %c0_17 = arith.constant 0 : index
    %c0_18 = arith.constant 0 : index
    %65 = memref.load %arg2[%c0_17, %c0_18] : memref<1x3xf32, #tpu.memory_space<smem>>
    %66 = vector.broadcast %65 : f32 to vector<16x128xf32>
    %67 = arith.addf %64, %66 : vector<16x128xf32>
    %cst_19 = arith.constant 0.000000e+00 : f32
    %68 = vector.broadcast %cst_19 : f32 to vector<16x128xf32>
    %69 = arith.subf %68, %25 : vector<16x128xf32>
    %70 = vector.broadcast %2 : f32 to vector<16x128xf32>
    %71 = arith.mulf %69, %70 : vector<16x128xf32>
    %72 = vector.broadcast %3 : f32 to vector<16x128xf32>
    %73 = arith.mulf %33, %72 : vector<16x128xf32>
    %74 = arith.addf %71, %73 : vector<16x128xf32>
    %75 = vector.broadcast %0 : f32 to vector<16x128xf32>
    %76 = arith.mulf %41, %75 : vector<16x128xf32>
    %77 = arith.addf %74, %76 : vector<16x128xf32>
    %78 = vector.broadcast %1 : f32 to vector<16x128xf32>
    %79 = arith.mulf %49, %78 : vector<16x128xf32>
    %80 = arith.subf %77, %79 : vector<16x128xf32>
    %81 = vector.broadcast %10 : f32 to vector<16x128xf32>
    %82 = arith.divf %80, %81 : vector<16x128xf32>
    %c0_20 = arith.constant 0 : index
    %c1_21 = arith.constant 1 : index
    %83 = memref.load %arg2[%c0_20, %c1_21] : memref<1x3xf32, #tpu.memory_space<smem>>
    %84 = vector.broadcast %83 : f32 to vector<16x128xf32>
    %85 = arith.addf %82, %84 : vector<16x128xf32>
    %cst_22 = arith.constant 0.000000e+00 : f32
    %86 = vector.broadcast %cst_22 : f32 to vector<16x128xf32>
    %87 = arith.subf %86, %25 : vector<16x128xf32>
    %88 = vector.broadcast %3 : f32 to vector<16x128xf32>
    %89 = arith.mulf %87, %88 : vector<16x128xf32>
    %90 = vector.broadcast %2 : f32 to vector<16x128xf32>
    %91 = arith.mulf %33, %90 : vector<16x128xf32>
    %92 = arith.subf %89, %91 : vector<16x128xf32>
    %93 = vector.broadcast %1 : f32 to vector<16x128xf32>
    %94 = arith.mulf %41, %93 : vector<16x128xf32>
    %95 = arith.addf %92, %94 : vector<16x128xf32>
    %96 = vector.broadcast %0 : f32 to vector<16x128xf32>
    %97 = arith.mulf %49, %96 : vector<16x128xf32>
    %98 = arith.addf %95, %97 : vector<16x128xf32>
    %99 = vector.broadcast %10 : f32 to vector<16x128xf32>
    %100 = arith.divf %98, %99 : vector<16x128xf32>
    %c0_23 = arith.constant 0 : index
    %c2_24 = arith.constant 2 : index
    %101 = memref.load %arg2[%c0_23, %c2_24] : memref<1x3xf32, #tpu.memory_space<smem>>
    %102 = vector.broadcast %101 : f32 to vector<16x128xf32>
    %103 = arith.addf %100, %102 : vector<16x128xf32>
    %104 = arith.mulf %67, %67 : vector<16x128xf32>
    %105 = arith.mulf %85, %85 : vector<16x128xf32>
    %106 = arith.addf %104, %105 : vector<16x128xf32>
    %107 = arith.mulf %103, %103 : vector<16x128xf32>
    %108 = arith.addf %106, %107 : vector<16x128xf32>
    %109 = math.sqrt %108 : vector<16x128xf32>
    %110 = vector.shape_cast %109 : vector<16x128xf32> to vector<1x16x128xf32>
    %cst_25 = arith.constant dense<0.000000e+00> : vector<1xf32>
    %111 = vector.multi_reduction <add>, %110, %cst_25 [1, 2] : vector<1x16x128xf32> to vector<1xf32>
    %112 = vector.shape_cast %111 : vector<1xf32> to vector<1x1x1xf32>
    %113 = vector.extract %112[0, 0, 0] : f32 from vector<1x1x1xf32>
    %cst_26 = arith.constant 4.8828125E-4 : f32
    %114 = arith.mulf %113, %cst_26 : f32
    %115 = vector.shape_cast %67 : vector<16x128xf32> to vector<1x16x128xf32>
    %cst_27 = arith.constant dense<0.000000e+00> : vector<1xf32>
    %116 = vector.multi_reduction <add>, %115, %cst_27 [1, 2] : vector<1x16x128xf32> to vector<1xf32>
    %117 = vector.shape_cast %116 : vector<1xf32> to vector<1x1x1xf32>
    %118 = vector.extract %117[0, 0, 0] : f32 from vector<1x1x1xf32>
    %cst_28 = arith.constant 4.8828125E-4 : f32
    %119 = arith.mulf %118, %cst_28 : f32
    %120 = vector.shape_cast %85 : vector<16x128xf32> to vector<1x16x128xf32>
    %cst_29 = arith.constant dense<0.000000e+00> : vector<1xf32>
    %121 = vector.multi_reduction <add>, %120, %cst_29 [1, 2] : vector<1x16x128xf32> to vector<1xf32>
    %122 = vector.shape_cast %121 : vector<1xf32> to vector<1x1x1xf32>
    %123 = vector.extract %122[0, 0, 0] : f32 from vector<1x1x1xf32>
    %cst_30 = arith.constant 4.8828125E-4 : f32
    %124 = arith.mulf %123, %cst_30 : f32
    %125 = vector.shape_cast %103 : vector<16x128xf32> to vector<1x16x128xf32>
    %cst_31 = arith.constant dense<0.000000e+00> : vector<1xf32>
    %126 = vector.multi_reduction <add>, %125, %cst_31 [1, 2] : vector<1x16x128xf32> to vector<1xf32>
    %127 = vector.shape_cast %126 : vector<1xf32> to vector<1x1x1xf32>
    %128 = vector.extract %127[0, 0, 0] : f32 from vector<1x1x1xf32>
    %cst_32 = arith.constant 4.8828125E-4 : f32
    %129 = arith.mulf %128, %cst_32 : f32
    %c0_33 = arith.constant 0 : index
    %c0_34 = arith.constant 0 : index
    %130 = vector.load %arg5[%c0_33, %c0_34] : memref<10x128xf32, #tpu.memory_space<vmem>>, vector<1x128xf32>
    %131 = vector.broadcast %114 : f32 to vector<1x128xf32>
    %132 = arith.mulf %131, %130 : vector<1x128xf32>
    %c1_35 = arith.constant 1 : index
    %c0_36 = arith.constant 0 : index
    %133 = vector.load %arg5[%c1_35, %c0_36] : memref<10x128xf32, #tpu.memory_space<vmem>>, vector<1x128xf32>
    %134 = vector.broadcast %119 : f32 to vector<1x128xf32>
    %135 = arith.mulf %134, %133 : vector<1x128xf32>
    %136 = arith.addf %132, %135 : vector<1x128xf32>
    %c2_37 = arith.constant 2 : index
    %c0_38 = arith.constant 0 : index
    %137 = vector.load %arg5[%c2_37, %c0_38] : memref<10x128xf32, #tpu.memory_space<vmem>>, vector<1x128xf32>
    %138 = vector.broadcast %124 : f32 to vector<1x128xf32>
    %139 = arith.mulf %138, %137 : vector<1x128xf32>
    %140 = arith.addf %136, %139 : vector<1x128xf32>
    %c3_39 = arith.constant 3 : index
    %c0_40 = arith.constant 0 : index
    %141 = vector.load %arg5[%c3_39, %c0_40] : memref<10x128xf32, #tpu.memory_space<vmem>>, vector<1x128xf32>
    %142 = vector.broadcast %129 : f32 to vector<1x128xf32>
    %143 = arith.mulf %142, %141 : vector<1x128xf32>
    %144 = arith.addf %140, %143 : vector<1x128xf32>
    %c0_41 = arith.constant 0 : index
    %c0_42 = arith.constant 0 : index
    %145 = memref.load %arg3[%c0_41, %c0_42] : memref<1x5xf32, #tpu.memory_space<smem>>
    %c5 = arith.constant 5 : index
    %c0_43 = arith.constant 0 : index
    %146 = vector.load %arg5[%c5, %c0_43] : memref<10x128xf32, #tpu.memory_space<vmem>>, vector<1x128xf32>
    %147 = vector.broadcast %145 : f32 to vector<1x128xf32>
    %148 = arith.mulf %147, %146 : vector<1x128xf32>
    %149 = arith.addf %144, %148 : vector<1x128xf32>
    %c0_44 = arith.constant 0 : index
    %c1_45 = arith.constant 1 : index
    %150 = memref.load %arg3[%c0_44, %c1_45] : memref<1x5xf32, #tpu.memory_space<smem>>
    %c6 = arith.constant 6 : index
    %c0_46 = arith.constant 0 : index
    %151 = vector.load %arg5[%c6, %c0_46] : memref<10x128xf32, #tpu.memory_space<vmem>>, vector<1x128xf32>
    %152 = vector.broadcast %150 : f32 to vector<1x128xf32>
    %153 = arith.mulf %152, %151 : vector<1x128xf32>
    %154 = arith.addf %149, %153 : vector<1x128xf32>
    %c0_47 = arith.constant 0 : index
    %c2_48 = arith.constant 2 : index
    %155 = memref.load %arg3[%c0_47, %c2_48] : memref<1x5xf32, #tpu.memory_space<smem>>
    %c7 = arith.constant 7 : index
    %c0_49 = arith.constant 0 : index
    %156 = vector.load %arg5[%c7, %c0_49] : memref<10x128xf32, #tpu.memory_space<vmem>>, vector<1x128xf32>
    %157 = vector.broadcast %155 : f32 to vector<1x128xf32>
    %158 = arith.mulf %157, %156 : vector<1x128xf32>
    %159 = arith.addf %154, %158 : vector<1x128xf32>
    %c0_50 = arith.constant 0 : index
    %c3_51 = arith.constant 3 : index
    %160 = memref.load %arg3[%c0_50, %c3_51] : memref<1x5xf32, #tpu.memory_space<smem>>
    %c8 = arith.constant 8 : index
    %c0_52 = arith.constant 0 : index
    %161 = vector.load %arg5[%c8, %c0_52] : memref<10x128xf32, #tpu.memory_space<vmem>>, vector<1x128xf32>
    %162 = vector.broadcast %160 : f32 to vector<1x128xf32>
    %163 = arith.mulf %162, %161 : vector<1x128xf32>
    %164 = arith.addf %159, %163 : vector<1x128xf32>
    %c0_53 = arith.constant 0 : index
    %c4 = arith.constant 4 : index
    %165 = memref.load %arg3[%c0_53, %c4] : memref<1x5xf32, #tpu.memory_space<smem>>
    %c9 = arith.constant 9 : index
    %c0_54 = arith.constant 0 : index
    %166 = vector.load %arg5[%c9, %c0_54] : memref<10x128xf32, #tpu.memory_space<vmem>>, vector<1x128xf32>
    %167 = vector.broadcast %165 : f32 to vector<1x128xf32>
    %168 = arith.mulf %167, %166 : vector<1x128xf32>
    %169 = arith.addf %164, %168 : vector<1x128xf32>
    %c0_55 = arith.constant 0 : index
    %c0_56 = arith.constant 0 : index
    %170 = vector.load %arg6[%c0_55, %c0_56] : memref<1x128xf32, #tpu.memory_space<vmem>>, vector<1x128xf32>
    %171 = arith.addf %169, %170 : vector<1x128xf32>
    %cst_57 = arith.constant 0.000000e+00 : f32
    %172 = vector.broadcast %cst_57 : f32 to vector<1x128xf32>
    %173 = arith.maximumf %171, %172 : vector<1x128xf32>
    %c0_58 = arith.constant 0 : index
    %c0_59 = arith.constant 0 : index
    %174 = vector.load %arg7[%c0_58, %c0_59] : memref<128x64xf32, #tpu.memory_space<vmem>>, vector<128x64xf32>
    %cst_60 = arith.constant dense<0.000000e+00> : vector<1x64xf32>
    %175 = tpu.matmul %173, %174, %cst_60 {dimension_numbers = #tpu.dot_dimension_numbers<[1], [0], [0], [1], [0, 0, 1, 1], [], []>} : vector<1x128xf32>, vector<128x64xf32>, vector<1x64xf32> -> vector<1x64xf32>
    %c0_61 = arith.constant 0 : index
    %c0_62 = arith.constant 0 : index
    %176 = vector.load %arg8[%c0_61, %c0_62] : memref<1x64xf32, #tpu.memory_space<vmem>>, vector<1x64xf32>
    %177 = arith.addf %175, %176 : vector<1x64xf32>
    %cst_63 = arith.constant 0.000000e+00 : f32
    %178 = vector.broadcast %cst_63 : f32 to vector<1x64xf32>
    %179 = arith.maximumf %177, %178 : vector<1x64xf32>
    %c0_64 = arith.constant 0 : index
    %c0_65 = arith.constant 0 : index
    %180 = vector.load %arg11[%c0_64, %c0_65] : memref<128x64xf32, #tpu.memory_space<vmem>>, vector<128x64xf32>
    %cst_66 = arith.constant dense<0.000000e+00> : vector<1x64xf32>
    %181 = tpu.matmul %173, %180, %cst_66 {dimension_numbers = #tpu.dot_dimension_numbers<[1], [0], [0], [1], [0, 0, 1, 1], [], []>} : vector<1x128xf32>, vector<128x64xf32>, vector<1x64xf32> -> vector<1x64xf32>
    %c0_67 = arith.constant 0 : index
    %c0_68 = arith.constant 0 : index
    %182 = vector.load %arg12[%c0_67, %c0_68] : memref<1x64xf32, #tpu.memory_space<vmem>>, vector<1x64xf32>
    %183 = arith.addf %181, %182 : vector<1x64xf32>
    %cst_69 = arith.constant 0.000000e+00 : f32
    %184 = vector.broadcast %cst_69 : f32 to vector<1x64xf32>
    %185 = arith.maximumf %183, %184 : vector<1x64xf32>
    %c0_70 = arith.constant 0 : index
    %c0_71 = arith.constant 0 : index
    %186 = vector.load %arg9[%c0_70, %c0_71] : memref<64x4xf32, #tpu.memory_space<vmem>>, vector<64x4xf32>
    %cst_72 = arith.constant dense<0.000000e+00> : vector<1x4xf32>
    %187 = tpu.matmul %179, %186, %cst_72 {dimension_numbers = #tpu.dot_dimension_numbers<[1], [0], [0], [1], [0, 0, 1, 1], [], []>} : vector<1x64xf32>, vector<64x4xf32>, vector<1x4xf32> -> vector<1x4xf32>
    %c0_73 = arith.constant 0 : index
    %c0_74 = arith.constant 0 : index
    %188 = vector.load %arg10[%c0_73, %c0_74] : memref<1x4xf32, #tpu.memory_space<vmem>>, vector<1x4xf32>
    %189 = arith.addf %187, %188 : vector<1x4xf32>
    %c0_75 = arith.constant 0 : index
    %c0_76 = arith.constant 0 : index
    %190 = vector.load %arg13[%c0_75, %c0_76] : memref<64x3xf32, #tpu.memory_space<vmem>>, vector<64x3xf32>
    %cst_77 = arith.constant dense<0.000000e+00> : vector<1x3xf32>
    %191 = tpu.matmul %185, %190, %cst_77 {dimension_numbers = #tpu.dot_dimension_numbers<[1], [0], [0], [1], [0, 0, 1, 1], [], []>} : vector<1x64xf32>, vector<64x3xf32>, vector<1x3xf32> -> vector<1x3xf32>
    %c0_78 = arith.constant 0 : index
    %c0_79 = arith.constant 0 : index
    %192 = vector.load %arg14[%c0_78, %c0_79] : memref<1x3xf32, #tpu.memory_space<vmem>>, vector<1x3xf32>
    %193 = arith.addf %191, %192 : vector<1x3xf32>
    %194 = arith.mulf %189, %189 : vector<1x4xf32>
    %cst_80 = arith.constant dense<0.000000e+00> : vector<1xf32>
    %195 = vector.multi_reduction <add>, %194, %cst_80 [1] : vector<1x4xf32> to vector<1xf32>
    %196 = vector.shape_cast %195 : vector<1xf32> to vector<1x1xf32>
    %cst_81 = arith.constant 9.99999996E-13 : f32
    %197 = vector.broadcast %cst_81 : f32 to vector<1x1xf32>
    %198 = arith.addf %196, %197 : vector<1x1xf32>
    %199 = math.rsqrt %198 : vector<1x1xf32>
    %200 = vector.broadcast %199 : vector<1x1xf32> to vector<1x4xf32>
    %201 = arith.mulf %189, %200 : vector<1x4xf32>
    %c0_82 = arith.constant 0 : index
    %c0_83 = arith.constant 0 : index
    %202 = vector.load %arg15[%c0_82, %c0_83] : memref<1x4xf32, #tpu.memory_space<vmem>>, vector<1x4xf32>
    tpu.vector_store %arg15[%c0_82, %c0_83], %201 {strides = array<i32>} : memref<1x4xf32, #tpu.memory_space<vmem>>, vector<1x4xf32>,
    %c0_84 = arith.constant 0 : index
    %c0_85 = arith.constant 0 : index
    %203 = vector.load %arg16[%c0_84, %c0_85] : memref<1x3xf32, #tpu.memory_space<vmem>>, vector<1x3xf32>
    tpu.vector_store %arg16[%c0_84, %c0_85], %193 {strides = array<i32>} : memref<1x3xf32, #tpu.memory_space<vmem>>, vector<1x3xf32>,
    return
  }
  func.func @transform_0(%arg0: i32) -> (i32, i32) {
    %c0_i32 = arith.constant 0 : i32
    %c0_i32_0 = arith.constant 0 : i32
    %c0_i32_1 = arith.constant 0 : i32
    return %c0_i32, %c0_i32_0 : i32, i32
  }
  func.func @transform_1(%arg0: i32) -> (i32, i32) {
    %c0_i32 = arith.constant 0 : i32
    %c0_i32_0 = arith.constant 0 : i32
    %c0_i32_1 = arith.constant 0 : i32
    return %c0_i32, %c0_i32_0 : i32, i32
  }
  func.func @transform_2(%arg0: i32) -> (i32, i32) {
    %c0_i32 = arith.constant 0 : i32
    %c0_i32_0 = arith.constant 0 : i32
    %c0_i32_1 = arith.constant 0 : i32
    return %c0_i32, %c0_i32_0 : i32, i32
  }
  func.func @transform_3(%arg0: i32) -> (i32, i32, i32, i32) {
    %c0_i32 = arith.constant 0 : i32
    %c0_i32_0 = arith.constant 0 : i32
    %c0_i32_1 = arith.constant 0 : i32
    %c0_i32_2 = arith.constant 0 : i32
    %c0_i32_3 = arith.constant 0 : i32
    return %c0_i32, %c0_i32_0, %c0_i32_1, %c0_i32_2 : i32, i32, i32, i32
  }
  func.func @transform_4(%arg0: i32) -> (i32, i32) {
    %c0_i32 = arith.constant 0 : i32
    %c0_i32_0 = arith.constant 0 : i32
    %c0_i32_1 = arith.constant 0 : i32
    return %c0_i32, %c0_i32_0 : i32, i32
  }
  func.func @transform_5(%arg0: i32) -> (i32, i32) {
    %c0_i32 = arith.constant 0 : i32
    %c0_i32_0 = arith.constant 0 : i32
    %c0_i32_1 = arith.constant 0 : i32
    return %c0_i32, %c0_i32_0 : i32, i32
  }
  func.func @transform_6(%arg0: i32) -> (i32, i32) {
    %c0_i32 = arith.constant 0 : i32
    %c0_i32_0 = arith.constant 0 : i32
    %c0_i32_1 = arith.constant 0 : i32
    return %c0_i32, %c0_i32_0 : i32, i32
  }
  func.func @transform_7(%arg0: i32) -> (i32, i32) {
    %c0_i32 = arith.constant 0 : i32
    %c0_i32_0 = arith.constant 0 : i32
    %c0_i32_1 = arith.constant 0 : i32
    return %c0_i32, %c0_i32_0 : i32, i32
  }
  func.func @transform_8(%arg0: i32) -> (i32, i32) {
    %c0_i32 = arith.constant 0 : i32
    %c0_i32_0 = arith.constant 0 : i32
    %c0_i32_1 = arith.constant 0 : i32
    return %c0_i32, %c0_i32_0 : i32, i32
  }
  func.func @transform_9(%arg0: i32) -> (i32, i32) {
    %c0_i32 = arith.constant 0 : i32
    %c0_i32_0 = arith.constant 0 : i32
    %c0_i32_1 = arith.constant 0 : i32
    return %c0_i32, %c0_i32_0 : i32, i32
  }
  func.func @transform_10(%arg0: i32) -> (i32, i32) {
    %c0_i32 = arith.constant 0 : i32
    %c0_i32_0 = arith.constant 0 : i32
    %c0_i32_1 = arith.constant 0 : i32
    return %c0_i32, %c0_i32_0 : i32, i32
  }
  func.func @transform_11(%arg0: i32) -> (i32, i32) {
    %c0_i32 = arith.constant 0 : i32
    %c0_i32_0 = arith.constant 0 : i32
    %c0_i32_1 = arith.constant 0 : i32
    return %c0_i32, %c0_i32_0 : i32, i32
  }
  func.func @transform_12(%arg0: i32) -> (i32, i32) {
    %c0_i32 = arith.constant 0 : i32
    %c0_i32_0 = arith.constant 0 : i32
    %c0_i32_1 = arith.constant 0 : i32
    return %c0_i32, %c0_i32_0 : i32, i32
  }
  func.func @transform_13(%arg0: i32) -> (i32, i32) {
    %c0_i32 = arith.constant 0 : i32
    %c0_i32_0 = arith.constant 0 : i32
    %c0_i32_1 = arith.constant 0 : i32
    return %c0_i32, %c0_i32_0 : i32, i32
  }
  func.func @transform_14(%arg0: i32) -> (i32, i32) {
    %c0_i32 = arith.constant 0 : i32
    %c0_i32_0 = arith.constant 0 : i32
    %c0_i32_1 = arith.constant 0 : i32
    return %c0_i32, %c0_i32_0 : i32, i32
  }
  func.func @transform_15(%arg0: i32) -> (i32, i32) {
    %c0_i32 = arith.constant 0 : i32
    %c0_i32_0 = arith.constant 0 : i32
    %c0_i32_1 = arith.constant 0 : i32
    return %c0_i32, %c0_i32_0 : i32, i32
  }
}

module attributes {stable_mosaic.version = 11 : i64} {
  func.func @_warp_pool_fc_kernel(%arg0: i32, %arg1: memref<1x4xf32, #tpu.memory_space<smem>>, %arg2: memref<1x3xf32, #tpu.memory_space<smem>>, %arg3: memref<1x5xf32, #tpu.memory_space<smem>>, %arg4: memref<1x3x16x128xf32, #tpu.memory_space<vmem>>, %arg5: memref<10x512xf32, #tpu.memory_space<vmem>>, %arg6: memref<1x512xf32, #tpu.memory_space<vmem>>, %arg7: memref<512x100xf32, #tpu.memory_space<vmem>>, %arg8: memref<1x100xf32, #tpu.memory_space<vmem>>, %arg9: memref<100x4xf32, #tpu.memory_space<vmem>>, %arg10: memref<1x4xf32, #tpu.memory_space<vmem>>, %arg11: memref<512x100xf32, #tpu.memory_space<vmem>>, %arg12: memref<1x100xf32, #tpu.memory_space<vmem>>, %arg13: memref<100x3xf32, #tpu.memory_space<vmem>>, %arg14: memref<1x3xf32, #tpu.memory_space<vmem>>, %arg15: memref<1x4xf32, #tpu.memory_space<vmem>>, %arg16: memref<1x3xf32, #tpu.memory_space<vmem>>) attributes {dimension_semantics = [#tpu.dimension_semantics<arbitrary>], iteration_bounds = array<i64: 1>, scalar_prefetch = 0 : i64, scratch_operands = 0 : i64, tpu.core_type = #tpu.core_type<tc>, window_params = [{transform_indices = @transform_0, window_bounds = array<i64: 1, 4>}, {transform_indices = @transform_1, window_bounds = array<i64: 1, 3>}, {transform_indices = @transform_2, window_bounds = array<i64: 1, 5>}, {pipeline_mode = #tpu.pipeline_mode<synchronous>, transform_indices = @transform_3, window_bounds = array<i64: 1, 3, 16, 128>}, {pipeline_mode = #tpu.pipeline_mode<synchronous>, transform_indices = @transform_4, window_bounds = array<i64: 10, 512>}, {pipeline_mode = #tpu.pipeline_mode<synchronous>, transform_indices = @transform_5, window_bounds = array<i64: 1, 512>}, {pipeline_mode = #tpu.pipeline_mode<synchronous>, transform_indices = @transform_6, window_bounds = array<i64: 512, 100>}, {pipeline_mode = #tpu.pipeline_mode<synchronous>, transform_indices = @transform_7, window_bounds = array<i64: 1, 100>}, {pipeline_mode = #tpu.pipeline_mode<synchronous>, transform_indices = @transform_8, window_bounds = array<i64: 100, 4>}, {pipeline_mode = #tpu.pipeline_mode<synchronous>, transform_indices = @transform_9, window_bounds = array<i64: 1, 4>}, {pipeline_mode = #tpu.pipeline_mode<synchronous>, transform_indices = @transform_10, window_bounds = array<i64: 512, 100>}, {pipeline_mode = #tpu.pipeline_mode<synchronous>, transform_indices = @transform_11, window_bounds = array<i64: 1, 100>}, {pipeline_mode = #tpu.pipeline_mode<synchronous>, transform_indices = @transform_12, window_bounds = array<i64: 100, 3>}, {pipeline_mode = #tpu.pipeline_mode<synchronous>, transform_indices = @transform_13, window_bounds = array<i64: 1, 3>}, {pipeline_mode = #tpu.pipeline_mode<synchronous>, transform_indices = @transform_14, window_bounds = array<i64: 1, 4>}, {pipeline_mode = #tpu.pipeline_mode<synchronous>, transform_indices = @transform_15, window_bounds = array<i64: 1, 3>}]} {
    %c0 = arith.constant 0 : index
    %c0_0 = arith.constant 0 : index
    %0 = memref.load %arg1[%c0, %c0_0] : memref<1x4xf32, #tpu.memory_space<smem>>
    %c0_1 = arith.constant 0 : index
    %c1 = arith.constant 1 : index
    %1 = memref.load %arg1[%c0_1, %c1] : memref<1x4xf32, #tpu.memory_space<smem>>
    %c0_2 = arith.constant 0 : index
    %c2 = arith.constant 2 : index
    %2 = memref.load %arg1[%c0_2, %c2] : memref<1x4xf32, #tpu.memory_space<smem>>
    %c0_3 = arith.constant 0 : index
    %c3 = arith.constant 3 : index
    %3 = memref.load %arg1[%c0_3, %c3] : memref<1x4xf32, #tpu.memory_space<smem>>
    %4 = arith.mulf %0, %0 : f32
    %5 = arith.mulf %1, %1 : f32
    %6 = arith.addf %4, %5 : f32
    %7 = arith.mulf %2, %2 : f32
    %8 = arith.addf %6, %7 : f32
    %9 = arith.mulf %3, %3 : f32
    %10 = arith.addf %8, %9 : f32
    %c0_4 = arith.constant 0 : index
    %c0_5 = arith.constant 0 : index
    %c0_6 = arith.constant 0 : index
    %c0_7 = arith.constant 0 : index
    %11 = vector.load %arg4[%c0_4, %c0_5, %c0_6, %c0_7] : memref<1x3x16x128xf32, #tpu.memory_space<vmem>>, vector<1x1x16x128xf32>
    %12 = vector.shape_cast %11 : vector<1x1x16x128xf32> to vector<16x128xf32>
    %c0_8 = arith.constant 0 : index
    %c1_9 = arith.constant 1 : index
    %c0_10 = arith.constant 0 : index
    %c0_11 = arith.constant 0 : index
    %13 = vector.load %arg4[%c0_8, %c1_9, %c0_10, %c0_11] : memref<1x3x16x128xf32, #tpu.memory_space<vmem>>, vector<1x1x16x128xf32>
    %14 = vector.shape_cast %13 : vector<1x1x16x128xf32> to vector<16x128xf32>
    %c0_12 = arith.constant 0 : index
    %c2_13 = arith.constant 2 : index
    %c0_14 = arith.constant 0 : index
    %c0_15 = arith.constant 0 : index
    %15 = vector.load %arg4[%c0_12, %c2_13, %c0_14, %c0_15] : memref<1x3x16x128xf32, #tpu.memory_space<vmem>>, vector<1x1x16x128xf32>
    %16 = vector.shape_cast %15 : vector<1x1x16x128xf32> to vector<16x128xf32>
    %cst = arith.constant 0.000000e+00 : f32
    %17 = arith.subf %cst, %1 : f32
    %18 = vector.broadcast %17 : f32 to vector<16x128xf32>
    %19 = arith.mulf %18, %12 : vector<16x128xf32>
    %20 = vector.broadcast %2 : f32 to vector<16x128xf32>
    %21 = arith.mulf %20, %14 : vector<16x128xf32>
    %22 = arith.subf %19, %21 : vector<16x128xf32>
    %23 = vector.broadcast %3 : f32 to vector<16x128xf32>
    %24 = arith.mulf %23, %16 : vector<16x128xf32>
    %25 = arith.subf %22, %24 : vector<16x128xf32>
    %26 = vector.broadcast %0 : f32 to vector<16x128xf32>
    %27 = arith.mulf %26, %12 : vector<16x128xf32>
    %28 = vector.broadcast %2 : f32 to vector<16x128xf32>
    %29 = arith.mulf %28, %16 : vector<16x128xf32>
    %30 = arith.addf %27, %29 : vector<16x128xf32>
    %31 = vector.broadcast %3 : f32 to vector<16x128xf32>
    %32 = arith.mulf %31, %14 : vector<16x128xf32>
    %33 = arith.subf %30, %32 : vector<16x128xf32>
    %34 = vector.broadcast %0 : f32 to vector<16x128xf32>
    %35 = arith.mulf %34, %14 : vector<16x128xf32>
    %36 = vector.broadcast %3 : f32 to vector<16x128xf32>
    %37 = arith.mulf %36, %12 : vector<16x128xf32>
    %38 = arith.addf %35, %37 : vector<16x128xf32>
    %39 = vector.broadcast %1 : f32 to vector<16x128xf32>
    %40 = arith.mulf %39, %16 : vector<16x128xf32>
    %41 = arith.subf %38, %40 : vector<16x128xf32>
    %42 = vector.broadcast %0 : f32 to vector<16x128xf32>
    %43 = arith.mulf %42, %16 : vector<16x128xf32>
    %44 = vector.broadcast %1 : f32 to vector<16x128xf32>
    %45 = arith.mulf %44, %14 : vector<16x128xf32>
    %46 = arith.addf %43, %45 : vector<16x128xf32>
    %47 = vector.broadcast %2 : f32 to vector<16x128xf32>
    %48 = arith.mulf %47, %12 : vector<16x128xf32>
    %49 = arith.subf %46, %48 : vector<16x128xf32>
    %cst_16 = arith.constant 0.000000e+00 : f32
    %50 = vector.broadcast %cst_16 : f32 to vector<16x128xf32>
    %51 = arith.subf %50, %25 : vector<16x128xf32>
    %52 = vector.broadcast %1 : f32 to vector<16x128xf32>
    %53 = arith.mulf %51, %52 : vector<16x128xf32>
    %54 = vector.broadcast %0 : f32 to vector<16x128xf32>
    %55 = arith.mulf %33, %54 : vector<16x128xf32>
    %56 = arith.addf %53, %55 : vector<16x128xf32>
    %57 = vector.broadcast %3 : f32 to vector<16x128xf32>
    %58 = arith.mulf %41, %57 : vector<16x128xf32>
    %59 = arith.subf %56, %58 : vector<16x128xf32>
    %60 = vector.broadcast %2 : f32 to vector<16x128xf32>
    %61 = arith.mulf %49, %60 : vector<16x128xf32>
    %62 = arith.addf %59, %61 : vector<16x128xf32>
    %63 = vector.broadcast %10 : f32 to vector<16x128xf32>
    %64 = arith.divf %62, %63 : vector<16x128xf32>
    %c0_17 = arith.constant 0 : index
    %c0_18 = arith.constant 0 : index
    %65 = memref.load %arg2[%c0_17, %c0_18] : memref<1x3xf32, #tpu.memory_space<smem>>
    %66 = vector.broadcast %65 : f32 to vector<16x128xf32>
    %67 = arith.addf %64, %66 : vector<16x128xf32>
    %cst_19 = arith.constant 0.000000e+00 : f32
    %68 = vector.broadcast %cst_19 : f32 to vector<16x128xf32>
    %69 = arith.subf %68, %25 : vector<16x128xf32>
    %70 = vector.broadcast %2 : f32 to vector<16x128xf32>
    %71 = arith.mulf %69, %70 : vector<16x128xf32>
    %72 = vector.broadcast %3 : f32 to vector<16x128xf32>
    %73 = arith.mulf %33, %72 : vector<16x128xf32>
    %74 = arith.addf %71, %73 : vector<16x128xf32>
    %75 = vector.broadcast %0 : f32 to vector<16x128xf32>
    %76 = arith.mulf %41, %75 : vector<16x128xf32>
    %77 = arith.addf %74, %76 : vector<16x128xf32>
    %78 = vector.broadcast %1 : f32 to vector<16x128xf32>
    %79 = arith.mulf %49, %78 : vector<16x128xf32>
    %80 = arith.subf %77, %79 : vector<16x128xf32>
    %81 = vector.broadcast %10 : f32 to vector<16x128xf32>
    %82 = arith.divf %80, %81 : vector<16x128xf32>
    %c0_20 = arith.constant 0 : index
    %c1_21 = arith.constant 1 : index
    %83 = memref.load %arg2[%c0_20, %c1_21] : memref<1x3xf32, #tpu.memory_space<smem>>
    %84 = vector.broadcast %83 : f32 to vector<16x128xf32>
    %85 = arith.addf %82, %84 : vector<16x128xf32>
    %cst_22 = arith.constant 0.000000e+00 : f32
    %86 = vector.broadcast %cst_22 : f32 to vector<16x128xf32>
    %87 = arith.subf %86, %25 : vector<16x128xf32>
    %88 = vector.broadcast %3 : f32 to vector<16x128xf32>
    %89 = arith.mulf %87, %88 : vector<16x128xf32>
    %90 = vector.broadcast %2 : f32 to vector<16x128xf32>
    %91 = arith.mulf %33, %90 : vector<16x128xf32>
    %92 = arith.subf %89, %91 : vector<16x128xf32>
    %93 = vector.broadcast %1 : f32 to vector<16x128xf32>
    %94 = arith.mulf %41, %93 : vector<16x128xf32>
    %95 = arith.addf %92, %94 : vector<16x128xf32>
    %96 = vector.broadcast %0 : f32 to vector<16x128xf32>
    %97 = arith.mulf %49, %96 : vector<16x128xf32>
    %98 = arith.addf %95, %97 : vector<16x128xf32>
    %99 = vector.broadcast %10 : f32 to vector<16x128xf32>
    %100 = arith.divf %98, %99 : vector<16x128xf32>
    %c0_23 = arith.constant 0 : index
    %c2_24 = arith.constant 2 : index
    %101 = memref.load %arg2[%c0_23, %c2_24] : memref<1x3xf32, #tpu.memory_space<smem>>
    %102 = vector.broadcast %101 : f32 to vector<16x128xf32>
    %103 = arith.addf %100, %102 : vector<16x128xf32>
    %104 = arith.mulf %67, %67 : vector<16x128xf32>
    %105 = arith.mulf %85, %85 : vector<16x128xf32>
    %106 = arith.addf %104, %105 : vector<16x128xf32>
    %107 = arith.mulf %103, %103 : vector<16x128xf32>
    %108 = arith.addf %106, %107 : vector<16x128xf32>
    %109 = math.sqrt %108 : vector<16x128xf32>
    %110 = vector.shape_cast %109 : vector<16x128xf32> to vector<1x16x128xf32>
    %cst_25 = arith.constant dense<0.000000e+00> : vector<1xf32>
    %111 = vector.multi_reduction <add>, %110, %cst_25 [1, 2] : vector<1x16x128xf32> to vector<1xf32>
    %112 = vector.shape_cast %111 : vector<1xf32> to vector<1x1x1xf32>
    %113 = vector.extract %112[0, 0, 0] : f32 from vector<1x1x1xf32>
    %cst_26 = arith.constant 4.8828125E-4 : f32
    %114 = arith.mulf %113, %cst_26 : f32
    %115 = vector.shape_cast %67 : vector<16x128xf32> to vector<1x16x128xf32>
    %cst_27 = arith.constant dense<0.000000e+00> : vector<1xf32>
    %116 = vector.multi_reduction <add>, %115, %cst_27 [1, 2] : vector<1x16x128xf32> to vector<1xf32>
    %117 = vector.shape_cast %116 : vector<1xf32> to vector<1x1x1xf32>
    %118 = vector.extract %117[0, 0, 0] : f32 from vector<1x1x1xf32>
    %cst_28 = arith.constant 4.8828125E-4 : f32
    %119 = arith.mulf %118, %cst_28 : f32
    %120 = vector.shape_cast %85 : vector<16x128xf32> to vector<1x16x128xf32>
    %cst_29 = arith.constant dense<0.000000e+00> : vector<1xf32>
    %121 = vector.multi_reduction <add>, %120, %cst_29 [1, 2] : vector<1x16x128xf32> to vector<1xf32>
    %122 = vector.shape_cast %121 : vector<1xf32> to vector<1x1x1xf32>
    %123 = vector.extract %122[0, 0, 0] : f32 from vector<1x1x1xf32>
    %cst_30 = arith.constant 4.8828125E-4 : f32
    %124 = arith.mulf %123, %cst_30 : f32
    %125 = vector.shape_cast %103 : vector<16x128xf32> to vector<1x16x128xf32>
    %cst_31 = arith.constant dense<0.000000e+00> : vector<1xf32>
    %126 = vector.multi_reduction <add>, %125, %cst_31 [1, 2] : vector<1x16x128xf32> to vector<1xf32>
    %127 = vector.shape_cast %126 : vector<1xf32> to vector<1x1x1xf32>
    %128 = vector.extract %127[0, 0, 0] : f32 from vector<1x1x1xf32>
    %cst_32 = arith.constant 4.8828125E-4 : f32
    %129 = arith.mulf %128, %cst_32 : f32
    %c0_33 = arith.constant 0 : index
    %c0_34 = arith.constant 0 : index
    %130 = vector.load %arg5[%c0_33, %c0_34] : memref<10x512xf32, #tpu.memory_space<vmem>>, vector<1x512xf32>
    %131 = vector.broadcast %114 : f32 to vector<1x512xf32>
    %132 = arith.mulf %131, %130 : vector<1x512xf32>
    %c1_35 = arith.constant 1 : index
    %c0_36 = arith.constant 0 : index
    %133 = vector.load %arg5[%c1_35, %c0_36] : memref<10x512xf32, #tpu.memory_space<vmem>>, vector<1x512xf32>
    %134 = vector.broadcast %119 : f32 to vector<1x512xf32>
    %135 = arith.mulf %134, %133 : vector<1x512xf32>
    %136 = arith.addf %132, %135 : vector<1x512xf32>
    %c2_37 = arith.constant 2 : index
    %c0_38 = arith.constant 0 : index
    %137 = vector.load %arg5[%c2_37, %c0_38] : memref<10x512xf32, #tpu.memory_space<vmem>>, vector<1x512xf32>
    %138 = vector.broadcast %124 : f32 to vector<1x512xf32>
    %139 = arith.mulf %138, %137 : vector<1x512xf32>
    %140 = arith.addf %136, %139 : vector<1x512xf32>
    %c3_39 = arith.constant 3 : index
    %c0_40 = arith.constant 0 : index
    %141 = vector.load %arg5[%c3_39, %c0_40] : memref<10x512xf32, #tpu.memory_space<vmem>>, vector<1x512xf32>
    %142 = vector.broadcast %129 : f32 to vector<1x512xf32>
    %143 = arith.mulf %142, %141 : vector<1x512xf32>
    %144 = arith.addf %140, %143 : vector<1x512xf32>
    %c0_41 = arith.constant 0 : index
    %c0_42 = arith.constant 0 : index
    %145 = memref.load %arg3[%c0_41, %c0_42] : memref<1x5xf32, #tpu.memory_space<smem>>
    %c5 = arith.constant 5 : index
    %c0_43 = arith.constant 0 : index
    %146 = vector.load %arg5[%c5, %c0_43] : memref<10x512xf32, #tpu.memory_space<vmem>>, vector<1x512xf32>
    %147 = vector.broadcast %145 : f32 to vector<1x512xf32>
    %148 = arith.mulf %147, %146 : vector<1x512xf32>
    %149 = arith.addf %144, %148 : vector<1x512xf32>
    %c0_44 = arith.constant 0 : index
    %c1_45 = arith.constant 1 : index
    %150 = memref.load %arg3[%c0_44, %c1_45] : memref<1x5xf32, #tpu.memory_space<smem>>
    %c6 = arith.constant 6 : index
    %c0_46 = arith.constant 0 : index
    %151 = vector.load %arg5[%c6, %c0_46] : memref<10x512xf32, #tpu.memory_space<vmem>>, vector<1x512xf32>
    %152 = vector.broadcast %150 : f32 to vector<1x512xf32>
    %153 = arith.mulf %152, %151 : vector<1x512xf32>
    %154 = arith.addf %149, %153 : vector<1x512xf32>
    %c0_47 = arith.constant 0 : index
    %c2_48 = arith.constant 2 : index
    %155 = memref.load %arg3[%c0_47, %c2_48] : memref<1x5xf32, #tpu.memory_space<smem>>
    %c7 = arith.constant 7 : index
    %c0_49 = arith.constant 0 : index
    %156 = vector.load %arg5[%c7, %c0_49] : memref<10x512xf32, #tpu.memory_space<vmem>>, vector<1x512xf32>
    %157 = vector.broadcast %155 : f32 to vector<1x512xf32>
    %158 = arith.mulf %157, %156 : vector<1x512xf32>
    %159 = arith.addf %154, %158 : vector<1x512xf32>
    %c0_50 = arith.constant 0 : index
    %c3_51 = arith.constant 3 : index
    %160 = memref.load %arg3[%c0_50, %c3_51] : memref<1x5xf32, #tpu.memory_space<smem>>
    %c8 = arith.constant 8 : index
    %c0_52 = arith.constant 0 : index
    %161 = vector.load %arg5[%c8, %c0_52] : memref<10x512xf32, #tpu.memory_space<vmem>>, vector<1x512xf32>
    %162 = vector.broadcast %160 : f32 to vector<1x512xf32>
    %163 = arith.mulf %162, %161 : vector<1x512xf32>
    %164 = arith.addf %159, %163 : vector<1x512xf32>
    %c0_53 = arith.constant 0 : index
    %c4 = arith.constant 4 : index
    %165 = memref.load %arg3[%c0_53, %c4] : memref<1x5xf32, #tpu.memory_space<smem>>
    %c9 = arith.constant 9 : index
    %c0_54 = arith.constant 0 : index
    %166 = vector.load %arg5[%c9, %c0_54] : memref<10x512xf32, #tpu.memory_space<vmem>>, vector<1x512xf32>
    %167 = vector.broadcast %165 : f32 to vector<1x512xf32>
    %168 = arith.mulf %167, %166 : vector<1x512xf32>
    %169 = arith.addf %164, %168 : vector<1x512xf32>
    %c0_55 = arith.constant 0 : index
    %c0_56 = arith.constant 0 : index
    %170 = vector.load %arg6[%c0_55, %c0_56] : memref<1x512xf32, #tpu.memory_space<vmem>>, vector<1x512xf32>
    %171 = arith.addf %169, %170 : vector<1x512xf32>
    %cst_57 = arith.constant 0.000000e+00 : f32
    %172 = vector.broadcast %cst_57 : f32 to vector<1x512xf32>
    %173 = arith.maximumf %171, %172 : vector<1x512xf32>
    %c0_58 = arith.constant 0 : index
    %c0_59 = arith.constant 0 : index
    %174 = vector.load %arg7[%c0_58, %c0_59] : memref<512x100xf32, #tpu.memory_space<vmem>>, vector<512x100xf32>
    %cst_60 = arith.constant dense<0.000000e+00> : vector<1x100xf32>
    %175 = tpu.matmul %173, %174, %cst_60 {dimension_numbers = #tpu.dot_dimension_numbers<[1], [0], [0], [1], [0, 0, 1, 1], [], []>} : vector<1x512xf32>, vector<512x100xf32>, vector<1x100xf32> -> vector<1x100xf32>
    %c0_61 = arith.constant 0 : index
    %c0_62 = arith.constant 0 : index
    %176 = vector.load %arg8[%c0_61, %c0_62] : memref<1x100xf32, #tpu.memory_space<vmem>>, vector<1x100xf32>
    %177 = arith.addf %175, %176 : vector<1x100xf32>
    %cst_63 = arith.constant 0.000000e+00 : f32
    %178 = vector.broadcast %cst_63 : f32 to vector<1x100xf32>
    %179 = arith.maximumf %177, %178 : vector<1x100xf32>
    %c0_64 = arith.constant 0 : index
    %c0_65 = arith.constant 0 : index
    %180 = vector.load %arg11[%c0_64, %c0_65] : memref<512x100xf32, #tpu.memory_space<vmem>>, vector<512x100xf32>
    %cst_66 = arith.constant dense<0.000000e+00> : vector<1x100xf32>
    %181 = tpu.matmul %173, %180, %cst_66 {dimension_numbers = #tpu.dot_dimension_numbers<[1], [0], [0], [1], [0, 0, 1, 1], [], []>} : vector<1x512xf32>, vector<512x100xf32>, vector<1x100xf32> -> vector<1x100xf32>
    %c0_67 = arith.constant 0 : index
    %c0_68 = arith.constant 0 : index
    %182 = vector.load %arg12[%c0_67, %c0_68] : memref<1x100xf32, #tpu.memory_space<vmem>>, vector<1x100xf32>
    %183 = arith.addf %181, %182 : vector<1x100xf32>
    %cst_69 = arith.constant 0.000000e+00 : f32
    %184 = vector.broadcast %cst_69 : f32 to vector<1x100xf32>
    %185 = arith.maximumf %183, %184 : vector<1x100xf32>
    %c0_70 = arith.constant 0 : index
    %c0_71 = arith.constant 0 : index
    %186 = vector.load %arg9[%c0_70, %c0_71] : memref<100x4xf32, #tpu.memory_space<vmem>>, vector<100x4xf32>
    %cst_72 = arith.constant dense<0.000000e+00> : vector<1x4xf32>
    %187 = tpu.matmul %179, %186, %cst_72 {dimension_numbers = #tpu.dot_dimension_numbers<[1], [0], [0], [1], [0, 0, 1, 1], [], []>} : vector<1x100xf32>, vector<100x4xf32>, vector<1x4xf32> -> vector<1x4xf32>
    %c0_73 = arith.constant 0 : index
    %c0_74 = arith.constant 0 : index
    %188 = vector.load %arg10[%c0_73, %c0_74] : memref<1x4xf32, #tpu.memory_space<vmem>>, vector<1x4xf32>
    %189 = arith.addf %187, %188 : vector<1x4xf32>
    %c0_75 = arith.constant 0 : index
    %c0_76 = arith.constant 0 : index
    %190 = vector.load %arg13[%c0_75, %c0_76] : memref<100x3xf32, #tpu.memory_space<vmem>>, vector<100x3xf32>
    %cst_77 = arith.constant dense<0.000000e+00> : vector<1x3xf32>
    %191 = tpu.matmul %185, %190, %cst_77 {dimension_numbers = #tpu.dot_dimension_numbers<[1], [0], [0], [1], [0, 0, 1, 1], [], []>} : vector<1x100xf32>, vector<100x3xf32>, vector<1x3xf32> -> vector<1x3xf32>
    %c0_78 = arith.constant 0 : index
    %c0_79 = arith.constant 0 : index
    %192 = vector.load %arg14[%c0_78, %c0_79] : memref<1x3xf32, #tpu.memory_space<vmem>>, vector<1x3xf32>
    %193 = arith.addf %191, %192 : vector<1x3xf32>
    %194 = arith.mulf %189, %189 : vector<1x4xf32>
    %cst_80 = arith.constant dense<0.000000e+00> : vector<1xf32>
    %195 = vector.multi_reduction <add>, %194, %cst_80 [1] : vector<1x4xf32> to vector<1xf32>
    %196 = vector.shape_cast %195 : vector<1xf32> to vector<1x1xf32>
    %cst_81 = arith.constant 9.99999996E-13 : f32
    %197 = vector.broadcast %cst_81 : f32 to vector<1x1xf32>
    %198 = arith.addf %196, %197 : vector<1x1xf32>
    %199 = math.rsqrt %198 : vector<1x1xf32>
    %200 = vector.broadcast %199 : vector<1x1xf32> to vector<1x4xf32>
    %201 = arith.mulf %189, %200 : vector<1x4xf32>
    %c0_82 = arith.constant 0 : index
    %c0_83 = arith.constant 0 : index
    %202 = vector.load %arg15[%c0_82, %c0_83] : memref<1x4xf32, #tpu.memory_space<vmem>>, vector<1x4xf32>
    tpu.vector_store %arg15[%c0_82, %c0_83], %201 {strides = array<i32>} : memref<1x4xf32, #tpu.memory_space<vmem>>, vector<1x4xf32>,
    %c0_84 = arith.constant 0 : index
    %c0_85 = arith.constant 0 : index
    %203 = vector.load %arg16[%c0_84, %c0_85] : memref<1x3xf32, #tpu.memory_space<vmem>>, vector<1x3xf32>
    tpu.vector_store %arg16[%c0_84, %c0_85], %193 {strides = array<i32>} : memref<1x3xf32, #tpu.memory_space<vmem>>, vector<1x3xf32>,
    return
  }
  func.func @transform_0(%arg0: i32) -> (i32, i32) {
    %c0_i32 = arith.constant 0 : i32
    %c0_i32_0 = arith.constant 0 : i32
    %c0_i32_1 = arith.constant 0 : i32
    return %c0_i32, %c0_i32_0 : i32, i32
  }
  func.func @transform_1(%arg0: i32) -> (i32, i32) {
    %c0_i32 = arith.constant 0 : i32
    %c0_i32_0 = arith.constant 0 : i32
    %c0_i32_1 = arith.constant 0 : i32
    return %c0_i32, %c0_i32_0 : i32, i32
  }
  func.func @transform_2(%arg0: i32) -> (i32, i32) {
    %c0_i32 = arith.constant 0 : i32
    %c0_i32_0 = arith.constant 0 : i32
    %c0_i32_1 = arith.constant 0 : i32
    return %c0_i32, %c0_i32_0 : i32, i32
  }
  func.func @transform_3(%arg0: i32) -> (i32, i32, i32, i32) {
    %c0_i32 = arith.constant 0 : i32
    %c0_i32_0 = arith.constant 0 : i32
    %c0_i32_1 = arith.constant 0 : i32
    %c0_i32_2 = arith.constant 0 : i32
    %c0_i32_3 = arith.constant 0 : i32
    return %c0_i32, %c0_i32_0, %c0_i32_1, %c0_i32_2 : i32, i32, i32, i32
  }
  func.func @transform_4(%arg0: i32) -> (i32, i32) {
    %c0_i32 = arith.constant 0 : i32
    %c0_i32_0 = arith.constant 0 : i32
    %c0_i32_1 = arith.constant 0 : i32
    return %c0_i32, %c0_i32_0 : i32, i32
  }
  func.func @transform_5(%arg0: i32) -> (i32, i32) {
    %c0_i32 = arith.constant 0 : i32
    %c0_i32_0 = arith.constant 0 : i32
    %c0_i32_1 = arith.constant 0 : i32
    return %c0_i32, %c0_i32_0 : i32, i32
  }
  func.func @transform_6(%arg0: i32) -> (i32, i32) {
    %c0_i32 = arith.constant 0 : i32
    %c0_i32_0 = arith.constant 0 : i32
    %c0_i32_1 = arith.constant 0 : i32
    return %c0_i32, %c0_i32_0 : i32, i32
  }
  func.func @transform_7(%arg0: i32) -> (i32, i32) {
    %c0_i32 = arith.constant 0 : i32
    %c0_i32_0 = arith.constant 0 : i32
    %c0_i32_1 = arith.constant 0 : i32
    return %c0_i32, %c0_i32_0 : i32, i32
  }
  func.func @transform_8(%arg0: i32) -> (i32, i32) {
    %c0_i32 = arith.constant 0 : i32
    %c0_i32_0 = arith.constant 0 : i32
    %c0_i32_1 = arith.constant 0 : i32
    return %c0_i32, %c0_i32_0 : i32, i32
  }
  func.func @transform_9(%arg0: i32) -> (i32, i32) {
    %c0_i32 = arith.constant 0 : i32
    %c0_i32_0 = arith.constant 0 : i32
    %c0_i32_1 = arith.constant 0 : i32
    return %c0_i32, %c0_i32_0 : i32, i32
  }
  func.func @transform_10(%arg0: i32) -> (i32, i32) {
    %c0_i32 = arith.constant 0 : i32
    %c0_i32_0 = arith.constant 0 : i32
    %c0_i32_1 = arith.constant 0 : i32
    return %c0_i32, %c0_i32_0 : i32, i32
  }
  func.func @transform_11(%arg0: i32) -> (i32, i32) {
    %c0_i32 = arith.constant 0 : i32
    %c0_i32_0 = arith.constant 0 : i32
    %c0_i32_1 = arith.constant 0 : i32
    return %c0_i32, %c0_i32_0 : i32, i32
  }
  func.func @transform_12(%arg0: i32) -> (i32, i32) {
    %c0_i32 = arith.constant 0 : i32
    %c0_i32_0 = arith.constant 0 : i32
    %c0_i32_1 = arith.constant 0 : i32
    return %c0_i32, %c0_i32_0 : i32, i32
  }
  func.func @transform_13(%arg0: i32) -> (i32, i32) {
    %c0_i32 = arith.constant 0 : i32
    %c0_i32_0 = arith.constant 0 : i32
    %c0_i32_1 = arith.constant 0 : i32
    return %c0_i32, %c0_i32_0 : i32, i32
  }
  func.func @transform_14(%arg0: i32) -> (i32, i32) {
    %c0_i32 = arith.constant 0 : i32
    %c0_i32_0 = arith.constant 0 : i32
    %c0_i32_1 = arith.constant 0 : i32
    return %c0_i32, %c0_i32_0 : i32, i32
  }
  func.func @transform_15(%arg0: i32) -> (i32, i32) {
    %c0_i32 = arith.constant 0 : i32
    %c0_i32_0 = arith.constant 0 : i32
    %c0_i32_1 = arith.constant 0 : i32
    return %c0_i32, %c0_i32_0 : i32, i32
  }
}

module attributes {stable_mosaic.version = 11 : i64} {
  func.func @_warp_pool_fc_kernel(%arg0: i32, %arg1: memref<1x4xf32, #tpu.memory_space<smem>>, %arg2: memref<1x3xf32, #tpu.memory_space<smem>>, %arg3: memref<1x5xf32, #tpu.memory_space<smem>>, %arg4: memref<1x3x16x128xf32, #tpu.memory_space<vmem>>, %arg5: memref<10x256xf32, #tpu.memory_space<vmem>>, %arg6: memref<1x256xf32, #tpu.memory_space<vmem>>, %arg7: memref<256x100xf32, #tpu.memory_space<vmem>>, %arg8: memref<1x100xf32, #tpu.memory_space<vmem>>, %arg9: memref<100x4xf32, #tpu.memory_space<vmem>>, %arg10: memref<1x4xf32, #tpu.memory_space<vmem>>, %arg11: memref<256x100xf32, #tpu.memory_space<vmem>>, %arg12: memref<1x100xf32, #tpu.memory_space<vmem>>, %arg13: memref<100x3xf32, #tpu.memory_space<vmem>>, %arg14: memref<1x3xf32, #tpu.memory_space<vmem>>, %arg15: memref<1x4xf32, #tpu.memory_space<vmem>>, %arg16: memref<1x3xf32, #tpu.memory_space<vmem>>) attributes {dimension_semantics = [#tpu.dimension_semantics<arbitrary>], iteration_bounds = array<i64: 1>, scalar_prefetch = 0 : i64, scratch_operands = 0 : i64, tpu.core_type = #tpu.core_type<tc>, window_params = [{transform_indices = @transform_0, window_bounds = array<i64: 1, 4>}, {transform_indices = @transform_1, window_bounds = array<i64: 1, 3>}, {transform_indices = @transform_2, window_bounds = array<i64: 1, 5>}, {pipeline_mode = #tpu.pipeline_mode<synchronous>, transform_indices = @transform_3, window_bounds = array<i64: 1, 3, 16, 128>}, {pipeline_mode = #tpu.pipeline_mode<synchronous>, transform_indices = @transform_4, window_bounds = array<i64: 10, 256>}, {pipeline_mode = #tpu.pipeline_mode<synchronous>, transform_indices = @transform_5, window_bounds = array<i64: 1, 256>}, {pipeline_mode = #tpu.pipeline_mode<synchronous>, transform_indices = @transform_6, window_bounds = array<i64: 256, 100>}, {pipeline_mode = #tpu.pipeline_mode<synchronous>, transform_indices = @transform_7, window_bounds = array<i64: 1, 100>}, {pipeline_mode = #tpu.pipeline_mode<synchronous>, transform_indices = @transform_8, window_bounds = array<i64: 100, 4>}, {pipeline_mode = #tpu.pipeline_mode<synchronous>, transform_indices = @transform_9, window_bounds = array<i64: 1, 4>}, {pipeline_mode = #tpu.pipeline_mode<synchronous>, transform_indices = @transform_10, window_bounds = array<i64: 256, 100>}, {pipeline_mode = #tpu.pipeline_mode<synchronous>, transform_indices = @transform_11, window_bounds = array<i64: 1, 100>}, {pipeline_mode = #tpu.pipeline_mode<synchronous>, transform_indices = @transform_12, window_bounds = array<i64: 100, 3>}, {pipeline_mode = #tpu.pipeline_mode<synchronous>, transform_indices = @transform_13, window_bounds = array<i64: 1, 3>}, {pipeline_mode = #tpu.pipeline_mode<synchronous>, transform_indices = @transform_14, window_bounds = array<i64: 1, 4>}, {pipeline_mode = #tpu.pipeline_mode<synchronous>, transform_indices = @transform_15, window_bounds = array<i64: 1, 3>}]} {
    %c0 = arith.constant 0 : index
    %c0_0 = arith.constant 0 : index
    %0 = memref.load %arg1[%c0, %c0_0] : memref<1x4xf32, #tpu.memory_space<smem>>
    %c0_1 = arith.constant 0 : index
    %c1 = arith.constant 1 : index
    %1 = memref.load %arg1[%c0_1, %c1] : memref<1x4xf32, #tpu.memory_space<smem>>
    %c0_2 = arith.constant 0 : index
    %c2 = arith.constant 2 : index
    %2 = memref.load %arg1[%c0_2, %c2] : memref<1x4xf32, #tpu.memory_space<smem>>
    %c0_3 = arith.constant 0 : index
    %c3 = arith.constant 3 : index
    %3 = memref.load %arg1[%c0_3, %c3] : memref<1x4xf32, #tpu.memory_space<smem>>
    %4 = arith.mulf %0, %0 : f32
    %5 = arith.mulf %1, %1 : f32
    %6 = arith.addf %4, %5 : f32
    %7 = arith.mulf %2, %2 : f32
    %8 = arith.addf %6, %7 : f32
    %9 = arith.mulf %3, %3 : f32
    %10 = arith.addf %8, %9 : f32
    %c0_4 = arith.constant 0 : index
    %c0_5 = arith.constant 0 : index
    %c0_6 = arith.constant 0 : index
    %c0_7 = arith.constant 0 : index
    %11 = vector.load %arg4[%c0_4, %c0_5, %c0_6, %c0_7] : memref<1x3x16x128xf32, #tpu.memory_space<vmem>>, vector<1x1x16x128xf32>
    %12 = vector.shape_cast %11 : vector<1x1x16x128xf32> to vector<16x128xf32>
    %c0_8 = arith.constant 0 : index
    %c1_9 = arith.constant 1 : index
    %c0_10 = arith.constant 0 : index
    %c0_11 = arith.constant 0 : index
    %13 = vector.load %arg4[%c0_8, %c1_9, %c0_10, %c0_11] : memref<1x3x16x128xf32, #tpu.memory_space<vmem>>, vector<1x1x16x128xf32>
    %14 = vector.shape_cast %13 : vector<1x1x16x128xf32> to vector<16x128xf32>
    %c0_12 = arith.constant 0 : index
    %c2_13 = arith.constant 2 : index
    %c0_14 = arith.constant 0 : index
    %c0_15 = arith.constant 0 : index
    %15 = vector.load %arg4[%c0_12, %c2_13, %c0_14, %c0_15] : memref<1x3x16x128xf32, #tpu.memory_space<vmem>>, vector<1x1x16x128xf32>
    %16 = vector.shape_cast %15 : vector<1x1x16x128xf32> to vector<16x128xf32>
    %cst = arith.constant 0.000000e+00 : f32
    %17 = arith.subf %cst, %1 : f32
    %18 = vector.broadcast %17 : f32 to vector<16x128xf32>
    %19 = arith.mulf %18, %12 : vector<16x128xf32>
    %20 = vector.broadcast %2 : f32 to vector<16x128xf32>
    %21 = arith.mulf %20, %14 : vector<16x128xf32>
    %22 = arith.subf %19, %21 : vector<16x128xf32>
    %23 = vector.broadcast %3 : f32 to vector<16x128xf32>
    %24 = arith.mulf %23, %16 : vector<16x128xf32>
    %25 = arith.subf %22, %24 : vector<16x128xf32>
    %26 = vector.broadcast %0 : f32 to vector<16x128xf32>
    %27 = arith.mulf %26, %12 : vector<16x128xf32>
    %28 = vector.broadcast %2 : f32 to vector<16x128xf32>
    %29 = arith.mulf %28, %16 : vector<16x128xf32>
    %30 = arith.addf %27, %29 : vector<16x128xf32>
    %31 = vector.broadcast %3 : f32 to vector<16x128xf32>
    %32 = arith.mulf %31, %14 : vector<16x128xf32>
    %33 = arith.subf %30, %32 : vector<16x128xf32>
    %34 = vector.broadcast %0 : f32 to vector<16x128xf32>
    %35 = arith.mulf %34, %14 : vector<16x128xf32>
    %36 = vector.broadcast %3 : f32 to vector<16x128xf32>
    %37 = arith.mulf %36, %12 : vector<16x128xf32>
    %38 = arith.addf %35, %37 : vector<16x128xf32>
    %39 = vector.broadcast %1 : f32 to vector<16x128xf32>
    %40 = arith.mulf %39, %16 : vector<16x128xf32>
    %41 = arith.subf %38, %40 : vector<16x128xf32>
    %42 = vector.broadcast %0 : f32 to vector<16x128xf32>
    %43 = arith.mulf %42, %16 : vector<16x128xf32>
    %44 = vector.broadcast %1 : f32 to vector<16x128xf32>
    %45 = arith.mulf %44, %14 : vector<16x128xf32>
    %46 = arith.addf %43, %45 : vector<16x128xf32>
    %47 = vector.broadcast %2 : f32 to vector<16x128xf32>
    %48 = arith.mulf %47, %12 : vector<16x128xf32>
    %49 = arith.subf %46, %48 : vector<16x128xf32>
    %cst_16 = arith.constant 0.000000e+00 : f32
    %50 = vector.broadcast %cst_16 : f32 to vector<16x128xf32>
    %51 = arith.subf %50, %25 : vector<16x128xf32>
    %52 = vector.broadcast %1 : f32 to vector<16x128xf32>
    %53 = arith.mulf %51, %52 : vector<16x128xf32>
    %54 = vector.broadcast %0 : f32 to vector<16x128xf32>
    %55 = arith.mulf %33, %54 : vector<16x128xf32>
    %56 = arith.addf %53, %55 : vector<16x128xf32>
    %57 = vector.broadcast %3 : f32 to vector<16x128xf32>
    %58 = arith.mulf %41, %57 : vector<16x128xf32>
    %59 = arith.subf %56, %58 : vector<16x128xf32>
    %60 = vector.broadcast %2 : f32 to vector<16x128xf32>
    %61 = arith.mulf %49, %60 : vector<16x128xf32>
    %62 = arith.addf %59, %61 : vector<16x128xf32>
    %63 = vector.broadcast %10 : f32 to vector<16x128xf32>
    %64 = arith.divf %62, %63 : vector<16x128xf32>
    %c0_17 = arith.constant 0 : index
    %c0_18 = arith.constant 0 : index
    %65 = memref.load %arg2[%c0_17, %c0_18] : memref<1x3xf32, #tpu.memory_space<smem>>
    %66 = vector.broadcast %65 : f32 to vector<16x128xf32>
    %67 = arith.addf %64, %66 : vector<16x128xf32>
    %cst_19 = arith.constant 0.000000e+00 : f32
    %68 = vector.broadcast %cst_19 : f32 to vector<16x128xf32>
    %69 = arith.subf %68, %25 : vector<16x128xf32>
    %70 = vector.broadcast %2 : f32 to vector<16x128xf32>
    %71 = arith.mulf %69, %70 : vector<16x128xf32>
    %72 = vector.broadcast %3 : f32 to vector<16x128xf32>
    %73 = arith.mulf %33, %72 : vector<16x128xf32>
    %74 = arith.addf %71, %73 : vector<16x128xf32>
    %75 = vector.broadcast %0 : f32 to vector<16x128xf32>
    %76 = arith.mulf %41, %75 : vector<16x128xf32>
    %77 = arith.addf %74, %76 : vector<16x128xf32>
    %78 = vector.broadcast %1 : f32 to vector<16x128xf32>
    %79 = arith.mulf %49, %78 : vector<16x128xf32>
    %80 = arith.subf %77, %79 : vector<16x128xf32>
    %81 = vector.broadcast %10 : f32 to vector<16x128xf32>
    %82 = arith.divf %80, %81 : vector<16x128xf32>
    %c0_20 = arith.constant 0 : index
    %c1_21 = arith.constant 1 : index
    %83 = memref.load %arg2[%c0_20, %c1_21] : memref<1x3xf32, #tpu.memory_space<smem>>
    %84 = vector.broadcast %83 : f32 to vector<16x128xf32>
    %85 = arith.addf %82, %84 : vector<16x128xf32>
    %cst_22 = arith.constant 0.000000e+00 : f32
    %86 = vector.broadcast %cst_22 : f32 to vector<16x128xf32>
    %87 = arith.subf %86, %25 : vector<16x128xf32>
    %88 = vector.broadcast %3 : f32 to vector<16x128xf32>
    %89 = arith.mulf %87, %88 : vector<16x128xf32>
    %90 = vector.broadcast %2 : f32 to vector<16x128xf32>
    %91 = arith.mulf %33, %90 : vector<16x128xf32>
    %92 = arith.subf %89, %91 : vector<16x128xf32>
    %93 = vector.broadcast %1 : f32 to vector<16x128xf32>
    %94 = arith.mulf %41, %93 : vector<16x128xf32>
    %95 = arith.addf %92, %94 : vector<16x128xf32>
    %96 = vector.broadcast %0 : f32 to vector<16x128xf32>
    %97 = arith.mulf %49, %96 : vector<16x128xf32>
    %98 = arith.addf %95, %97 : vector<16x128xf32>
    %99 = vector.broadcast %10 : f32 to vector<16x128xf32>
    %100 = arith.divf %98, %99 : vector<16x128xf32>
    %c0_23 = arith.constant 0 : index
    %c2_24 = arith.constant 2 : index
    %101 = memref.load %arg2[%c0_23, %c2_24] : memref<1x3xf32, #tpu.memory_space<smem>>
    %102 = vector.broadcast %101 : f32 to vector<16x128xf32>
    %103 = arith.addf %100, %102 : vector<16x128xf32>
    %104 = arith.mulf %67, %67 : vector<16x128xf32>
    %105 = arith.mulf %85, %85 : vector<16x128xf32>
    %106 = arith.addf %104, %105 : vector<16x128xf32>
    %107 = arith.mulf %103, %103 : vector<16x128xf32>
    %108 = arith.addf %106, %107 : vector<16x128xf32>
    %109 = math.sqrt %108 : vector<16x128xf32>
    %110 = vector.shape_cast %109 : vector<16x128xf32> to vector<1x16x128xf32>
    %cst_25 = arith.constant dense<0.000000e+00> : vector<1xf32>
    %111 = vector.multi_reduction <add>, %110, %cst_25 [1, 2] : vector<1x16x128xf32> to vector<1xf32>
    %112 = vector.shape_cast %111 : vector<1xf32> to vector<1x1x1xf32>
    %113 = vector.extract %112[0, 0, 0] : f32 from vector<1x1x1xf32>
    %cst_26 = arith.constant 4.8828125E-4 : f32
    %114 = arith.mulf %113, %cst_26 : f32
    %115 = vector.shape_cast %67 : vector<16x128xf32> to vector<1x16x128xf32>
    %cst_27 = arith.constant dense<0.000000e+00> : vector<1xf32>
    %116 = vector.multi_reduction <add>, %115, %cst_27 [1, 2] : vector<1x16x128xf32> to vector<1xf32>
    %117 = vector.shape_cast %116 : vector<1xf32> to vector<1x1x1xf32>
    %118 = vector.extract %117[0, 0, 0] : f32 from vector<1x1x1xf32>
    %cst_28 = arith.constant 4.8828125E-4 : f32
    %119 = arith.mulf %118, %cst_28 : f32
    %120 = vector.shape_cast %85 : vector<16x128xf32> to vector<1x16x128xf32>
    %cst_29 = arith.constant dense<0.000000e+00> : vector<1xf32>
    %121 = vector.multi_reduction <add>, %120, %cst_29 [1, 2] : vector<1x16x128xf32> to vector<1xf32>
    %122 = vector.shape_cast %121 : vector<1xf32> to vector<1x1x1xf32>
    %123 = vector.extract %122[0, 0, 0] : f32 from vector<1x1x1xf32>
    %cst_30 = arith.constant 4.8828125E-4 : f32
    %124 = arith.mulf %123, %cst_30 : f32
    %125 = vector.shape_cast %103 : vector<16x128xf32> to vector<1x16x128xf32>
    %cst_31 = arith.constant dense<0.000000e+00> : vector<1xf32>
    %126 = vector.multi_reduction <add>, %125, %cst_31 [1, 2] : vector<1x16x128xf32> to vector<1xf32>
    %127 = vector.shape_cast %126 : vector<1xf32> to vector<1x1x1xf32>
    %128 = vector.extract %127[0, 0, 0] : f32 from vector<1x1x1xf32>
    %cst_32 = arith.constant 4.8828125E-4 : f32
    %129 = arith.mulf %128, %cst_32 : f32
    %c0_33 = arith.constant 0 : index
    %c0_34 = arith.constant 0 : index
    %130 = vector.load %arg5[%c0_33, %c0_34] : memref<10x256xf32, #tpu.memory_space<vmem>>, vector<1x256xf32>
    %131 = vector.broadcast %114 : f32 to vector<1x256xf32>
    %132 = arith.mulf %131, %130 : vector<1x256xf32>
    %c1_35 = arith.constant 1 : index
    %c0_36 = arith.constant 0 : index
    %133 = vector.load %arg5[%c1_35, %c0_36] : memref<10x256xf32, #tpu.memory_space<vmem>>, vector<1x256xf32>
    %134 = vector.broadcast %119 : f32 to vector<1x256xf32>
    %135 = arith.mulf %134, %133 : vector<1x256xf32>
    %136 = arith.addf %132, %135 : vector<1x256xf32>
    %c2_37 = arith.constant 2 : index
    %c0_38 = arith.constant 0 : index
    %137 = vector.load %arg5[%c2_37, %c0_38] : memref<10x256xf32, #tpu.memory_space<vmem>>, vector<1x256xf32>
    %138 = vector.broadcast %124 : f32 to vector<1x256xf32>
    %139 = arith.mulf %138, %137 : vector<1x256xf32>
    %140 = arith.addf %136, %139 : vector<1x256xf32>
    %c3_39 = arith.constant 3 : index
    %c0_40 = arith.constant 0 : index
    %141 = vector.load %arg5[%c3_39, %c0_40] : memref<10x256xf32, #tpu.memory_space<vmem>>, vector<1x256xf32>
    %142 = vector.broadcast %129 : f32 to vector<1x256xf32>
    %143 = arith.mulf %142, %141 : vector<1x256xf32>
    %144 = arith.addf %140, %143 : vector<1x256xf32>
    %c0_41 = arith.constant 0 : index
    %c0_42 = arith.constant 0 : index
    %145 = memref.load %arg3[%c0_41, %c0_42] : memref<1x5xf32, #tpu.memory_space<smem>>
    %c5 = arith.constant 5 : index
    %c0_43 = arith.constant 0 : index
    %146 = vector.load %arg5[%c5, %c0_43] : memref<10x256xf32, #tpu.memory_space<vmem>>, vector<1x256xf32>
    %147 = vector.broadcast %145 : f32 to vector<1x256xf32>
    %148 = arith.mulf %147, %146 : vector<1x256xf32>
    %149 = arith.addf %144, %148 : vector<1x256xf32>
    %c0_44 = arith.constant 0 : index
    %c1_45 = arith.constant 1 : index
    %150 = memref.load %arg3[%c0_44, %c1_45] : memref<1x5xf32, #tpu.memory_space<smem>>
    %c6 = arith.constant 6 : index
    %c0_46 = arith.constant 0 : index
    %151 = vector.load %arg5[%c6, %c0_46] : memref<10x256xf32, #tpu.memory_space<vmem>>, vector<1x256xf32>
    %152 = vector.broadcast %150 : f32 to vector<1x256xf32>
    %153 = arith.mulf %152, %151 : vector<1x256xf32>
    %154 = arith.addf %149, %153 : vector<1x256xf32>
    %c0_47 = arith.constant 0 : index
    %c2_48 = arith.constant 2 : index
    %155 = memref.load %arg3[%c0_47, %c2_48] : memref<1x5xf32, #tpu.memory_space<smem>>
    %c7 = arith.constant 7 : index
    %c0_49 = arith.constant 0 : index
    %156 = vector.load %arg5[%c7, %c0_49] : memref<10x256xf32, #tpu.memory_space<vmem>>, vector<1x256xf32>
    %157 = vector.broadcast %155 : f32 to vector<1x256xf32>
    %158 = arith.mulf %157, %156 : vector<1x256xf32>
    %159 = arith.addf %154, %158 : vector<1x256xf32>
    %c0_50 = arith.constant 0 : index
    %c3_51 = arith.constant 3 : index
    %160 = memref.load %arg3[%c0_50, %c3_51] : memref<1x5xf32, #tpu.memory_space<smem>>
    %c8 = arith.constant 8 : index
    %c0_52 = arith.constant 0 : index
    %161 = vector.load %arg5[%c8, %c0_52] : memref<10x256xf32, #tpu.memory_space<vmem>>, vector<1x256xf32>
    %162 = vector.broadcast %160 : f32 to vector<1x256xf32>
    %163 = arith.mulf %162, %161 : vector<1x256xf32>
    %164 = arith.addf %159, %163 : vector<1x256xf32>
    %c0_53 = arith.constant 0 : index
    %c4 = arith.constant 4 : index
    %165 = memref.load %arg3[%c0_53, %c4] : memref<1x5xf32, #tpu.memory_space<smem>>
    %c9 = arith.constant 9 : index
    %c0_54 = arith.constant 0 : index
    %166 = vector.load %arg5[%c9, %c0_54] : memref<10x256xf32, #tpu.memory_space<vmem>>, vector<1x256xf32>
    %167 = vector.broadcast %165 : f32 to vector<1x256xf32>
    %168 = arith.mulf %167, %166 : vector<1x256xf32>
    %169 = arith.addf %164, %168 : vector<1x256xf32>
    %c0_55 = arith.constant 0 : index
    %c0_56 = arith.constant 0 : index
    %170 = vector.load %arg6[%c0_55, %c0_56] : memref<1x256xf32, #tpu.memory_space<vmem>>, vector<1x256xf32>
    %171 = arith.addf %169, %170 : vector<1x256xf32>
    %cst_57 = arith.constant 0.000000e+00 : f32
    %172 = vector.broadcast %cst_57 : f32 to vector<1x256xf32>
    %173 = arith.maximumf %171, %172 : vector<1x256xf32>
    %c0_58 = arith.constant 0 : index
    %c0_59 = arith.constant 0 : index
    %174 = vector.load %arg7[%c0_58, %c0_59] : memref<256x100xf32, #tpu.memory_space<vmem>>, vector<256x100xf32>
    %cst_60 = arith.constant dense<0.000000e+00> : vector<1x100xf32>
    %175 = tpu.matmul %173, %174, %cst_60 {dimension_numbers = #tpu.dot_dimension_numbers<[1], [0], [0], [1], [0, 0, 1, 1], [], []>} : vector<1x256xf32>, vector<256x100xf32>, vector<1x100xf32> -> vector<1x100xf32>
    %c0_61 = arith.constant 0 : index
    %c0_62 = arith.constant 0 : index
    %176 = vector.load %arg8[%c0_61, %c0_62] : memref<1x100xf32, #tpu.memory_space<vmem>>, vector<1x100xf32>
    %177 = arith.addf %175, %176 : vector<1x100xf32>
    %cst_63 = arith.constant 0.000000e+00 : f32
    %178 = vector.broadcast %cst_63 : f32 to vector<1x100xf32>
    %179 = arith.maximumf %177, %178 : vector<1x100xf32>
    %c0_64 = arith.constant 0 : index
    %c0_65 = arith.constant 0 : index
    %180 = vector.load %arg11[%c0_64, %c0_65] : memref<256x100xf32, #tpu.memory_space<vmem>>, vector<256x100xf32>
    %cst_66 = arith.constant dense<0.000000e+00> : vector<1x100xf32>
    %181 = tpu.matmul %173, %180, %cst_66 {dimension_numbers = #tpu.dot_dimension_numbers<[1], [0], [0], [1], [0, 0, 1, 1], [], []>} : vector<1x256xf32>, vector<256x100xf32>, vector<1x100xf32> -> vector<1x100xf32>
    %c0_67 = arith.constant 0 : index
    %c0_68 = arith.constant 0 : index
    %182 = vector.load %arg12[%c0_67, %c0_68] : memref<1x100xf32, #tpu.memory_space<vmem>>, vector<1x100xf32>
    %183 = arith.addf %181, %182 : vector<1x100xf32>
    %cst_69 = arith.constant 0.000000e+00 : f32
    %184 = vector.broadcast %cst_69 : f32 to vector<1x100xf32>
    %185 = arith.maximumf %183, %184 : vector<1x100xf32>
    %c0_70 = arith.constant 0 : index
    %c0_71 = arith.constant 0 : index
    %186 = vector.load %arg9[%c0_70, %c0_71] : memref<100x4xf32, #tpu.memory_space<vmem>>, vector<100x4xf32>
    %cst_72 = arith.constant dense<0.000000e+00> : vector<1x4xf32>
    %187 = tpu.matmul %179, %186, %cst_72 {dimension_numbers = #tpu.dot_dimension_numbers<[1], [0], [0], [1], [0, 0, 1, 1], [], []>} : vector<1x100xf32>, vector<100x4xf32>, vector<1x4xf32> -> vector<1x4xf32>
    %c0_73 = arith.constant 0 : index
    %c0_74 = arith.constant 0 : index
    %188 = vector.load %arg10[%c0_73, %c0_74] : memref<1x4xf32, #tpu.memory_space<vmem>>, vector<1x4xf32>
    %189 = arith.addf %187, %188 : vector<1x4xf32>
    %c0_75 = arith.constant 0 : index
    %c0_76 = arith.constant 0 : index
    %190 = vector.load %arg13[%c0_75, %c0_76] : memref<100x3xf32, #tpu.memory_space<vmem>>, vector<100x3xf32>
    %cst_77 = arith.constant dense<0.000000e+00> : vector<1x3xf32>
    %191 = tpu.matmul %185, %190, %cst_77 {dimension_numbers = #tpu.dot_dimension_numbers<[1], [0], [0], [1], [0, 0, 1, 1], [], []>} : vector<1x100xf32>, vector<100x3xf32>, vector<1x3xf32> -> vector<1x3xf32>
    %c0_78 = arith.constant 0 : index
    %c0_79 = arith.constant 0 : index
    %192 = vector.load %arg14[%c0_78, %c0_79] : memref<1x3xf32, #tpu.memory_space<vmem>>, vector<1x3xf32>
    %193 = arith.addf %191, %192 : vector<1x3xf32>
    %194 = arith.mulf %189, %189 : vector<1x4xf32>
    %cst_80 = arith.constant dense<0.000000e+00> : vector<1xf32>
    %195 = vector.multi_reduction <add>, %194, %cst_80 [1] : vector<1x4xf32> to vector<1xf32>
    %196 = vector.shape_cast %195 : vector<1xf32> to vector<1x1xf32>
    %cst_81 = arith.constant 9.99999996E-13 : f32
    %197 = vector.broadcast %cst_81 : f32 to vector<1x1xf32>
    %198 = arith.addf %196, %197 : vector<1x1xf32>
    %199 = math.rsqrt %198 : vector<1x1xf32>
    %200 = vector.broadcast %199 : vector<1x1xf32> to vector<1x4xf32>
    %201 = arith.mulf %189, %200 : vector<1x4xf32>
    %c0_82 = arith.constant 0 : index
    %c0_83 = arith.constant 0 : index
    %202 = vector.load %arg15[%c0_82, %c0_83] : memref<1x4xf32, #tpu.memory_space<vmem>>, vector<1x4xf32>
    tpu.vector_store %arg15[%c0_82, %c0_83], %201 {strides = array<i32>} : memref<1x4xf32, #tpu.memory_space<vmem>>, vector<1x4xf32>,
    %c0_84 = arith.constant 0 : index
    %c0_85 = arith.constant 0 : index
    %203 = vector.load %arg16[%c0_84, %c0_85] : memref<1x3xf32, #tpu.memory_space<vmem>>, vector<1x3xf32>
    tpu.vector_store %arg16[%c0_84, %c0_85], %193 {strides = array<i32>} : memref<1x3xf32, #tpu.memory_space<vmem>>, vector<1x3xf32>,
    return
  }
  func.func @transform_0(%arg0: i32) -> (i32, i32) {
    %c0_i32 = arith.constant 0 : i32
    %c0_i32_0 = arith.constant 0 : i32
    %c0_i32_1 = arith.constant 0 : i32
    return %c0_i32, %c0_i32_0 : i32, i32
  }
  func.func @transform_1(%arg0: i32) -> (i32, i32) {
    %c0_i32 = arith.constant 0 : i32
    %c0_i32_0 = arith.constant 0 : i32
    %c0_i32_1 = arith.constant 0 : i32
    return %c0_i32, %c0_i32_0 : i32, i32
  }
  func.func @transform_2(%arg0: i32) -> (i32, i32) {
    %c0_i32 = arith.constant 0 : i32
    %c0_i32_0 = arith.constant 0 : i32
    %c0_i32_1 = arith.constant 0 : i32
    return %c0_i32, %c0_i32_0 : i32, i32
  }
  func.func @transform_3(%arg0: i32) -> (i32, i32, i32, i32) {
    %c0_i32 = arith.constant 0 : i32
    %c0_i32_0 = arith.constant 0 : i32
    %c0_i32_1 = arith.constant 0 : i32
    %c0_i32_2 = arith.constant 0 : i32
    %c0_i32_3 = arith.constant 0 : i32
    return %c0_i32, %c0_i32_0, %c0_i32_1, %c0_i32_2 : i32, i32, i32, i32
  }
  func.func @transform_4(%arg0: i32) -> (i32, i32) {
    %c0_i32 = arith.constant 0 : i32
    %c0_i32_0 = arith.constant 0 : i32
    %c0_i32_1 = arith.constant 0 : i32
    return %c0_i32, %c0_i32_0 : i32, i32
  }
  func.func @transform_5(%arg0: i32) -> (i32, i32) {
    %c0_i32 = arith.constant 0 : i32
    %c0_i32_0 = arith.constant 0 : i32
    %c0_i32_1 = arith.constant 0 : i32
    return %c0_i32, %c0_i32_0 : i32, i32
  }
  func.func @transform_6(%arg0: i32) -> (i32, i32) {
    %c0_i32 = arith.constant 0 : i32
    %c0_i32_0 = arith.constant 0 : i32
    %c0_i32_1 = arith.constant 0 : i32
    return %c0_i32, %c0_i32_0 : i32, i32
  }
  func.func @transform_7(%arg0: i32) -> (i32, i32) {
    %c0_i32 = arith.constant 0 : i32
    %c0_i32_0 = arith.constant 0 : i32
    %c0_i32_1 = arith.constant 0 : i32
    return %c0_i32, %c0_i32_0 : i32, i32
  }
  func.func @transform_8(%arg0: i32) -> (i32, i32) {
    %c0_i32 = arith.constant 0 : i32
    %c0_i32_0 = arith.constant 0 : i32
    %c0_i32_1 = arith.constant 0 : i32
    return %c0_i32, %c0_i32_0 : i32, i32
  }
  func.func @transform_9(%arg0: i32) -> (i32, i32) {
    %c0_i32 = arith.constant 0 : i32
    %c0_i32_0 = arith.constant 0 : i32
    %c0_i32_1 = arith.constant 0 : i32
    return %c0_i32, %c0_i32_0 : i32, i32
  }
  func.func @transform_10(%arg0: i32) -> (i32, i32) {
    %c0_i32 = arith.constant 0 : i32
    %c0_i32_0 = arith.constant 0 : i32
    %c0_i32_1 = arith.constant 0 : i32
    return %c0_i32, %c0_i32_0 : i32, i32
  }
  func.func @transform_11(%arg0: i32) -> (i32, i32) {
    %c0_i32 = arith.constant 0 : i32
    %c0_i32_0 = arith.constant 0 : i32
    %c0_i32_1 = arith.constant 0 : i32
    return %c0_i32, %c0_i32_0 : i32, i32
  }
  func.func @transform_12(%arg0: i32) -> (i32, i32) {
    %c0_i32 = arith.constant 0 : i32
    %c0_i32_0 = arith.constant 0 : i32
    %c0_i32_1 = arith.constant 0 : i32
    return %c0_i32, %c0_i32_0 : i32, i32
  }
  func.func @transform_13(%arg0: i32) -> (i32, i32) {
    %c0_i32 = arith.constant 0 : i32
    %c0_i32_0 = arith.constant 0 : i32
    %c0_i32_1 = arith.constant 0 : i32
    return %c0_i32, %c0_i32_0 : i32, i32
  }
  func.func @transform_14(%arg0: i32) -> (i32, i32) {
    %c0_i32 = arith.constant 0 : i32
    %c0_i32_0 = arith.constant 0 : i32
    %c0_i32_1 = arith.constant 0 : i32
    return %c0_i32, %c0_i32_0 : i32, i32
  }
  func.func @transform_15(%arg0: i32) -> (i32, i32) {
    %c0_i32 = arith.constant 0 : i32
    %c0_i32_0 = arith.constant 0 : i32
    %c0_i32_1 = arith.constant 0 : i32
    return %c0_i32, %c0_i32_0 : i32, i32
  }
}

</mosaic_0001>

<bundles_post_ra>
// kernel: odometry_forward.5
= control target key start
LH: loop header
LB: loop body
LE: loop exit
PB: predicated region body
PF: predicated region fallthrough
CT: control target
= control target key end

     0   :  { %8 = vsyncpa [#allocation3], 0  ;;  %s698_s0 = inlined_call_operand.vmem [shape: f32[2,5,16,128], index: 0, kind: input, shape index: {}]   ;;  %s699_s1 = inlined_call_operand.vmem [shape: f32[5,3], index: 1, kind: input, shape index: {}]   ;;  %s700_s2 = inlined_call_operand.vmem [shape: f32[1,3], index: 2, kind: input, shape index: {}]   ;;  %s701_s3 = inlined_call_operand.vmem [shape: f32[2,3,16,128], index: 3, kind: output, shape index: {}]  }
   0x1   :  { %9 = vsyncpa [#allocation5], 0  ;;  %s583_s12 = smov 0  }
   0x2 LB: > { %s427_s13 = sadd.s32 4294967295, %s559_s12   ;;  %p429_p0 = scmp.ge.s32.totalorder %s559_s12, 1  ;;  %s559_s12 = sphi %s583_s12, %s15_s12  }
   0x3   : > { %p114_p1 = scmp.lt.s32.totalorder %s559_s12, 3  ;;  %s126_s16 = sshll.u32 %s699_s1, 4  ;;  %s127_s16 = int_to_ptr.vmem [resolvable:$true] %s126_s16 }
   0x4   : > { %p485_p3 = scmp.eq.s32.totalorder %s427_s13, 0  ;;  %s136_s19 = sshll.u32 %s700_s2, 4  ;;  %s137_s19 = int_to_ptr.vmem [resolvable:$true] %s136_s19 }
   0x5   : > { %p115_p2 = pnand %p429_p0, %p114_p1  ;;  %s561_s20 = smov [#allocation2]  }
   0x6   : > { %s562_s21 = smov [#allocation4]  }
   0x7   : > { %p478_p4 = pneg %p115_p2 }
   0x8   : > { %157 = sbr.rel (%p115_p2) target bundleno = 83 (0x53), region = 32 }
   0x9   : > { %p479_p5 = pnand %p485_p3, %p478_p4 }
   0xb   : > { %481 = dma.vmem_to_smem (!%p479_p5), %s127_s16, 128, %s561_s20, [#allocation3]  }
   0xc   : > { %484 = dma.vmem_to_smem (!%p479_p5), %s137_s19, 16, %s562_s21, [#allocation5]  }
   0xd   : > { %550 = dma.done.wait (%p485_p3), [#allocation3], 128  }
   0xe   : > { %552 = vsyncadd (%p485_p3), [#allocation3], 4294967168 }
   0xf   : > { %554 = dma.done.wait (%p485_p3), [#allocation5], 16  }
  0x10   : > { %556 = vsyncadd (%p485_p3), [#allocation5], 4294967280 }
  0x11   : > { %169 = sfence }
  0x12   : > { %p188_p6 = scmp.lt.s32.totalorder %s427_s13, 1  ;;  %s200_s22 = sld [smem:[#allocation2]] }
  0x13   : > { %s440_s23 = sld [smem:[#allocation2 + $0x80]] }
  0x14   : > { %s703_s13 = smov (!%p188_p6, %s427_s13), 1  ;;  %s604_s24 = sld [smem:[#allocation2 + $0x100]] }
  0x15   : > { %s468_s25 = smul.u32 80, %s703_s13  ;;  %s607_s26 = sld [smem:[#allocation2 + $0x180]] }
  0x16   : > { %s609_s27 = sld [smem:[#allocation2 + $0x200]]  ;;  %s469_s19 = smul.u32 48, %s703_s13 }
  0x17   : > { %s192_s30 = scalar_lea.vmem %s698_s0, %s468_s25  ;;  %s614_s4 = sld [smem:[#allocation4]] }
  0x18   : > { %v201_v0 = vstv %s200_s22  ;;  %v198_v1 = vld [vmem:[%s192_s30] sm:$0xff]  ;;  %v616_v2 = vld [vmem:[%s192_s30 + $0x10] sm:$0xff]  ;;  %s620_s5 = sld [smem:[#allocation2 + $0x1]]  ;;  %v627_v8 = vld [vmem:[%s192_s30 + $0x8] sm:$0xff]  ;;  %s197_s22 = scalar_lea.vmem %s701_s3, %s469_s19 }
  0x19   : > { %v208_v3 = vstv %s440_s23  ;;  %v618_v4 = vld [vmem:[%s192_s30 + $0x20] sm:$0xff]  ;;  %v202_v5 = vmul.f32 %v201_v0, %v198_v1  ;;  %v623_v7 = vld [vmem:[%s192_s30 + $0x30] sm:$0xff]  ;;  %s625_s6 = sld [smem:[#allocation2 + $0x81]]  ;;  %v203_v10 = vmul.f32 %v201_v0, %v627_v8  ;;  %v439_v11 = vld [vmem:[%s192_s30 + $0x18] sm:$0xff] }
  0x1a   : > { %v209_v6 = vmul.f32 %v616_v2, %v208_v3  ;;  %v217_v9 = vstv %s604_s24  ;;  %s630_s7 = sld [smem:[#allocation2 + $0x101]]  ;;  %v633_v12 = vld [vmem:[%s192_s30 + $0x28] sm:$0xff]  ;;  %v635_v13 = vld [vmem:[%s192_s30 + $0x38] sm:$0xff]  ;;  %v447_v17 = vld [vmem:[%s192_s30 + $0x40] sm:$0xff]  ;;  %v210_v18 = vmul.f32 %v439_v11, %v208_v3 }
  0x1b   : > { %v218_v15 = vmul.f32 %v618_v4, %v217_v9  ;;  %v226_v16 = vstv %s607_s26  ;;  %s639_s8 = sld [smem:[#allocation2 + $0x181]]  ;;  %v641_v19 = vld [vmem:[%s192_s30 + $0x48] sm:$0xff]  ;;  %v219_v22 = vmul.f32 %v633_v12, %v217_v9 }
  0x1c   : > { %v211_v14 = vadd.f32 %v209_v6, %v202_v5  ;;  %v227_v20 = vmul.f32 %v623_v7, %v226_v16  ;;  %v235_v21 = vstv %s609_s27  ;;  %s645_s9 = sld [smem:[#allocation2 + $0x201]]  ;;  %v212_v24 = vadd.f32 %v210_v18, %v203_v10 }
  0x1d   : > { %s648_s10 = sld [smem:[#allocation4 + $0x1]]  ;;  %v228_v25 = vmul.f32 %v635_v13, %v226_v16  ;;  %v236_v26 = vmul.f32 %v447_v17, %v235_v21  ;;  %v237_v28 = vmul.f32 %v641_v19, %v235_v21  ;;  %v241_v45 = vstv %s614_s4 }
  0x1e   : > { %v220_v23 = vadd.f32 %v218_v15, %v211_v14  ;;  %v245_v27 = vstv %s620_s5  ;;  %s652_s11 = sld [smem:[#allocation2 + $0x2]]  ;;  %v221_v32 = vadd.f32 %v219_v22, %v212_v24 }
  0x1f   : > { %v246_v30 = vmul.f32 %v245_v27, %v198_v1  ;;  %v249_v31 = vstv %s625_s6  ;;  %s656_s14 = sld [smem:[#allocation2 + $0x82]]  ;;  %v247_v35 = vmul.f32 %v245_v27, %v627_v8 }
  0x20   : > { %v229_v29 = vadd.f32 %v227_v20, %v220_v23  ;;  %v250_v33 = vmul.f32 %v616_v2, %v249_v31  ;;  %v255_v34 = vstv %s630_s7  ;;  %s660_s15 = sld [smem:[#allocation2 + $0x102]]  ;;  %v251_v36 = vmul.f32 %v439_v11, %v249_v31 }
  0x21   : > { %v256_v37 = vmul.f32 %v618_v4, %v255_v34  ;;  %v261_v38 = vstv %s639_s8  ;;  %s665_s16 = sld [smem:[#allocation2 + $0x182]]  ;;  %v230_v39 = vadd.f32 %v228_v25, %v221_v32  ;;  %v257_v51 = vmul.f32 %v633_v12, %v255_v34 }
  0x22   : > { %v252_v40 = vadd.f32 %v250_v33, %v246_v30  ;;  %v262_v41 = vmul.f32 %v623_v7, %v261_v38  ;;  %v267_v42 = vstv %s645_s9  ;;  %s669_s17 = sld [smem:[#allocation2 + $0x202]]  ;;  %v253_v43 = vadd.f32 %v251_v36, %v247_v35 }
  0x23   : > { %v238_v44 = vadd.f32 %v236_v26, %v229_v29  ;;  %v268_v46 = vmul.f32 %v447_v17, %v267_v42  ;;  %v273_v47 = vstv %s648_s10  ;;  %v239_v50 = vadd.f32 %v237_v28, %v230_v39  ;;  %s676_s18 = sld [smem:[#allocation4 + $0x2]] }
  0x24   : > { %v258_v48 = vadd.f32 %v256_v37, %v252_v40  ;;  %v277_v49 = vstv %s652_s11  ;;  %v263_v54 = vmul.f32 %v635_v13, %v261_v38  ;;  %v269_v55 = vmul.f32 %v641_v19, %v267_v42 }
  0x25   : > { %v278_v52 = vmul.f32 %v277_v49, %v198_v1  ;;  %v281_v53 = vstv %s656_s14  ;;  %v259_v59 = vadd.f32 %v257_v51, %v253_v43  ;;  %v279_v62 = vmul.f32 %v277_v49, %v627_v8 }
  0x26   : > { %v264_v56 = vadd.f32 %v262_v41, %v258_v48  ;;  %v282_v57 = vmul.f32 %v616_v2, %v281_v53  ;;  %v287_v58 = vstv %s660_s15  ;;  %v283_v63 = vmul.f32 %v439_v11, %v281_v53 }
  0x27   : > { %v288_v60 = vmul.f32 %v618_v4, %v287_v58  ;;  %v293_v61 = vstv %s665_s16  ;;  %v242_v6 = vadd.f32 %v241_v45, %v238_v44  ;;  %v265_v10 = vadd.f32 %v263_v54, %v259_v59 }
  0x28   : > { %v270_v0 = vadd.f32 %v268_v46, %v264_v56  ;;  %v284_v1 = vadd.f32 %v282_v57, %v278_v52  ;;  %v294_v3 = vmul.f32 %v623_v7, %v293_v61  ;;  %v299_v5 = vstv %s669_s17 }
  0x29   : > { %v300_v9 = vmul.f32 %v447_v17, %v299_v5  ;;  %v285_v14 = vadd.f32 %v283_v63, %v279_v62  ;;  %v289_v16 = vmul.f32 %v633_v12, %v287_v58  ;;  %v295_v4 = vmul.f32 %v635_v13, %v293_v61 }
  0x2a   : > { %v274_v15 = vadd.f32 %v273_v47, %v270_v0  ;;  %v290_v2 = vadd.f32 %v288_v60, %v284_v1  ;;  %v271_v18 = vadd.f32 %v269_v55, %v265_v10  ;;  %v243_v8 = vadd.f32 %v241_v45, %v239_v50 }
  0x2b   : > { %v291_v11 = vadd.f32 %v289_v16, %v285_v14  ;;  %v301_v21 = vmul.f32 %v641_v19, %v299_v5  ;;  %v305_v22 = vstv %s676_s18 }
  0x2c   : > { %v296_v20 = vadd.f32 %v294_v3, %v290_v2  ;;  %v275_v23 = vadd.f32 %v273_v47, %v271_v18  ;;  %v308_v24 = vmax.f32 %v242_v6, %v274_v15 }
  0x2d   : > { %v297_v25 = vadd.f32 %v295_v4, %v291_v11 }
  0x2e   : > { %v302_v7 = vadd.f32 %v300_v9, %v296_v20  ;;  %v309_v27 = vmax.f32 %v243_v8, %v275_v23 }
  0x2f   : > { %v303_v26 = vadd.f32 %v301_v21, %v297_v25 }
  0x30   : > { %v306_v17 = vadd.f32 %v305_v22, %v302_v7 }
  0x31   : > { %v307_v29 = vadd.f32 %v305_v22, %v303_v26 }
  0x32   : > { %v310_v28 = vmax.f32 %v308_v24, %v306_v17 }
  0x33   : > { %v311_v13 = vmax.f32 %v309_v27, %v307_v29 }
  0x34   : > { %v312_v30 = vsub.f32 %v242_v6, %v310_v28  ;;  %v318_v12 = vsub.f32 %v274_v15, %v310_v28  ;;  %v324_v31 = vsub.f32 %v306_v17, %v310_v28 }
  0x35   : > { %v313_v35 = vsub.f32 %v243_v8, %v311_v13  ;;  %v319_v36 = vsub.f32 %v275_v23, %v311_v13  ;;  %v325_v19 = vsub.f32 %v307_v29, %v311_v13 }
  0x36   : > { %v314_v32 = vmul.f32 1.442695, %v312_v30  ;;  %v320_v33 = vmul.f32 1.442695, %v318_v12  ;;  %v326_v34 = vmul.f32 1.442695, %v324_v31 }
  0x37   : > { %v316_v37 = vmul.f32 1.442695, %v313_v35  ;;  %v322_v38 = vmul.f32 1.442695, %v319_v36  ;;  %v328_v39 = vmul.f32 1.442695, %v325_v19 }
  0x38   : > { %499 = vpow2.f32 %v314_v32 }
  0x39   : > { %501 = vpow2.f32 %v320_v33 }
  0x3a   : > { %503 = vpow2.f32 %v326_v34 }
  0x3b   : > { %505 = vpow2.f32 %v316_v37 }
  0x3c   : > { %507 = vpow2.f32 %v322_v38 }
  0x3d   : > { %509 = vpow2.f32 %v328_v39 }
  0x3e   : > { %v500_v40 = vpop.eup %499 }
  0x3f   : > { %v502_v41 = vpop.eup %501 }
  0x40   : > { %v504_v42 = vpop.eup %503  ;;  %v330_v43 = vadd.f32 %v502_v41, %v500_v40 }
  0x41   : > { %v506_v44 = vpop.eup %505 }
  0x42   : > { %v508_v45 = vpop.eup %507  ;;  %v332_v46 = vadd.f32 %v504_v42, %v330_v43 }
  0x43   : > { %v510_v47 = vpop.eup %509  ;;  %v331_v48 = vadd.f32 %v508_v45, %v506_v44 }
  0x44   : > { %511 = vrcp.f32 %v332_v46 }
  0x45   : > { %v333_v49 = vadd.f32 %v510_v47, %v331_v48 }
  0x47   : > { %513 = vrcp.f32 %v333_v49 }
  0x4a   : > { %v512_v50 = vpop.eup %511 }
  0x4b   : > { %v336_v51 = vmul.f32 %v512_v50, %v500_v40  ;;  %v340_v52 = vmul.f32 %v512_v50, %v502_v41  ;;  %v345_v53 = vmul.f32 %v512_v50, %v504_v42 }
  0x4d   : > { %v514_v54 = vpop.eup %513  ;;  %338 = vst [vmem:[%s197_s22] sm:$0xff] %v336_v51 }
  0x4e   : > { %v337_v55 = vmul.f32 %v514_v54, %v506_v44  ;;  %462 = vst [vmem:[%s197_s22 + $0x10] sm:$0xff] %v340_v52  ;;  %v341_v56 = vmul.f32 %v514_v54, %v508_v45  ;;  %v346_v57 = vmul.f32 %v514_v54, %v510_v47 }
  0x4f   : > { %464 = vst [vmem:[%s197_s22 + $0x20] sm:$0xff] %v345_v53 }
  0x50   : > { %339 = vst [vmem:[%s197_s22 + $0x8] sm:$0xff] %v337_v55 }
  0x51   : > { %463 = vst [vmem:[%s197_s22 + $0x18] sm:$0xff] %v341_v56 }
  0x52   : > { %465 = vst [vmem:[%s197_s22 + $0x28] sm:$0xff] %v346_v57 }
  0x53 PF: > { %s15_s12 = sadd.s32 1, %s559_s12  }
  0x54   : > { %p12_p7 = scmp.ge.s32.totalorder %s15_s12, 4  }
  0x56   :  { %14 = sbr.rel (!%p12_p7) target bundleno = 2 (0x2), region = 77 }
  0x5b   :  { %371 = vsyncpa [#allocation3], 1 }
  0x5c   :  { %373 = vsyncpa [#allocation3 + $0x1], 1 }
  0x5d   :  { %374 = vsyncpa [#allocation5], 1 }

// kernel: odometry_forward.6
= control target key start
LH: loop header
LB: loop body
LE: loop exit
PB: predicated region body
PF: predicated region fallthrough
CT: control target
= control target key end

     0   :  { %21 = vsyncpa [#allocation3], 0  ;;  %s873_s0 = inlined_call_operand.vmem [shape: f32[1,4], index: 0, kind: input, shape index: {}]   ;;  %s874_s1 = inlined_call_operand.vmem [shape: f32[1,3], index: 1, kind: input, shape index: {}]   ;;  %s875_s2 = inlined_call_operand.vmem [shape: f32[1,5], index: 2, kind: input, shape index: {}]   ;;  %s876_s3 = inlined_call_operand.vmem [shape: f32[1,3,16,128], index: 3, kind: input, shape index: {}]   ;;  %s877_s4 = inlined_call_operand.vmem [shape: f32[10,64], index: 4, kind: input, shape index: {}]   ;;  %s878_s5 = inlined_call_operand.vmem [shape: f32[1,64], index: 5, kind: input, shape index: {}]   ;;  %s879_s6 = inlined_call_operand.vmem [shape: f32[64,32], index: 6, kind: input, shape index: {}]   ;;  %s880_s7 = inlined_call_operand.vmem [shape: f32[1,32], index: 7, kind: input, shape index: {}]   ;;  %s881_s8 = inlined_call_operand.vmem [shape: f32[32,4], index: 8, kind: input, shape index: {}]   ;;  %s882_s9 = inlined_call_operand.vmem [shape: f32[1,4], index: 9, kind: input, shape index: {}]   ;;  %s883_s10 = inlined_call_operand.vmem [shape: f32[64,32], index: 10, kind: input, shape index: {}]   ;;  %s884_s11 = inlined_call_operand.vmem [shape: f32[1,32], index: 11, kind: input, shape index: {}]   ;;  %s885_s12 = inlined_call_operand.vmem [shape: f32[32,3], index: 12, kind: input, shape index: {}]   ;;  %s886_s13 = inlined_call_operand.vmem [shape: f32[1,3], index: 13, kind: input, shape index: {}]   ;;  %s887_s14 = inlined_call_operand.vmem [shape: f32[1,4], index: 14, kind: output, shape index: {0}]   ;;  %s888_s15 = inlined_call_operand.vmem [shape: f32[1,3], index: 15, kind: output, shape index: {1}]  }
   0x1   :  { %22 = vsyncpa [#allocation5], 0  ;;  %s37_s20 = sshll.u32 %s874_s1, 4  ;;  %s28_s23 = sshll.u32 %s873_s0, 4  ;;  %s38_s20 = int_to_ptr.vmem [resolvable:$true] %s37_s20  ;;  %s29_s23 = int_to_ptr.vmem [resolvable:$true] %s28_s23 }
   0x2   :  { %s575_s24 = smov [#allocation4]   ;;  %s576_s25 = smov [#allocation2]  }
   0x3   :  { %40 = dma.vmem_to_smem %s38_s20, 16, %s575_s24, [#allocation5]  }
   0x4   :  { %31 = dma.vmem_to_smem %s29_s23, 16, %s576_s25, [#allocation3]  }
   0x5   :  { %s46_s28 = sshll.u32 %s875_s2, 4  ;;  %s577_s29 = smov [#allocation6]   ;;  %s47_s28 = int_to_ptr.vmem [resolvable:$true] %s46_s28 }
   0x6   :  { %49 = dma.vmem_to_smem %s47_s28, 16, %s577_s29, [#allocation5]  }
   0x7   :  { %571 = dma.done.wait [#allocation3], 16  }
   0x8   :  { %572 = vsyncadd [#allocation3], 4294967280 }
   0x9   :  { %573 = dma.done.wait [#allocation5], 32  }
   0xa   :  { %574 = vsyncadd [#allocation5], 4294967264 }
   0xb   :  { %84 = sfence }
   0xc   :  { %s85_s1 = sld [smem:[#allocation2]]  ;;  %v96_v0 = vld [vmem:[%s876_s3] sm:$0xff]  ;;  %v97_v1 = vld [vmem:[%s876_s3 + $0x8] sm:$0xff]  ;;  %v502_v2 = vld [vmem:[%s876_s3 + $0x10] sm:$0xff]  ;;  %vm357_vm8 = vcmask 523264   ;;  %vm417_vm9 = vcmask 261120  }
   0xd   :  { %s499_s30 = sld [smem:[#allocation2 + $0x1]]  ;;  %v503_v3 = vld [vmem:[%s876_s3 + $0x18] sm:$0xff]  ;;  %v504_v5 = vld [vmem:[%s876_s3 + $0x20] sm:$0xff]  ;;  %v505_v6 = vld [vmem:[%s876_s3 + $0x28] sm:$0xff]  ;;  %vm487_vm10 = vcmask 16384   ;;  %vm470_vm11 = vcmask 24576  }
   0xe   :  { %s667_s0 = sld [smem:[#allocation2 + $0x2]] }
   0xf   :  { %s669_s16 = sld [smem:[#allocation2 + $0x3]] }
  0x10   :  { %s737_s19 = sld [smem:[#allocation4 + $0x2]] }
  0x11   :  { %s799_s20 = sld [smem:[#allocation6 + $0x1]] }
  0x12   :  { %s89_s2 = smul.f32 %s85_s1, %s85_s1  ;;  %v683_v4 = vstv %s85_s1  ;;  %s801_s21 = sld [smem:[#allocation6 + $0x2]] }
  0x13   :  { %s90_s25 = smul.f32 %s499_s30, %s499_s30  ;;  %s104_s17 = ssub.f32 0.0, %s499_s30  ;;  %v119_v7 = vmul.f32 %v683_v4, %v96_v0  ;;  %v120_v8 = vmul.f32 %v683_v4, %v97_v1  ;;  %v129_v10 = vmul.f32 %v502_v2, %v683_v4  ;;  %v130_v11 = vmul.f32 %v503_v3, %v683_v4 }
  0x14   :  { %s92_s18 = smul.f32 %s667_s0, %s667_s0  ;;  %v696_v9 = vstv %s667_s0  ;;  %v700_v12 = vstv %s499_s30  ;;  %v140_v31 = vmul.f32 %v504_v5, %v683_v4  ;;  %v141_v34 = vmul.f32 %v505_v6, %v683_v4 }
  0x15   :  { %s91_s1 = sadd.f32 %s90_s25, %s89_s2  ;;  %v105_v13 = vstv %s104_s17  ;;  %v109_v14 = vmul.f32 %v502_v2, %v696_v9  ;;  %v110_v15 = vmul.f32 %v503_v3, %v696_v9  ;;  %v113_v16 = vstv %s669_s16  ;;  %s94_s30 = smul.f32 %s669_s16, %s669_s16 }
  0x16   :  { %v106_v17 = vmul.f32 %v105_v13, %v96_v0  ;;  %v107_v18 = vmul.f32 %v105_v13, %v97_v1  ;;  %v114_v19 = vmul.f32 %v504_v5, %v113_v16  ;;  %v115_v20 = vmul.f32 %v505_v6, %v113_v16  ;;  %s728_s16 = sld [smem:[#allocation4]] }
  0x17   :  { %v121_v21 = vmul.f32 %v504_v5, %v696_v9  ;;  %v122_v22 = vmul.f32 %v505_v6, %v696_v9  ;;  %v125_v23 = vmul.f32 %v502_v2, %v113_v16  ;;  %v126_v24 = vmul.f32 %v503_v3, %v113_v16  ;;  %s93_s3 = sadd.f32 %s92_s18, %s91_s1 }
  0x18   :  { %v111_v25 = vsub.f32 %v106_v17, %v109_v14  ;;  %v112_v26 = vsub.f32 %v107_v18, %v110_v15  ;;  %v131_v27 = vmul.f32 %v113_v16, %v96_v0  ;;  %v132_v28 = vmul.f32 %v113_v16, %v97_v1  ;;  %s735_s2 = sld [smem:[#allocation4 + $0x1]] }
  0x19   :  { %v123_v29 = vadd.f32 %v121_v21, %v119_v7  ;;  %v124_v30 = vadd.f32 %v122_v22, %v120_v8  ;;  %v136_v35 = vmul.f32 %v504_v5, %v700_v12  ;;  %v137_v36 = vmul.f32 %v505_v6, %v700_v12  ;;  %s95_s0 = sadd.f32 %s94_s30, %s93_s3 }
  0x1a   :  { %v116_v32 = vsub.f32 %v111_v25, %v114_v19  ;;  %v117_v33 = vsub.f32 %v112_v26, %v115_v20  ;;  %v142_v37 = vmul.f32 %v502_v2, %v700_v12  ;;  %v143_v38 = vmul.f32 %v503_v3, %v700_v12 }
  0x1b   :  { %v127_v39 = vsub.f32 %v123_v29, %v125_v23  ;;  %v128_v40 = vsub.f32 %v124_v30, %v126_v24  ;;  %v133_v41 = vadd.f32 %v131_v27, %v129_v10  ;;  %v134_v42 = vadd.f32 %v132_v28, %v130_v11 }
  0x1c   :  { %v144_v43 = vadd.f32 %v142_v37, %v140_v31  ;;  %v146_v44 = vmul.f32 %v696_v9, %v96_v0  ;;  %v150_v45 = vsub.f32 0.0, %v116_v32  ;;  %v151_v46 = vsub.f32 0.0, %v117_v33 }
  0x1d   :  { %v145_v47 = vadd.f32 %v143_v38, %v141_v34  ;;  %v147_v48 = vmul.f32 %v696_v9, %v97_v1  ;;  %v138_v49 = vsub.f32 %v133_v41, %v136_v35  ;;  %v139_v50 = vsub.f32 %v134_v42, %v137_v36 }
  0x1e   :  { %v154_v51 = vmul.f32 %v127_v39, %v683_v4  ;;  %v166_v52 = vstv %s95_s0  ;;  %v148_v53 = vsub.f32 %v144_v43, %v146_v44  ;;  %v152_v54 = vmul.f32 %v150_v45, %v700_v12 }
  0x1f   :  { %v153_v55 = vmul.f32 %v151_v46, %v700_v12  ;;  %v155_v56 = vmul.f32 %v128_v40, %v683_v4  ;;  %527 = vrcp.f32 %v166_v52  ;;  %v187_v57 = vmul.f32 %v150_v45, %v696_v9 }
  0x20   :  { %v188_v58 = vmul.f32 %v151_v46, %v696_v9  ;;  %v149_v59 = vsub.f32 %v145_v47, %v147_v48  ;;  %v189_v60 = vmul.f32 %v127_v39, %v113_v16  ;;  %v190_v61 = vmul.f32 %v128_v40, %v113_v16 }
  0x21   :  { %v158_v62 = vmul.f32 %v138_v49, %v113_v16  ;;  %v159_v63 = vmul.f32 %v139_v50, %v113_v16  ;;  %v156_v0 = vadd.f32 %v154_v51, %v152_v54  ;;  %v157_v1 = vadd.f32 %v155_v56, %v153_v55 }
  0x22   :  { %v162_v2 = vmul.f32 %v148_v53, %v696_v9  ;;  %v193_v3 = vmul.f32 %v138_v49, %v683_v4  ;;  %v191_v5 = vadd.f32 %v189_v60, %v187_v57  ;;  %v192_v6 = vadd.f32 %v190_v61, %v188_v58 }
  0x23   :  { %v194_v7 = vmul.f32 %v139_v50, %v683_v4  ;;  %v207_v8 = vmul.f32 %v150_v45, %v113_v16  ;;  %v163_v10 = vmul.f32 %v149_v59, %v696_v9  ;;  %vm172_vm0 = vweird.f32 %v166_v52 }
  0x24   :  { %v208_v11 = vmul.f32 %v151_v46, %v113_v16  ;;  %v209_v13 = vmul.f32 %v127_v39, %v696_v9  ;;  %v176_v15 = vand.u32 2147483647, %v166_v52  ;;  %v210_v17 = vmul.f32 %v128_v40, %v696_v9 }
  0x25   :  { %v528_v14 = vpop.eup %527  ;;  %v213_v18 = vmul.f32 %v138_v49, %v700_v12  ;;  %v214_v19 = vmul.f32 %v139_v50, %v700_v12  ;;  %v178_v21 = vand.u32 2147483648, %v166_v52  ;;  %v197_v22 = vmul.f32 %v148_v53, %v700_v12 }
  0x26   :  { %v168_v20 = vmul.f32 %v528_v14, %v166_v52  ;;  %v198_v23 = vmul.f32 %v149_v59, %v700_v12  ;;  %v195_v16 = vadd.f32 %v193_v3, %v191_v5  ;;  %v196_v24 = vadd.f32 %v194_v7, %v192_v6 }
  0x27   :  { %v211_v25 = vsub.f32 %v207_v8, %v209_v13  ;;  %v212_v26 = vsub.f32 %v208_v11, %v210_v17  ;;  %vm173_vm1 = vweird.f32 %v528_v14  ;;  %v217_v9 = vmul.f32 %v148_v53, %v683_v4 }
  0x28   :  { %v169_v27 = vsub.f32 1.0, %v168_v20  ;;  %v218_v28 = vmul.f32 %v149_v59, %v683_v4  ;;  %v160_v29 = vsub.f32 %v156_v0, %v158_v62  ;;  %v161_v30 = vsub.f32 %v157_v1, %v159_v63  ;;  %vm174_vm2 = vmor %vm172_vm0, %vm173_vm1 }
  0x29   :  { %v215_v31 = vadd.f32 %v213_v18, %v211_v25  ;;  %v216_v12 = vadd.f32 %v214_v19, %v212_v26  ;;  %vm177_vm3 = vcmp.eq.f32.partialorder %v176_v15, 8.507059e+37  ;;  %v179_v33 = vor.u32 1.1754944e-38, %v178_v21 }
  0x2a   :  { %v170_v32 = vmul.f32 %v528_v14, %v169_v27  ;;  %v199_v34 = vsub.f32 %v195_v16, %v197_v22  ;;  %v200_v36 = vsub.f32 %v196_v24, %v198_v23  ;;  %v164_v39 = vadd.f32 %v162_v2, %v160_v29 }
  0x2b   :  { %v219_v37 = vadd.f32 %v217_v9, %v215_v31  ;;  %v220_v38 = vadd.f32 %v218_v28, %v216_v12  ;;  %v165_v40 = vadd.f32 %v163_v10, %v161_v30  ;;  %v184_v42 = vstv %s728_s16 }
  0x2c   :  { %v171_v35 = vadd.f32 %v528_v14, %v170_v32  ;;  %v204_v43 = vstv %s735_s2  ;;  %v224_v44 = vstv %s737_s19  ;;  %s320_s19 = sld [smem:[#allocation6]] }
  0x2e   :  { %v175_v4 = vsel %vm174_vm2, %v528_v14, %v171_v35 }
  0x2f   :  { %v180_v41 = vsel %vm177_vm3, %v179_v33, %v175_v4 }
  0x30   :  { %v201_v45 = vmul.f32 %v199_v34, %v180_v41  ;;  %v202_v46 = vmul.f32 %v200_v36, %v180_v41  ;;  %v221_v47 = vmul.f32 %v219_v37, %v180_v41  ;;  %v222_v48 = vmul.f32 %v220_v38, %v180_v41 }
  0x31   :  { %v181_v49 = vmul.f32 %v180_v41, %v164_v39  ;;  %v182_v50 = vmul.f32 %v180_v41, %v165_v40 }
  0x32   :  { %v205_v51 = vadd.f32 %v204_v43, %v201_v45  ;;  %v206_v52 = vadd.f32 %v204_v43, %v202_v46  ;;  %v225_v53 = vadd.f32 %v224_v44, %v221_v47  ;;  %v226_v54 = vadd.f32 %v224_v44, %v222_v48 }
  0x33   :  { %v185_v55 = vadd.f32 %v184_v42, %v181_v49  ;;  %v186_v56 = vadd.f32 %v184_v42, %v182_v50 }
  0x34   :  { %v230_v57 = vmul.f32 %v206_v52, %v206_v52  ;;  %v233_v58 = vmul.f32 %v225_v53, %v225_v53  ;;  %v283_v59 = vadd.f32 %v206_v52, %v205_v51  ;;  %v234_v60 = vmul.f32 %v226_v54, %v226_v54 }
  0x35   :  { %v227_v61 = vmul.f32 %v185_v55, %v185_v55  ;;  %v228_v62 = vmul.f32 %v186_v56, %v186_v56  ;;  %v229_v63 = vmul.f32 %v205_v51, %v205_v51  ;;  %v294_v5 = vadd.f32 %v226_v54, %v225_v53 }
  0x36   :  { %284 = vadd.xlane.f32.xlu1 %v283_v59  ;;  %v272_v28 = vadd.f32 %v186_v56, %v185_v55  ;;  %v355_v55 = vld [vmem:[%s879_s6 + $0x38] sm:$0xff]  ;;  %v353_v59 = vld [vmem:[%s879_s6 + $0x28] sm:$0xff] }
  0x37   :  { %v231_v0 = vadd.f32 %v229_v63, %v227_v61  ;;  %v232_v1 = vadd.f32 %v230_v57, %v228_v62  ;;  %v389_v56 = vld [vmem:[%s883_s10 + $0x38] sm:$0xff]  ;;  %369 = vmatpush.msra.mxu0 %v355_v55  ;;  %v354_v57 = vld [vmem:[%s879_s6 + $0x30] sm:$0xff]  ;;  %v352_v61 = vld [vmem:[%s879_s6 + $0x20] sm:$0xff] }
  0x38   :  { %399 = vmatpush.msra.mxu1 %v389_v56  ;;  %v386_v62 = vld [vmem:[%s883_s10 + $0x20] sm:$0xff]  ;;  %v351_v63 = vld [vmem:[%s879_s6 + $0x18] sm:$0xff] }
  0x39   :  { %v235_v2 = vadd.f32 %v233_v58, %v231_v0  ;;  %v236_v3 = vadd.f32 %v234_v60, %v232_v1  ;;  %v388_v58 = vld [vmem:[%s883_s10 + $0x30] sm:$0xff]  ;;  %370 = vmatpush.msra.mxu0 %v354_v57  ;;  %v387_v60 = vld [vmem:[%s883_s10 + $0x28] sm:$0xff]  ;;  %v385_v0 = vld [vmem:[%s883_s10 + $0x18] sm:$0xff] }
  0x3a   :  { %400 = vmatpush.msra.mxu1 %v388_v58  ;;  %v350_v1 = vld [vmem:[%s879_s6 + $0x10] sm:$0xff] }
  0x3b   :  { %529 = vrsqrt.f32 %v235_v2  ;;  %vm244_vm4 = vcmp.eq.f32.partialorder %v235_v2, inf  ;;  %v247_v20 = vand.u32 2147483648, %v235_v2  ;;  %vm246_vm5 = vcmp.eq.f32.partialorder %v235_v2, 0.0  ;;  %371 = vmatpush.msra.mxu0 %v353_v59 }
  0x3c   :  { %531 = vrsqrt.f32 %v236_v3  ;;  %vm256_vm6 = vcmp.eq.f32.partialorder %v236_v3, inf  ;;  %v259_v23 = vand.u32 2147483648, %v236_v3  ;;  %vm258_vm7 = vcmp.eq.f32.partialorder %v236_v3, 0.0  ;;  %401 = vmatpush.msra.mxu1 %v387_v60 }
  0x3d   :  { %372 = vmatpush.msra.mxu0 %v352_v61  ;;  %v416_v61 = vld [vmem:[%s882_s9] sm:$0x1] }
  0x3e   :  { %295 = vadd.xlane.f32.xlu1 %v294_v5  ;;  %402 = vmatpush.msra.mxu1 %v386_v62  ;;  %v383_v5 = vld [vmem:[%s883_s10 + $0x8] sm:$0xff]  ;;  %v445_v62 = vld [vmem:[%s886_s13] sm:$0x1] }
  0x3f   :  { %373 = vmatpush.msra.mxu0 %v351_v63 }
  0x40   :  { %403 = vmatpush.msra.mxu1 %v385_v0 }
  0x41   :  { %v530_v6 = vpop.eup %529  ;;  %374 = vmatpush.msra.mxu0 %v350_v1 }
  0x42   :  { %v532_v7 = vpop.eup %531  ;;  %v238_v8 = vmul.f32 %v530_v6, %v235_v2 }
  0x43   :  { %v250_v10 = vmul.f32 %v532_v7, %v236_v3 }
  0x44   :  { %v239_v11 = vmul.f32 %v530_v6, %v238_v8  ;;  %v415_v8 = vld [vmem:[%s881_s8 + $0x18] sm:$0xff] }
  0x45   :  { %v251_v13 = vmul.f32 %v532_v7, %v250_v10  ;;  %v444_v10 = vld [vmem:[%s885_s12 + $0x18] sm:$0xff]  ;;  %433 = vmatpush.msra.mxu2 %v415_v8 }
  0x46   :  { %v240_v14 = vmul.f32 0.5, %v239_v11  ;;  %461 = vmatpush.msra.mxu3 %v444_v10  ;;  %v305_v11 = vld [vmem:[%s877_s4] sm:$0x1] }
  0x47   :  { %v252_v15 = vmul.f32 0.5, %v251_v13 }
  0x48   :  { %v241_v17 = vsub.f32 1.5, %v240_v14  ;;  %v308_v14 = vld [vmem:[%s877_s4 + $0x1] sm:$0x1] }
  0x49   :  { %v253_v18 = vsub.f32 1.5, %v252_v15 }
  0x4a   :  { %v242_v19 = vmul.f32 %v530_v6, %v241_v17  ;;  %v348_v6 = vld [vmem:[%s879_s6] sm:$0xff] }
  0x4b   :  { %v254_v21 = vmul.f32 %v532_v7, %v253_v18  ;;  %v382_v7 = vld [vmem:[%s883_s10] sm:$0xff] }
  0x4c   :  { %v243_v22 = vmul.f32 %v242_v19, %v235_v2  ;;  %v312_v17 = vld [vmem:[%s877_s4 + $0x2] sm:$0x1] }
  0x4d   :  { %v255_v16 = vmul.f32 %v254_v21, %v236_v3  ;;  %v316_v21 = vld [vmem:[%s877_s4 + $0x3] sm:$0x1] }
  0x4e   :  { %v245_v24 = vsel %vm244_vm4, %v235_v2, %v243_v22  ;;  %v384_v2 = vld [vmem:[%s883_s10 + $0x10] sm:$0xff] }
  0x4f   :  { %v248_v25 = vsel %vm246_vm5, %v247_v20, %v245_v24  ;;  %v257_v26 = vsel %vm256_vm6, %v236_v3, %v255_v16  ;;  %v349_v3 = vld [vmem:[%s879_s6 + $0x8] sm:$0xff]  ;;  %404 = vmatpush.msra.mxu1 %v384_v2  ;;  %v322_v16 = vstv %s320_s19 }
  0x50   :  { %v260_v27 = vsel %vm258_vm7, %v259_v23, %v257_v26  ;;  %375 = vmatpush.msra.mxu0 %v349_v3  ;;  %v321_v23 = vld [vmem:[%s877_s4 + $0x5] sm:$0x1]  ;;  %v326_v26 = vld [vmem:[%s877_s4 + $0x6] sm:$0x1] }
  0x51   :  { %v261_v9 = vadd.f32 %v260_v27, %v248_v25  ;;  %405 = vmatpush.msra.mxu1 %v383_v5  ;;  %v327_v27 = vstv %s799_s20 }
  0x52   :  { %376 = vmatpush.msra.mxu0 %v348_v6 }
  0x53   :  { %262 = vadd.xlane.f32.xlu0 %v261_v9  ;;  %406 = vmatpush.msra.mxu1 %v382_v7 }
  0x5b   :  { %273 = vadd.xlane.f32.xlu0 %v272_v28 }
  0xa9   :  { %v285_v29 = vpop.xlane.xlu1 %284 }
  0xaa   :  { %v286_v31 = vrot.slane %v285_v29, 4 }
  0xac   :  { %v287_v35 = vadd.f32 %v286_v31, %v285_v29  ;;  %v323_v29 = vmul.f32 %v322_v16, %v321_v23  ;;  %v332_v31 = vstv %s801_s21 }
  0xae   :  { %v288_v39 = vrot.slane %v287_v35, 2 }
  0xb0   :  { %v289_v45 = vadd.f32 %v288_v39, %v287_v35 }
  0xb1   :  { %v296_v30 = vpop.xlane.xlu1 %295 }
  0xb2   :  { %v297_v33 = vrot.slane %v296_v30, 4  ;;  %v290_v49 = vrot.slane %v289_v45, 1 }
  0xb4   :  { %v298_v37 = vadd.f32 %v297_v33, %v296_v30  ;;  %v291_v53 = vadd.f32 %v290_v49, %v289_v45  ;;  %v331_v30 = vld [vmem:[%s877_s4 + $0x7] sm:$0x1]  ;;  %v336_v33 = vld [vmem:[%s877_s4 + $0x8] sm:$0x1] }
  0xb5   :  { %v413_v49 = vld [vmem:[%s881_s8 + $0x8] sm:$0xff] }
  0xb6   :  { %v299_v4 = vrot.slane %v298_v37, 2 }
  0xb8   :  { %v300_v46 = vadd.f32 %v299_v4, %v298_v37  ;;  %v341_v37 = vld [vmem:[%s877_s4 + $0x9] sm:$0x1] }
  0xba   :  { %v301_v51 = vrot.slane %v300_v46, 1 }
  0xbc   :  { %v302_v54 = vadd.f32 %v301_v51, %v300_v46  ;;  %v412_v51 = vld [vmem:[%s881_s8] sm:$0xff] }
  0xc6   :  { %v263_v12 = vpop.xlane.xlu0 %262 }
  0xc7   :  { %v264_v32 = vrot.slane %v263_v12, 4 }
  0xc9   :  { %v265_v34 = vadd.f32 %v264_v32, %v263_v12  ;;  %v328_v32 = vmul.f32 %v327_v27, %v326_v26 }
  0xcb   :  { %v266_v36 = vrot.slane %v265_v34, 2 }
  0xcd   :  { %v267_v38 = vadd.f32 %v266_v36, %v265_v34  ;;  %v333_v36 = vmul.f32 %v332_v31, %v331_v30 }
  0xce   :  { %v274_v40 = vpop.xlane.xlu0 %273 }
  0xcf   :  { %v275_v41 = vrot.slane %v274_v40, 4  ;;  %v268_v42 = vrot.slane %v267_v38, 1 }
  0xd1   :  { %v276_v43 = vadd.f32 %v275_v41, %v274_v40  ;;  %v269_v44 = vadd.f32 %v268_v42, %v267_v38 }
  0xd3   :  { %v277_v47 = vrot.slane %v276_v43, 2  ;;  %516 = vpush %v269_v44 }
  0xd5   :  { %v278_v48 = vadd.f32 %v277_v47, %v276_v43  ;;  %v345_v43 = vld [vmem:[%s878_s5] sm:$0x1]  ;;  %v414_v47 = vld [vmem:[%s881_s8 + $0x10] sm:$0xff] }
  0xd6   :  { %434 = vmatpush.msra.mxu2 %v414_v47 }
  0xd7   :  { %v279_v50 = vrot.slane %v278_v48, 1 }
  0xd8   :  { %435 = vmatpush.msra.mxu2 %v413_v49 }
  0xd9   :  { %v280_v52 = vadd.f32 %v279_v50, %v278_v48  ;;  %v443_v48 = vld [vmem:[%s885_s12 + $0x10] sm:$0xff]  ;;  %v442_v50 = vld [vmem:[%s885_s12 + $0x8] sm:$0xff] }
  0xda   :  { %462 = vmatpush.msra.mxu3 %v443_v48  ;;  %436 = vmatpush.msra.mxu2 %v412_v51 }
  0xdb   :  { %518 = vpush %v280_v52  ;;  %v441_v52 = vld [vmem:[%s885_s12] sm:$0xff] }
  0xdc   :  { %520 = vpush %v291_v53  ;;  %463 = vmatpush.msra.mxu3 %v442_v50  ;;  %v356_v53 = vld [vmem:[%s880_s7] sm:$0x1] }
  0xdd   :  { %522 = vpush %v302_v54  ;;  %v390_v54 = vld [vmem:[%s884_s11] sm:$0x1] }
  0xde   :  { %464 = vmatpush.msra.mxu3 %v441_v52 }
 0x104   :  { %s517_s3 = spop %516 }
 0x105   :  { %s271_s6 = smul.f32 0.00048828125, %s517_s3  ;;  %s510_s3 = sld [smem:[#allocation6 + $0x3]] }
 0x107   :  { %v306_v13 = vstv %s271_s6  ;;  %s511_s6 = sld [smem:[#allocation6 + $0x4]] }
 0x108   :  { %v307_v18 = vmul.f32 %v306_v13, %v305_v11 }
 0x10b   :  { %v337_v34 = vstv %s510_s3 }
 0x10c   :  { %s519_s10 = spop %518  ;;  %v338_v40 = vmul.f32 %v337_v34, %v336_v33 }
 0x10d   :  { %s282_s24 = smul.f32 0.00048828125, %s519_s10  ;;  %s521_s27 = spop %520  ;;  %v342_v38 = vstv %s511_s6 }
 0x10e   :  { %s293_s28 = smul.f32 0.00048828125, %s521_s27  ;;  %s523_s29 = spop %522  ;;  %v343_v41 = vmul.f32 %v342_v38, %v341_v37 }
 0x10f   :  { %v309_v15 = vstv %s282_s24  ;;  %s304_s1 = smul.f32 0.00048828125, %s523_s29 }
 0x110   :  { %v310_v19 = vmul.f32 %v309_v15, %v308_v14  ;;  %v313_v20 = vstv %s293_s28 }
 0x111   :  { %v317_v22 = vstv %s304_s1  ;;  %v314_v25 = vmul.f32 %v313_v20, %v312_v17 }
 0x112   :  { %v311_v24 = vadd.f32 %v310_v19, %v307_v18  ;;  %v318_v28 = vmul.f32 %v317_v22, %v316_v21 }
 0x114   :  { %v315_v9 = vadd.f32 %v314_v25, %v311_v24 }
 0x116   :  { %v319_v12 = vadd.f32 %v318_v28, %v315_v9 }
 0x118   :  { %v324_v35 = vadd.f32 %v323_v29, %v319_v12 }
 0x11a   :  { %v329_v39 = vadd.f32 %v328_v32, %v324_v35 }
 0x11c   :  { %v334_v4 = vadd.f32 %v333_v36, %v329_v39 }
 0x11e   :  { %v339_v42 = vadd.f32 %v338_v40, %v334_v4 }
 0x120   :  { %v344_v44 = vadd.f32 %v343_v41, %v339_v42 }
 0x122   :  { %v346_v45 = vadd.f32 %v345_v43, %v344_v44 }
 0x124   :  { %v347_v46 = vmax.f32 %v346_v45, 0.0 }
 0x126   :  { %512 = vmatmul.msk.f32.vlgmr.msra.gmra.mxu0 %vm357_vm8, %v347_v46  ;;  %513 = vmatmul.msk.f32.vlgmr.msra.gmra.mxu1 %vm357_vm8, %v347_v46 }
 0x1a3   :  { %v378_v55 = vpop.f32.mrf.mxu0  ;;  %v408_v56 = vpop.f32.mrf.mxu1 }
 0x1a4   :  { %v379_v57 = vadd.f32 %v378_v55, %v356_v53  ;;  %v409_v58 = vadd.f32 %v408_v56, %v390_v54 }
 0x1a6   :  { %v381_v59 = vmax.f32 %v379_v57, 0.0  ;;  %v411_v60 = vmax.f32 %v409_v58, 0.0 }
 0x1a8   :  { %514 = vmatmul.msk.f32.vlgmr.msra.gmra.mxu2 %vm417_vm9, %v381_v59  ;;  %515 = vmatmul.msk.f32.vlgmr.msra.gmra.mxu3 %vm417_vm9, %v411_v60 }
 0x22b   :  { %v438_v63 = vpop.f32.mrf.mxu2  ;;  %v466_v0 = vpop.f32.mrf.mxu3 }
 0x22c   :  { %v439_v1 = vadd.f32 %v438_v63, %v416_v61  ;;  %v467_v2 = vadd.f32 %v466_v0, %v445_v62 }
 0x22e   :  { %488 = vst.msk [vmem:[%s888_s15] sm:$0x1] %vm487_vm10, %v467_v2  ;;  %v469_v3 = vmul.f32 %v439_v1, %v439_v1 }
 0x230   :  { %v471_v5 = vsel %vm470_vm11, %v469_v3, 0.0 }
 0x231   :  { %472 = vadd.xlane.f32.xlu2 %v471_v5 }
 0x2a4   :  { %v473_v6 = vpop.xlane.xlu2 %472 }
 0x2a5   :  { %v474_v7 = vadd.f32 1e-12, %v473_v6 }
 0x2a7   :  { %533 = vrsqrt.f32 %v474_v7  ;;  %vm481_vm13 = vweird.f32 %v474_v7 }
 0x2ad   :  { %v534_v8 = vpop.eup %533 }
 0x2ae   :  { %v476_v10 = vmul.f32 %v534_v8, %v474_v7  ;;  %vm482_vm12 = vweird.f32 %v534_v8 }
 0x2af   :  { %vm483_vm14 = vmor %vm481_vm13, %vm482_vm12 }
 0x2b0   :  { %v477_v11 = vmul.f32 %v534_v8, %v476_v10 }
 0x2b2   :  { %v478_v13 = vmul.f32 0.5, %v477_v11 }
 0x2b4   :  { %v479_v14 = vsub.f32 1.5, %v478_v13 }
 0x2b6   :  { %v480_v15 = vmul.f32 %v534_v8, %v479_v14 }
 0x2b8   :  { %v484_v17 = vsel %vm483_vm14, %v534_v8, %v480_v15 }
 0x2b9   :  { %v485_v18 = vmul.f32 %v484_v17, %v439_v1 }
 0x2bb   :  { %486 = vst.msk [vmem:[%s887_s14] sm:$0x1] %vm470_vm11, %v485_v18 }
 0x2bc   :  { %497 = vsyncpa [#allocation3], 1 }
 0x2bd   :  { %498 = vsyncpa [#allocation5], 1 }

// kernel: odometry_forward.7
= control target key start
LH: loop header
LB: loop body
LE: loop exit
PB: predicated region body
PF: predicated region fallthrough
CT: control target
= control target key end

     0   :  { %21 = vsyncpa [#allocation3], 0  ;;  %s966_s0 = inlined_call_operand.vmem [shape: f32[1,4], index: 0, kind: input, shape index: {}]   ;;  %s967_s1 = inlined_call_operand.vmem [shape: f32[1,3], index: 1, kind: input, shape index: {}]   ;;  %s968_s2 = inlined_call_operand.vmem [shape: f32[1,5], index: 2, kind: input, shape index: {}]   ;;  %s969_s3 = inlined_call_operand.vmem [shape: f32[1,3,16,128], index: 3, kind: input, shape index: {}]   ;;  %s970_s4 = inlined_call_operand.vmem [shape: f32[10,128], index: 4, kind: input, shape index: {}]   ;;  %s971_s5 = inlined_call_operand.vmem [shape: f32[1,128], index: 5, kind: input, shape index: {}]   ;;  %s972_s6 = inlined_call_operand.vmem [shape: f32[128,64], index: 6, kind: input, shape index: {}]   ;;  %s973_s7 = inlined_call_operand.vmem [shape: f32[1,64], index: 7, kind: input, shape index: {}]   ;;  %s974_s8 = inlined_call_operand.vmem [shape: f32[64,4], index: 8, kind: input, shape index: {}]   ;;  %s975_s9 = inlined_call_operand.vmem [shape: f32[1,4], index: 9, kind: input, shape index: {}]   ;;  %s976_s10 = inlined_call_operand.vmem [shape: f32[128,64], index: 10, kind: input, shape index: {}]   ;;  %s977_s11 = inlined_call_operand.vmem [shape: f32[1,64], index: 11, kind: input, shape index: {}]   ;;  %s978_s12 = inlined_call_operand.vmem [shape: f32[64,3], index: 12, kind: input, shape index: {}]   ;;  %s979_s13 = inlined_call_operand.vmem [shape: f32[1,3], index: 13, kind: input, shape index: {}]   ;;  %s980_s14 = inlined_call_operand.vmem [shape: f32[1,4], index: 14, kind: output, shape index: {0}]   ;;  %s981_s15 = inlined_call_operand.vmem [shape: f32[1,3], index: 15, kind: output, shape index: {1}]  }
   0x1   :  { %22 = vsyncpa [#allocation5], 0  ;;  %s37_s20 = sshll.u32 %s967_s1, 4  ;;  %s28_s23 = sshll.u32 %s966_s0, 4  ;;  %s38_s20 = int_to_ptr.vmem [resolvable:$true] %s37_s20  ;;  %s29_s23 = int_to_ptr.vmem [resolvable:$true] %s28_s23 }
   0x2   :  { %s593_s24 = smov [#allocation4]   ;;  %s594_s25 = smov [#allocation2]  }
   0x3   :  { %40 = dma.vmem_to_smem %s38_s20, 16, %s593_s24, [#allocation5]  }
   0x4   :  { %31 = dma.vmem_to_smem %s29_s23, 16, %s594_s25, [#allocation3]  }
   0x5   :  { %s46_s28 = sshll.u32 %s968_s2, 4  ;;  %s595_s29 = smov [#allocation6]   ;;  %s47_s28 = int_to_ptr.vmem [resolvable:$true] %s46_s28 }
   0x6   :  { %49 = dma.vmem_to_smem %s47_s28, 16, %s595_s29, [#allocation5]  }
   0x7   :  { %589 = dma.done.wait [#allocation3], 16  }
   0x8   :  { %590 = vsyncadd [#allocation3], 4294967280 }
   0x9   :  { %591 = dma.done.wait [#allocation5], 32  }
   0xa   :  { %592 = vsyncadd [#allocation5], 4294967264 }
   0xb   :  { %84 = sfence }
   0xc   :  { %s85_s1 = sld [smem:[#allocation2]]  ;;  %v96_v0 = vld [vmem:[%s969_s3] sm:$0xff]  ;;  %v97_v1 = vld [vmem:[%s969_s3 + $0x8] sm:$0xff]  ;;  %v522_v2 = vld [vmem:[%s969_s3 + $0x10] sm:$0xff]  ;;  %vm433_vm8 = vcmask 523264   ;;  %vm507_vm9 = vcmask 16384  }
   0xd   :  { %s519_s30 = sld [smem:[#allocation2 + $0x1]]  ;;  %v523_v3 = vld [vmem:[%s969_s3 + $0x18] sm:$0xff]  ;;  %v524_v5 = vld [vmem:[%s969_s3 + $0x20] sm:$0xff]  ;;  %v525_v6 = vld [vmem:[%s969_s3 + $0x28] sm:$0xff]  ;;  %vm490_vm10 = vcmask 24576  }
   0xe   :  { %s685_s0 = sld [smem:[#allocation2 + $0x2]] }
   0xf   :  { %s687_s16 = sld [smem:[#allocation2 + $0x3]] }
  0x10   :  { %s755_s19 = sld [smem:[#allocation4 + $0x2]] }
  0x11   :  { %s879_s21 = sld [smem:[#allocation6 + $0x1]] }
  0x12   :  { %s89_s2 = smul.f32 %s85_s1, %s85_s1  ;;  %v701_v4 = vstv %s85_s1  ;;  %s890_s29 = sld [smem:[#allocation6 + $0x2]] }
  0x13   :  { %s90_s25 = smul.f32 %s519_s30, %s519_s30  ;;  %s104_s17 = ssub.f32 0.0, %s519_s30  ;;  %v119_v7 = vmul.f32 %v701_v4, %v96_v0  ;;  %v120_v8 = vmul.f32 %v701_v4, %v97_v1  ;;  %v129_v10 = vmul.f32 %v522_v2, %v701_v4  ;;  %v130_v11 = vmul.f32 %v523_v3, %v701_v4 }
  0x14   :  { %s92_s18 = smul.f32 %s685_s0, %s685_s0  ;;  %v714_v9 = vstv %s685_s0  ;;  %v718_v12 = vstv %s519_s30  ;;  %v140_v31 = vmul.f32 %v524_v5, %v701_v4  ;;  %v141_v34 = vmul.f32 %v525_v6, %v701_v4  ;;  %s530_s24 = sld [smem:[#allocation6 + $0x3]] }
  0x15   :  { %s91_s1 = sadd.f32 %s90_s25, %s89_s2  ;;  %v105_v13 = vstv %s104_s17  ;;  %v109_v14 = vmul.f32 %v522_v2, %v714_v9  ;;  %v110_v15 = vmul.f32 %v523_v3, %v714_v9  ;;  %v113_v16 = vstv %s687_s16  ;;  %s94_s30 = smul.f32 %s687_s16, %s687_s16 }
  0x16   :  { %v106_v17 = vmul.f32 %v105_v13, %v96_v0  ;;  %v107_v18 = vmul.f32 %v105_v13, %v97_v1  ;;  %v114_v19 = vmul.f32 %v524_v5, %v113_v16  ;;  %v115_v20 = vmul.f32 %v525_v6, %v113_v16  ;;  %s746_s16 = sld [smem:[#allocation4]] }
  0x17   :  { %v121_v21 = vmul.f32 %v524_v5, %v714_v9  ;;  %v122_v22 = vmul.f32 %v525_v6, %v714_v9  ;;  %v125_v23 = vmul.f32 %v522_v2, %v113_v16  ;;  %v126_v24 = vmul.f32 %v523_v3, %v113_v16  ;;  %s93_s3 = sadd.f32 %s92_s18, %s91_s1 }
  0x18   :  { %v111_v25 = vsub.f32 %v106_v17, %v109_v14  ;;  %v112_v26 = vsub.f32 %v107_v18, %v110_v15  ;;  %v131_v27 = vmul.f32 %v113_v16, %v96_v0  ;;  %v132_v28 = vmul.f32 %v113_v16, %v97_v1  ;;  %s753_s2 = sld [smem:[#allocation4 + $0x1]] }
  0x19   :  { %v123_v29 = vadd.f32 %v121_v21, %v119_v7  ;;  %v124_v30 = vadd.f32 %v122_v22, %v120_v8  ;;  %v136_v35 = vmul.f32 %v524_v5, %v718_v12  ;;  %v137_v36 = vmul.f32 %v525_v6, %v718_v12  ;;  %s95_s0 = sadd.f32 %s94_s30, %s93_s3 }
  0x1a   :  { %v116_v32 = vsub.f32 %v111_v25, %v114_v19  ;;  %v117_v33 = vsub.f32 %v112_v26, %v115_v20  ;;  %v142_v37 = vmul.f32 %v522_v2, %v718_v12  ;;  %v143_v38 = vmul.f32 %v523_v3, %v718_v12 }
  0x1b   :  { %v127_v39 = vsub.f32 %v123_v29, %v125_v23  ;;  %v128_v40 = vsub.f32 %v124_v30, %v126_v24  ;;  %v133_v41 = vadd.f32 %v131_v27, %v129_v10  ;;  %v134_v42 = vadd.f32 %v132_v28, %v130_v11 }
  0x1c   :  { %v144_v43 = vadd.f32 %v142_v37, %v140_v31  ;;  %v146_v44 = vmul.f32 %v714_v9, %v96_v0  ;;  %v150_v45 = vsub.f32 0.0, %v116_v32  ;;  %v151_v46 = vsub.f32 0.0, %v117_v33 }
  0x1d   :  { %v145_v47 = vadd.f32 %v143_v38, %v141_v34  ;;  %v147_v48 = vmul.f32 %v714_v9, %v97_v1  ;;  %v138_v49 = vsub.f32 %v133_v41, %v136_v35  ;;  %v139_v50 = vsub.f32 %v134_v42, %v137_v36 }
  0x1e   :  { %v154_v51 = vmul.f32 %v127_v39, %v701_v4  ;;  %v166_v52 = vstv %s95_s0  ;;  %v148_v53 = vsub.f32 %v144_v43, %v146_v44  ;;  %v152_v54 = vmul.f32 %v150_v45, %v718_v12  ;;  %s871_s0 = sld [smem:[#allocation6]] }
  0x1f   :  { %v153_v55 = vmul.f32 %v151_v46, %v718_v12  ;;  %v155_v56 = vmul.f32 %v128_v40, %v701_v4  ;;  %545 = vrcp.f32 %v166_v52  ;;  %v187_v57 = vmul.f32 %v150_v45, %v714_v9 }
  0x20   :  { %v188_v58 = vmul.f32 %v151_v46, %v714_v9  ;;  %v149_v59 = vsub.f32 %v145_v47, %v147_v48  ;;  %v189_v60 = vmul.f32 %v127_v39, %v113_v16  ;;  %v190_v61 = vmul.f32 %v128_v40, %v113_v16 }
  0x21   :  { %v158_v62 = vmul.f32 %v138_v49, %v113_v16  ;;  %v159_v63 = vmul.f32 %v139_v50, %v113_v16  ;;  %v156_v0 = vadd.f32 %v154_v51, %v152_v54  ;;  %v157_v1 = vadd.f32 %v155_v56, %v153_v55 }
  0x22   :  { %v162_v2 = vmul.f32 %v148_v53, %v714_v9  ;;  %v193_v3 = vmul.f32 %v138_v49, %v701_v4  ;;  %v191_v5 = vadd.f32 %v189_v60, %v187_v57  ;;  %v192_v6 = vadd.f32 %v190_v61, %v188_v58 }
  0x23   :  { %v194_v7 = vmul.f32 %v139_v50, %v701_v4  ;;  %v207_v8 = vmul.f32 %v150_v45, %v113_v16  ;;  %v163_v10 = vmul.f32 %v149_v59, %v714_v9  ;;  %vm172_vm0 = vweird.f32 %v166_v52 }
  0x24   :  { %v208_v11 = vmul.f32 %v151_v46, %v113_v16  ;;  %v209_v13 = vmul.f32 %v127_v39, %v714_v9  ;;  %v176_v15 = vand.u32 2147483647, %v166_v52  ;;  %v210_v17 = vmul.f32 %v128_v40, %v714_v9 }
  0x25   :  { %v546_v14 = vpop.eup %545  ;;  %v213_v18 = vmul.f32 %v138_v49, %v718_v12  ;;  %v214_v19 = vmul.f32 %v139_v50, %v718_v12  ;;  %v178_v21 = vand.u32 2147483648, %v166_v52  ;;  %v197_v22 = vmul.f32 %v148_v53, %v718_v12 }
  0x26   :  { %v168_v20 = vmul.f32 %v546_v14, %v166_v52  ;;  %v198_v23 = vmul.f32 %v149_v59, %v718_v12  ;;  %v195_v16 = vadd.f32 %v193_v3, %v191_v5  ;;  %v196_v24 = vadd.f32 %v194_v7, %v192_v6 }
  0x27   :  { %v211_v25 = vsub.f32 %v207_v8, %v209_v13  ;;  %v212_v26 = vsub.f32 %v208_v11, %v210_v17  ;;  %vm173_vm1 = vweird.f32 %v546_v14  ;;  %v217_v9 = vmul.f32 %v148_v53, %v701_v4 }
  0x28   :  { %v169_v27 = vsub.f32 1.0, %v168_v20  ;;  %v218_v28 = vmul.f32 %v149_v59, %v701_v4  ;;  %v160_v29 = vsub.f32 %v156_v0, %v158_v62  ;;  %v161_v30 = vsub.f32 %v157_v1, %v159_v63  ;;  %vm174_vm2 = vmor %vm172_vm0, %vm173_vm1 }
  0x29   :  { %v215_v31 = vadd.f32 %v213_v18, %v211_v25  ;;  %v216_v12 = vadd.f32 %v214_v19, %v212_v26  ;;  %vm177_vm3 = vcmp.eq.f32.partialorder %v176_v15, 8.507059e+37  ;;  %v179_v33 = vor.u32 1.1754944e-38, %v178_v21 }
  0x2a   :  { %v170_v32 = vmul.f32 %v546_v14, %v169_v27  ;;  %v199_v34 = vsub.f32 %v195_v16, %v197_v22  ;;  %v200_v36 = vsub.f32 %v196_v24, %v198_v23  ;;  %v164_v39 = vadd.f32 %v162_v2, %v160_v29 }
  0x2b   :  { %v219_v37 = vadd.f32 %v217_v9, %v215_v31  ;;  %v220_v38 = vadd.f32 %v218_v28, %v216_v12  ;;  %v165_v40 = vadd.f32 %v163_v10, %v161_v30  ;;  %v184_v42 = vstv %s746_s16 }
  0x2c   :  { %v171_v35 = vadd.f32 %v546_v14, %v170_v32  ;;  %v204_v43 = vstv %s753_s2  ;;  %v224_v44 = vstv %s755_s19 }
  0x2e   :  { %v175_v4 = vsel %vm174_vm2, %v546_v14, %v171_v35 }
  0x2f   :  { %v180_v41 = vsel %vm177_vm3, %v179_v33, %v175_v4 }
  0x30   :  { %v201_v45 = vmul.f32 %v199_v34, %v180_v41  ;;  %v202_v46 = vmul.f32 %v200_v36, %v180_v41  ;;  %v221_v47 = vmul.f32 %v219_v37, %v180_v41  ;;  %v222_v48 = vmul.f32 %v220_v38, %v180_v41 }
  0x31   :  { %v181_v49 = vmul.f32 %v180_v41, %v164_v39  ;;  %v182_v50 = vmul.f32 %v180_v41, %v165_v40 }
  0x32   :  { %v205_v51 = vadd.f32 %v204_v43, %v201_v45  ;;  %v206_v52 = vadd.f32 %v204_v43, %v202_v46  ;;  %v225_v53 = vadd.f32 %v224_v44, %v221_v47  ;;  %v226_v54 = vadd.f32 %v224_v44, %v222_v48 }
  0x33   :  { %v185_v55 = vadd.f32 %v184_v42, %v181_v49  ;;  %v186_v56 = vadd.f32 %v184_v42, %v182_v50 }
  0x34   :  { %v230_v57 = vmul.f32 %v206_v52, %v206_v52  ;;  %v233_v58 = vmul.f32 %v225_v53, %v225_v53  ;;  %v283_v59 = vadd.f32 %v206_v52, %v205_v51  ;;  %v234_v60 = vmul.f32 %v226_v54, %v226_v54 }
  0x35   :  { %v227_v61 = vmul.f32 %v185_v55, %v185_v55  ;;  %v228_v62 = vmul.f32 %v186_v56, %v186_v56  ;;  %v229_v63 = vmul.f32 %v205_v51, %v205_v51  ;;  %v294_v5 = vadd.f32 %v226_v54, %v225_v53 }
  0x36   :  { %284 = vadd.xlane.f32.xlu1 %v283_v59  ;;  %v272_v28 = vadd.f32 %v186_v56, %v185_v55  ;;  %v363_v55 = vld [vmem:[%s972_s6 + $0x78] sm:$0xff]  ;;  %v361_v59 = vld [vmem:[%s972_s6 + $0x68] sm:$0xff] }
  0x37   :  { %v231_v0 = vadd.f32 %v229_v63, %v227_v61  ;;  %v232_v1 = vadd.f32 %v230_v57, %v228_v62  ;;  %v401_v56 = vld [vmem:[%s976_s10 + $0x78] sm:$0xff]  ;;  %v362_v57 = vld [vmem:[%s972_s6 + $0x70] sm:$0xff]  ;;  %365 = vmatpush.msra.mxu0 %v363_v55  ;;  %v360_v61 = vld [vmem:[%s972_s6 + $0x60] sm:$0xff] }
  0x38   :  { %403 = vmatpush.msra.mxu1 %v401_v56  ;;  %v398_v62 = vld [vmem:[%s976_s10 + $0x60] sm:$0xff]  ;;  %v359_v63 = vld [vmem:[%s972_s6 + $0x58] sm:$0xff]  ;;  %v336_v56 = vld [vmem:[%s970_s4 + $0x8] sm:$0x1] }
  0x39   :  { %v235_v2 = vadd.f32 %v233_v58, %v231_v0  ;;  %v236_v3 = vadd.f32 %v234_v60, %v232_v1  ;;  %v400_v58 = vld [vmem:[%s976_s10 + $0x70] sm:$0xff]  ;;  %v399_v60 = vld [vmem:[%s976_s10 + $0x68] sm:$0xff]  ;;  %366 = vmatpush.msra.mxu0 %v362_v57  ;;  %v397_v0 = vld [vmem:[%s976_s10 + $0x58] sm:$0xff]  ;;  %v337_v57 = vstv %s530_s24 }
  0x3a   :  { %404 = vmatpush.msra.mxu1 %v400_v58  ;;  %v358_v1 = vld [vmem:[%s972_s6 + $0x50] sm:$0xff] }
  0x3b   :  { %547 = vrsqrt.f32 %v235_v2  ;;  %vm244_vm4 = vcmp.eq.f32.partialorder %v235_v2, inf  ;;  %v247_v20 = vand.u32 2147483648, %v235_v2  ;;  %vm246_vm5 = vcmp.eq.f32.partialorder %v235_v2, 0.0  ;;  %367 = vmatpush.msra.mxu0 %v361_v59 }
  0x3c   :  { %549 = vrsqrt.f32 %v236_v3  ;;  %vm256_vm6 = vcmp.eq.f32.partialorder %v236_v3, inf  ;;  %v259_v23 = vand.u32 2147483648, %v236_v3  ;;  %vm258_vm7 = vcmp.eq.f32.partialorder %v236_v3, 0.0  ;;  %405 = vmatpush.msra.mxu1 %v399_v60  ;;  %v341_v60 = vld [vmem:[%s970_s4 + $0x9] sm:$0x1] }
  0x3d   :  { %368 = vmatpush.msra.mxu0 %v360_v61 }
  0x3e   :  { %295 = vadd.xlane.f32.xlu1 %v294_v5  ;;  %406 = vmatpush.msra.mxu1 %v398_v62  ;;  %v395_v5 = vld [vmem:[%s976_s10 + $0x48] sm:$0xff] }
  0x3f   :  { %369 = vmatpush.msra.mxu0 %v359_v63  ;;  %v338_v63 = vmul.f32 %v337_v57, %v336_v56 }
  0x40   :  { %407 = vmatpush.msra.mxu1 %v397_v0 }
  0x41   :  { %v548_v6 = vpop.eup %547  ;;  %370 = vmatpush.msra.mxu0 %v358_v1 }
  0x42   :  { %v550_v7 = vpop.eup %549  ;;  %v238_v8 = vmul.f32 %v548_v6, %v235_v2 }
  0x43   :  { %v250_v10 = vmul.f32 %v550_v7, %v236_v3 }
  0x44   :  { %v239_v11 = vmul.f32 %v548_v6, %v238_v8  ;;  %v355_v8 = vld [vmem:[%s972_s6 + $0x38] sm:$0xff] }
  0x45   :  { %v251_v13 = vmul.f32 %v550_v7, %v250_v10  ;;  %v393_v10 = vld [vmem:[%s976_s10 + $0x38] sm:$0xff] }
  0x46   :  { %v240_v14 = vmul.f32 0.5, %v239_v11  ;;  %v354_v11 = vld [vmem:[%s972_s6 + $0x30] sm:$0xff] }
  0x47   :  { %v252_v15 = vmul.f32 0.5, %v251_v13  ;;  %v392_v13 = vld [vmem:[%s976_s10 + $0x30] sm:$0xff] }
  0x48   :  { %v241_v17 = vsub.f32 1.5, %v240_v14  ;;  %v353_v14 = vld [vmem:[%s972_s6 + $0x28] sm:$0xff] }
  0x49   :  { %v253_v18 = vsub.f32 1.5, %v252_v15  ;;  %v391_v15 = vld [vmem:[%s976_s10 + $0x28] sm:$0xff] }
  0x4a   :  { %v242_v19 = vmul.f32 %v548_v6, %v241_v17  ;;  %v356_v6 = vld [vmem:[%s972_s6 + $0x40] sm:$0xff] }
  0x4b   :  { %v254_v21 = vmul.f32 %v550_v7, %v253_v18  ;;  %v394_v7 = vld [vmem:[%s976_s10 + $0x40] sm:$0xff] }
  0x4c   :  { %v243_v22 = vmul.f32 %v242_v19, %v235_v2  ;;  %v352_v17 = vld [vmem:[%s972_s6 + $0x20] sm:$0xff]  ;;  %v351_v19 = vld [vmem:[%s972_s6 + $0x18] sm:$0xff] }
  0x4d   :  { %v255_v16 = vmul.f32 %v254_v21, %v236_v3  ;;  %v390_v18 = vld [vmem:[%s976_s10 + $0x20] sm:$0xff]  ;;  %v350_v21 = vld [vmem:[%s972_s6 + $0x10] sm:$0xff] }
  0x4e   :  { %v245_v24 = vsel %vm244_vm4, %v235_v2, %v243_v22  ;;  %v396_v2 = vld [vmem:[%s976_s10 + $0x50] sm:$0xff] }
  0x4f   :  { %v248_v25 = vsel %vm246_vm5, %v247_v20, %v245_v24  ;;  %v257_v26 = vsel %vm256_vm6, %v236_v3, %v255_v16  ;;  %408 = vmatpush.msra.mxu1 %v396_v2  ;;  %v357_v3 = vld [vmem:[%s972_s6 + $0x48] sm:$0xff]  ;;  %v389_v20 = vld [vmem:[%s976_s10 + $0x18] sm:$0xff]  ;;  %v388_v22 = vld [vmem:[%s976_s10 + $0x10] sm:$0xff] }
  0x50   :  { %v260_v27 = vsel %vm258_vm7, %v259_v23, %v257_v26  ;;  %371 = vmatpush.msra.mxu0 %v357_v3  ;;  %v349_v23 = vld [vmem:[%s972_s6 + $0x8] sm:$0xff]  ;;  %v348_v24 = vld [vmem:[%s972_s6] sm:$0xff]  ;;  %v431_v26 = vld [vmem:[%s974_s8 + $0x38] sm:$0xff] }
  0x51   :  { %v261_v9 = vadd.f32 %v260_v27, %v248_v25  ;;  %409 = vmatpush.msra.mxu1 %v395_v5  ;;  %v387_v16 = vld [vmem:[%s976_s10 + $0x8] sm:$0xff]  ;;  %v386_v25 = vld [vmem:[%s976_s10] sm:$0xff]  ;;  %v464_v27 = vld [vmem:[%s978_s12 + $0x38] sm:$0xff]  ;;  %445 = vmatpush.msra.mxu2 %v431_v26 }
  0x52   :  { %372 = vmatpush.msra.mxu0 %v356_v6  ;;  %477 = vmatpush.msra.mxu3 %v464_v27  ;;  %v345_v3 = vld [vmem:[%s971_s5] sm:$0x1] }
  0x53   :  { %262 = vadd.xlane.f32.xlu0 %v261_v9  ;;  %410 = vmatpush.msra.mxu1 %v394_v7  ;;  %v430_v9 = vld [vmem:[%s974_s8 + $0x30] sm:$0xff] }
  0x54   :  { %373 = vmatpush.msra.mxu0 %v355_v8  ;;  %446 = vmatpush.msra.mxu2 %v430_v9  ;;  %v426_v8 = vld [vmem:[%s974_s8 + $0x10] sm:$0xff] }
  0x55   :  { %411 = vmatpush.msra.mxu1 %v393_v10  ;;  %v459_v10 = vld [vmem:[%s978_s12 + $0x10] sm:$0xff] }
  0x56   :  { %374 = vmatpush.msra.mxu0 %v354_v11  ;;  %v425_v11 = vld [vmem:[%s974_s8 + $0x8] sm:$0xff] }
  0x57   :  { %412 = vmatpush.msra.mxu1 %v392_v13  ;;  %v458_v13 = vld [vmem:[%s978_s12 + $0x8] sm:$0xff] }
  0x58   :  { %375 = vmatpush.msra.mxu0 %v353_v14  ;;  %v424_v14 = vld [vmem:[%s974_s8] sm:$0xff] }
  0x59   :  { %413 = vmatpush.msra.mxu1 %v391_v15  ;;  %v457_v15 = vld [vmem:[%s978_s12] sm:$0xff] }
  0x5a   :  { %376 = vmatpush.msra.mxu0 %v352_v17  ;;  %v364_v17 = vld [vmem:[%s973_s7] sm:$0x1] }
  0x5b   :  { %273 = vadd.xlane.f32.xlu0 %v272_v28  ;;  %414 = vmatpush.msra.mxu1 %v390_v18  ;;  %v463_v28 = vld [vmem:[%s978_s12 + $0x30] sm:$0xff]  ;;  %v402_v18 = vld [vmem:[%s977_s11] sm:$0x1] }
  0x5c   :  { %377 = vmatpush.msra.mxu0 %v351_v19  ;;  %478 = vmatpush.msra.mxu3 %v463_v28 }
  0x5d   :  { %415 = vmatpush.msra.mxu1 %v389_v20 }
  0x5e   :  { %378 = vmatpush.msra.mxu0 %v350_v21 }
  0x5f   :  { %416 = vmatpush.msra.mxu1 %v388_v22 }
  0x60   :  { %379 = vmatpush.msra.mxu0 %v349_v23 }
  0x61   :  { %417 = vmatpush.msra.mxu1 %v387_v16 }
  0x62   :  { %380 = vmatpush.msra.mxu0 %v348_v24  ;;  %v432_v24 = vld [vmem:[%s975_s9] sm:$0x1] }
  0x63   :  { %418 = vmatpush.msra.mxu1 %v386_v25  ;;  %v465_v25 = vld [vmem:[%s979_s13] sm:$0x1] }
  0xa9   :  { %v285_v29 = vpop.xlane.xlu1 %284 }
  0xaa   :  { %v286_v31 = vrot.slane %v285_v29, 4 }
  0xac   :  { %v287_v35 = vadd.f32 %v286_v31, %v285_v29  ;;  %v429_v29 = vld [vmem:[%s974_s8 + $0x28] sm:$0xff]  ;;  %v428_v31 = vld [vmem:[%s974_s8 + $0x20] sm:$0xff] }
  0xad   :  { %447 = vmatpush.msra.mxu2 %v429_v29 }
  0xae   :  { %v288_v39 = vrot.slane %v287_v35, 2 }
  0xaf   :  { %448 = vmatpush.msra.mxu2 %v428_v31 }
  0xb0   :  { %v289_v45 = vadd.f32 %v288_v39, %v287_v35  ;;  %v427_v35 = vld [vmem:[%s974_s8 + $0x18] sm:$0xff] }
  0xb1   :  { %v296_v30 = vpop.xlane.xlu1 %295  ;;  %449 = vmatpush.msra.mxu2 %v427_v35 }
  0xb2   :  { %v297_v33 = vrot.slane %v296_v30, 4  ;;  %v290_v49 = vrot.slane %v289_v45, 1 }
  0xb3   :  { %450 = vmatpush.msra.mxu2 %v426_v8 }
  0xb4   :  { %v298_v37 = vadd.f32 %v297_v33, %v296_v30  ;;  %v291_v53 = vadd.f32 %v290_v49, %v289_v45  ;;  %v462_v30 = vld [vmem:[%s978_s12 + $0x28] sm:$0xff] }
  0xb5   :  { %479 = vmatpush.msra.mxu3 %v462_v30  ;;  %451 = vmatpush.msra.mxu2 %v425_v11 }
  0xb6   :  { %v299_v4 = vrot.slane %v298_v37, 2 }
  0xb7   :  { %452 = vmatpush.msra.mxu2 %v424_v14 }
  0xb8   :  { %v300_v46 = vadd.f32 %v299_v4, %v298_v37 }
  0xba   :  { %v301_v51 = vrot.slane %v300_v46, 1 }
  0xbc   :  { %v302_v54 = vadd.f32 %v301_v51, %v300_v46 }
  0xc6   :  { %v263_v12 = vpop.xlane.xlu0 %262 }
  0xc7   :  { %v264_v32 = vrot.slane %v263_v12, 4 }
  0xc9   :  { %v265_v34 = vadd.f32 %v264_v32, %v263_v12  ;;  %v461_v12 = vld [vmem:[%s978_s12 + $0x20] sm:$0xff] }
  0xca   :  { %v305_v32 = vld [vmem:[%s970_s4] sm:$0x1]  ;;  %480 = vmatpush.msra.mxu3 %v461_v12 }
  0xcb   :  { %v266_v36 = vrot.slane %v265_v34, 2 }
  0xcd   :  { %v267_v38 = vadd.f32 %v266_v36, %v265_v34  ;;  %v308_v34 = vld [vmem:[%s970_s4 + $0x1] sm:$0x1]  ;;  %v460_v36 = vld [vmem:[%s978_s12 + $0x18] sm:$0xff] }
  0xce   :  { %v274_v40 = vpop.xlane.xlu0 %273  ;;  %481 = vmatpush.msra.mxu3 %v460_v36 }
  0xcf   :  { %v275_v41 = vrot.slane %v274_v40, 4  ;;  %v268_v42 = vrot.slane %v267_v38, 1 }
  0xd0   :  { %482 = vmatpush.msra.mxu3 %v459_v10 }
  0xd1   :  { %v276_v43 = vadd.f32 %v275_v41, %v274_v40  ;;  %v269_v44 = vadd.f32 %v268_v42, %v267_v38  ;;  %v312_v38 = vld [vmem:[%s970_s4 + $0x2] sm:$0x1]  ;;  %v316_v41 = vld [vmem:[%s970_s4 + $0x3] sm:$0x1] }
  0xd2   :  { %483 = vmatpush.msra.mxu3 %v458_v13 }
  0xd3   :  { %v277_v47 = vrot.slane %v276_v43, 2  ;;  %534 = vpush %v269_v44  ;;  %v322_v44 = vstv %s871_s0 }
  0xd4   :  { %484 = vmatpush.msra.mxu3 %v457_v15 }
  0xd5   :  { %v278_v48 = vadd.f32 %v277_v47, %v276_v43  ;;  %v321_v43 = vld [vmem:[%s970_s4 + $0x5] sm:$0x1]  ;;  %v326_v47 = vld [vmem:[%s970_s4 + $0x6] sm:$0x1] }
  0xd6   :  { %v323_v51 = vmul.f32 %v322_v44, %v321_v43 }
  0xd7   :  { %v279_v50 = vrot.slane %v278_v48, 1 }
  0xd9   :  { %v280_v52 = vadd.f32 %v279_v50, %v278_v48  ;;  %v327_v48 = vstv %s879_s21 }
  0xda   :  { %v328_v55 = vmul.f32 %v327_v48, %v326_v47 }
  0xdb   :  { %536 = vpush %v280_v52  ;;  %v331_v52 = vld [vmem:[%s970_s4 + $0x7] sm:$0x1] }
  0xdc   :  { %538 = vpush %v291_v53  ;;  %v332_v53 = vstv %s890_s29 }
  0xdd   :  { %540 = vpush %v302_v54  ;;  %v333_v59 = vmul.f32 %v332_v53, %v331_v52 }
 0x104   :  { %s535_s27 = spop %534 }
 0x105   :  { %s271_s10 = smul.f32 0.00048828125, %s535_s27 }
 0x107   :  { %v306_v33 = vstv %s271_s10 }
 0x108   :  { %v307_v39 = vmul.f32 %v306_v33, %v305_v32 }
 0x10c   :  { %s537_s28 = spop %536 }
 0x10d   :  { %s282_s17 = smul.f32 0.00048828125, %s537_s28  ;;  %s539_s3 = spop %538 }
 0x10e   :  { %s293_s19 = smul.f32 0.00048828125, %s539_s3  ;;  %s541_s20 = spop %540 }
 0x10f   :  { %v309_v37 = vstv %s282_s17  ;;  %s304_s23 = smul.f32 0.00048828125, %s541_s20  ;;  %s531_s17 = sld [smem:[#allocation6 + $0x4]] }
 0x110   :  { %v310_v40 = vmul.f32 %v309_v37, %v308_v34  ;;  %v313_v4 = vstv %s293_s19 }
 0x111   :  { %v317_v42 = vstv %s304_s23  ;;  %v314_v46 = vmul.f32 %v313_v4, %v312_v38 }
 0x112   :  { %v311_v45 = vadd.f32 %v310_v40, %v307_v39  ;;  %v318_v50 = vmul.f32 %v317_v42, %v316_v41 }
 0x114   :  { %v315_v49 = vadd.f32 %v314_v46, %v311_v45 }
 0x115   :  { %v342_v61 = vstv %s531_s17 }
 0x116   :  { %v319_v54 = vadd.f32 %v318_v50, %v315_v49  ;;  %v343_v1 = vmul.f32 %v342_v61, %v341_v60 }
 0x118   :  { %v324_v58 = vadd.f32 %v323_v51, %v319_v54 }
 0x11a   :  { %v329_v62 = vadd.f32 %v328_v55, %v324_v58 }
 0x11c   :  { %v334_v0 = vadd.f32 %v333_v59, %v329_v62 }
 0x11e   :  { %v339_v2 = vadd.f32 %v338_v63, %v334_v0 }
 0x120   :  { %v344_v5 = vadd.f32 %v343_v1, %v339_v2 }
 0x122   :  { %v346_v6 = vadd.f32 %v345_v3, %v344_v5 }
 0x124   :  { %v347_v7 = vmax.f32 %v346_v6, 0.0 }
 0x126   :  { %381 = vmatmul.f32.vlgmr.msra.gmra.mxu0 %v347_v7  ;;  %419 = vmatmul.f32.vlgmr.msra.gmra.mxu1 %v347_v7 }
 0x1a3   :  { %v382_v19 = vpop.f32.mrf.mxu0  ;;  %v420_v20 = vpop.f32.mrf.mxu1 }
 0x1a4   :  { %v383_v21 = vadd.f32 %v382_v19, %v364_v17  ;;  %v421_v22 = vadd.f32 %v420_v20, %v402_v18 }
 0x1a6   :  { %v385_v23 = vmax.f32 %v383_v21, 0.0  ;;  %v423_v16 = vmax.f32 %v421_v22, 0.0 }
 0x1a8   :  { %532 = vmatmul.msk.f32.vlgmr.msra.gmra.mxu2 %vm433_vm8, %v385_v23  ;;  %533 = vmatmul.msk.f32.vlgmr.msra.gmra.mxu3 %vm433_vm8, %v423_v16 }
 0x22b   :  { %v454_v26 = vpop.f32.mrf.mxu2  ;;  %v486_v27 = vpop.f32.mrf.mxu3 }
 0x22c   :  { %v455_v9 = vadd.f32 %v454_v26, %v432_v24  ;;  %v487_v28 = vadd.f32 %v486_v27, %v465_v25 }
 0x22e   :  { %508 = vst.msk [vmem:[%s981_s15] sm:$0x1] %vm507_vm9, %v487_v28  ;;  %v489_v29 = vmul.f32 %v455_v9, %v455_v9 }
 0x230   :  { %v491_v30 = vsel %vm490_vm10, %v489_v29, 0.0 }
 0x231   :  { %492 = vadd.xlane.f32.xlu2 %v491_v30 }
 0x2a4   :  { %v493_v31 = vpop.xlane.xlu2 %492 }
 0x2a5   :  { %v494_v12 = vadd.f32 1e-12, %v493_v31 }
 0x2a7   :  { %551 = vrsqrt.f32 %v494_v12  ;;  %vm501_vm12 = vweird.f32 %v494_v12 }
 0x2ad   :  { %v552_v32 = vpop.eup %551 }
 0x2ae   :  { %v496_v33 = vmul.f32 %v552_v32, %v494_v12  ;;  %vm502_vm11 = vweird.f32 %v552_v32 }
 0x2af   :  { %vm503_vm13 = vmor %vm501_vm12, %vm502_vm11 }
 0x2b0   :  { %v497_v34 = vmul.f32 %v552_v32, %v496_v33 }
 0x2b2   :  { %v498_v35 = vmul.f32 0.5, %v497_v34 }
 0x2b4   :  { %v499_v36 = vsub.f32 1.5, %v498_v35 }
 0x2b6   :  { %v500_v37 = vmul.f32 %v552_v32, %v499_v36 }
 0x2b8   :  { %v504_v38 = vsel %vm503_vm13, %v552_v32, %v500_v37 }
 0x2b9   :  { %v505_v39 = vmul.f32 %v504_v38, %v455_v9 }
 0x2bb   :  { %506 = vst.msk [vmem:[%s980_s14] sm:$0x1] %vm490_vm10, %v505_v39 }
 0x2bc   :  { %517 = vsyncpa [#allocation3], 1 }
 0x2bd   :  { %518 = vsyncpa [#allocation5], 1 }

// kernel: odometry_forward.8
= control target key start
LH: loop header
LB: loop body
LE: loop exit
PB: predicated region body
PF: predicated region fallthrough
CT: control target
= control target key end

     0   :  { %21 = vsyncpa [#allocation3], 0  ;;  %s1213_s0 = inlined_call_operand.vmem [shape: f32[1,4], index: 0, kind: input, shape index: {}]   ;;  %s1214_s1 = inlined_call_operand.vmem [shape: f32[1,3], index: 1, kind: input, shape index: {}]   ;;  %s1215_s2 = inlined_call_operand.vmem [shape: f32[1,5], index: 2, kind: input, shape index: {}]   ;;  %s1216_s3 = inlined_call_operand.vmem [shape: f32[1,3,16,128], index: 3, kind: input, shape index: {}]   ;;  %s1217_s4 = inlined_call_operand.vmem [shape: f32[10,256], index: 4, kind: input, shape index: {}]   ;;  %s1218_s5 = inlined_call_operand.vmem [shape: f32[1,256], index: 5, kind: input, shape index: {}]   ;;  %s1219_s6 = inlined_call_operand.vmem [shape: f32[256,100], index: 6, kind: input, shape index: {}]   ;;  %s1220_s7 = inlined_call_operand.vmem [shape: f32[1,100], index: 7, kind: input, shape index: {}]   ;;  %s1221_s8 = inlined_call_operand.vmem [shape: f32[100,4], index: 8, kind: input, shape index: {}]   ;;  %s1222_s9 = inlined_call_operand.vmem [shape: f32[1,4], index: 9, kind: input, shape index: {}]   ;;  %s1223_s10 = inlined_call_operand.vmem [shape: f32[256,100], index: 10, kind: input, shape index: {}]   ;;  %s1224_s11 = inlined_call_operand.vmem [shape: f32[1,100], index: 11, kind: input, shape index: {}]   ;;  %s1225_s12 = inlined_call_operand.vmem [shape: f32[100,3], index: 12, kind: input, shape index: {}]   ;;  %s1226_s13 = inlined_call_operand.vmem [shape: f32[1,3], index: 13, kind: input, shape index: {}]   ;;  %s1227_s14 = inlined_call_operand.vmem [shape: f32[1,4], index: 14, kind: output, shape index: {0}]   ;;  %s1228_s15 = inlined_call_operand.vmem [shape: f32[1,3], index: 15, kind: output, shape index: {1}]  }
   0x1   :  { %22 = vsyncpa [#allocation5], 0  ;;  %s37_s20 = sshll.u32 %s1214_s1, 4  ;;  %s28_s23 = sshll.u32 %s1213_s0, 4  ;;  %s38_s20 = int_to_ptr.vmem [resolvable:$true] %s37_s20  ;;  %s29_s23 = int_to_ptr.vmem [resolvable:$true] %s28_s23 }
   0x2   :  { %s705_s24 = smov [#allocation4]   ;;  %s706_s25 = smov [#allocation2]  }
   0x3   :  { %40 = dma.vmem_to_smem %s38_s20, 16, %s705_s24, [#allocation5]  }
   0x4   :  { %31 = dma.vmem_to_smem %s29_s23, 16, %s706_s25, [#allocation3]  }
   0x5   :  { %s46_s28 = sshll.u32 %s1215_s2, 4  ;;  %s707_s29 = smov [#allocation6]   ;;  %s47_s28 = int_to_ptr.vmem [resolvable:$true] %s46_s28 }
   0x6   :  { %49 = dma.vmem_to_smem %s47_s28, 16, %s707_s29, [#allocation5]  }
   0x7   :  { %701 = dma.done.wait [#allocation3], 16  }
   0x8   :  { %702 = vsyncadd [#allocation3], 4294967280 }
   0x9   :  { %703 = dma.done.wait [#allocation5], 32  }
   0xa   :  { %704 = vsyncadd [#allocation5], 4294967264 }
   0xb   :  { %84 = sfence }
   0xc   :  { %s85_s1 = sld [smem:[#allocation2]]  ;;  %v96_v0 = vld [vmem:[%s1216_s3] sm:$0xff]  ;;  %v97_v1 = vld [vmem:[%s1216_s3 + $0x8] sm:$0xff]  ;;  %v624_v2 = vld [vmem:[%s1216_s3 + $0x10] sm:$0xff]  ;;  %vm527_vm8 = vcmask 1043456   ;;  %vm523_vm9 = vcmask 818176  }
   0xd   :  { %s621_s30 = sld [smem:[#allocation2 + $0x1]]  ;;  %v625_v3 = vld [vmem:[%s1216_s3 + $0x18] sm:$0xff]  ;;  %v626_v5 = vld [vmem:[%s1216_s3 + $0x20] sm:$0xff]  ;;  %v627_v6 = vld [vmem:[%s1216_s3 + $0x28] sm:$0xff]  ;;  %vm592_vm10 = vcmask 24576   ;;  %vm609_vm11 = vcmask 16384  }
   0xe   :  { %s797_s0 = sld [smem:[#allocation2 + $0x2]] }
   0xf   :  { %s799_s16 = sld [smem:[#allocation2 + $0x3]] }
  0x10   :  { %s867_s19 = sld [smem:[#allocation4 + $0x2]] }
  0x11   :  { %s1083_s23 = sld [smem:[#allocation6 + $0x2]] }
  0x12   :  { %s89_s2 = smul.f32 %s85_s1, %s85_s1  ;;  %v813_v4 = vstv %s85_s1  ;;  %s1091_s29 = sld [smem:[#allocation6 + $0x3]] }
  0x13   :  { %s90_s25 = smul.f32 %s621_s30, %s621_s30  ;;  %s104_s17 = ssub.f32 0.0, %s621_s30  ;;  %v119_v7 = vmul.f32 %v813_v4, %v96_v0  ;;  %v120_v8 = vmul.f32 %v813_v4, %v97_v1  ;;  %v129_v10 = vmul.f32 %v624_v2, %v813_v4  ;;  %v130_v11 = vmul.f32 %v625_v3, %v813_v4 }
  0x14   :  { %s92_s18 = smul.f32 %s797_s0, %s797_s0  ;;  %v826_v9 = vstv %s797_s0  ;;  %v830_v12 = vstv %s621_s30  ;;  %v140_v31 = vmul.f32 %v626_v5, %v813_v4  ;;  %v141_v34 = vmul.f32 %v627_v6, %v813_v4 }
  0x15   :  { %s91_s1 = sadd.f32 %s90_s25, %s89_s2  ;;  %v105_v13 = vstv %s104_s17  ;;  %v109_v14 = vmul.f32 %v624_v2, %v826_v9  ;;  %v110_v15 = vmul.f32 %v625_v3, %v826_v9  ;;  %v113_v16 = vstv %s799_s16  ;;  %s94_s30 = smul.f32 %s799_s16, %s799_s16 }
  0x16   :  { %v106_v17 = vmul.f32 %v105_v13, %v96_v0  ;;  %v107_v18 = vmul.f32 %v105_v13, %v97_v1  ;;  %v114_v19 = vmul.f32 %v626_v5, %v113_v16  ;;  %v115_v20 = vmul.f32 %v627_v6, %v113_v16  ;;  %s858_s16 = sld [smem:[#allocation4]] }
  0x17   :  { %v121_v21 = vmul.f32 %v626_v5, %v826_v9  ;;  %v122_v22 = vmul.f32 %v627_v6, %v826_v9  ;;  %v125_v23 = vmul.f32 %v624_v2, %v113_v16  ;;  %v126_v24 = vmul.f32 %v625_v3, %v113_v16  ;;  %s93_s3 = sadd.f32 %s92_s18, %s91_s1 }
  0x18   :  { %v111_v25 = vsub.f32 %v106_v17, %v109_v14  ;;  %v112_v26 = vsub.f32 %v107_v18, %v110_v15  ;;  %v131_v27 = vmul.f32 %v113_v16, %v96_v0  ;;  %v132_v28 = vmul.f32 %v113_v16, %v97_v1  ;;  %s865_s2 = sld [smem:[#allocation4 + $0x1]] }
  0x19   :  { %v123_v29 = vadd.f32 %v121_v21, %v119_v7  ;;  %v124_v30 = vadd.f32 %v122_v22, %v120_v8  ;;  %v136_v35 = vmul.f32 %v626_v5, %v830_v12  ;;  %v137_v36 = vmul.f32 %v627_v6, %v830_v12  ;;  %s95_s0 = sadd.f32 %s94_s30, %s93_s3 }
  0x1a   :  { %v116_v32 = vsub.f32 %v111_v25, %v114_v19  ;;  %v117_v33 = vsub.f32 %v112_v26, %v115_v20  ;;  %v142_v37 = vmul.f32 %v624_v2, %v830_v12  ;;  %v143_v38 = vmul.f32 %v625_v3, %v830_v12 }
  0x1b   :  { %v127_v39 = vsub.f32 %v123_v29, %v125_v23  ;;  %v128_v40 = vsub.f32 %v124_v30, %v126_v24  ;;  %v133_v41 = vadd.f32 %v131_v27, %v129_v10  ;;  %v134_v42 = vadd.f32 %v132_v28, %v130_v11 }
  0x1c   :  { %v144_v43 = vadd.f32 %v142_v37, %v140_v31  ;;  %v146_v44 = vmul.f32 %v826_v9, %v96_v0  ;;  %v150_v45 = vsub.f32 0.0, %v116_v32  ;;  %v151_v46 = vsub.f32 0.0, %v117_v33 }
  0x1d   :  { %v145_v47 = vadd.f32 %v143_v38, %v141_v34  ;;  %v147_v48 = vmul.f32 %v826_v9, %v97_v1  ;;  %v138_v49 = vsub.f32 %v133_v41, %v136_v35  ;;  %v139_v50 = vsub.f32 %v134_v42, %v137_v36 }
  0x1e   :  { %v154_v51 = vmul.f32 %v127_v39, %v813_v4  ;;  %v166_v52 = vstv %s95_s0  ;;  %v148_v53 = vsub.f32 %v144_v43, %v146_v44  ;;  %v152_v54 = vmul.f32 %v150_v45, %v830_v12 }
  0x1f   :  { %v153_v55 = vmul.f32 %v151_v46, %v830_v12  ;;  %v155_v56 = vmul.f32 %v128_v40, %v813_v4  ;;  %657 = vrcp.f32 %v166_v52  ;;  %v187_v57 = vmul.f32 %v150_v45, %v826_v9 }
  0x20   :  { %v188_v58 = vmul.f32 %v151_v46, %v826_v9  ;;  %v149_v59 = vsub.f32 %v145_v47, %v147_v48  ;;  %v189_v60 = vmul.f32 %v127_v39, %v113_v16  ;;  %v190_v61 = vmul.f32 %v128_v40, %v113_v16 }
  0x21   :  { %v158_v62 = vmul.f32 %v138_v49, %v113_v16  ;;  %v159_v63 = vmul.f32 %v139_v50, %v113_v16  ;;  %v156_v0 = vadd.f32 %v154_v51, %v152_v54  ;;  %v157_v1 = vadd.f32 %v155_v56, %v153_v55 }
  0x22   :  { %v162_v2 = vmul.f32 %v148_v53, %v826_v9  ;;  %v193_v3 = vmul.f32 %v138_v49, %v813_v4  ;;  %v191_v5 = vadd.f32 %v189_v60, %v187_v57  ;;  %v192_v6 = vadd.f32 %v190_v61, %v188_v58 }
  0x23   :  { %v194_v7 = vmul.f32 %v139_v50, %v813_v4  ;;  %v207_v8 = vmul.f32 %v150_v45, %v113_v16  ;;  %v163_v10 = vmul.f32 %v149_v59, %v826_v9  ;;  %vm172_vm0 = vweird.f32 %v166_v52 }
  0x24   :  { %v208_v11 = vmul.f32 %v151_v46, %v113_v16  ;;  %v209_v13 = vmul.f32 %v127_v39, %v826_v9  ;;  %v176_v15 = vand.u32 2147483647, %v166_v52  ;;  %v210_v17 = vmul.f32 %v128_v40, %v826_v9 }
  0x25   :  { %v658_v14 = vpop.eup %657  ;;  %v213_v18 = vmul.f32 %v138_v49, %v830_v12  ;;  %v214_v19 = vmul.f32 %v139_v50, %v830_v12  ;;  %v178_v21 = vand.u32 2147483648, %v166_v52  ;;  %v197_v22 = vmul.f32 %v148_v53, %v830_v12 }
  0x26   :  { %v168_v20 = vmul.f32 %v658_v14, %v166_v52  ;;  %v198_v23 = vmul.f32 %v149_v59, %v830_v12  ;;  %v195_v16 = vadd.f32 %v193_v3, %v191_v5  ;;  %v196_v24 = vadd.f32 %v194_v7, %v192_v6 }
  0x27   :  { %v211_v25 = vsub.f32 %v207_v8, %v209_v13  ;;  %v212_v26 = vsub.f32 %v208_v11, %v210_v17  ;;  %vm173_vm1 = vweird.f32 %v658_v14  ;;  %v217_v9 = vmul.f32 %v148_v53, %v813_v4 }
  0x28   :  { %v169_v27 = vsub.f32 1.0, %v168_v20  ;;  %v218_v28 = vmul.f32 %v149_v59, %v813_v4  ;;  %v160_v29 = vsub.f32 %v156_v0, %v158_v62  ;;  %v161_v30 = vsub.f32 %v157_v1, %v159_v63  ;;  %vm174_vm2 = vmor %vm172_vm0, %vm173_vm1 }
  0x29   :  { %v215_v31 = vadd.f32 %v213_v18, %v211_v25  ;;  %v216_v12 = vadd.f32 %v214_v19, %v212_v26  ;;  %vm177_vm3 = vcmp.eq.f32.partialorder %v176_v15, 8.507059e+37  ;;  %v179_v33 = vor.u32 1.1754944e-38, %v178_v21 }
  0x2a   :  { %v170_v32 = vmul.f32 %v658_v14, %v169_v27  ;;  %v199_v34 = vsub.f32 %v195_v16, %v197_v22  ;;  %v200_v36 = vsub.f32 %v196_v24, %v198_v23  ;;  %v164_v39 = vadd.f32 %v162_v2, %v160_v29 }
  0x2b   :  { %v219_v37 = vadd.f32 %v217_v9, %v215_v31  ;;  %v220_v38 = vadd.f32 %v218_v28, %v216_v12  ;;  %v165_v40 = vadd.f32 %v163_v10, %v161_v30  ;;  %v184_v42 = vstv %s858_s16  ;;  %s1070_s16 = sld [smem:[#allocation6]] }
  0x2c   :  { %v171_v35 = vadd.f32 %v658_v14, %v170_v32  ;;  %v204_v43 = vstv %s865_s2  ;;  %v224_v44 = vstv %s867_s19  ;;  %s1121_s19 = sld [smem:[#allocation6 + $0x4]] }
  0x2e   :  { %v175_v4 = vsel %vm174_vm2, %v658_v14, %v171_v35 }
  0x2f   :  { %v180_v41 = vsel %vm177_vm3, %v179_v33, %v175_v4 }
  0x30   :  { %v201_v45 = vmul.f32 %v199_v34, %v180_v41  ;;  %v202_v46 = vmul.f32 %v200_v36, %v180_v41  ;;  %v221_v47 = vmul.f32 %v219_v37, %v180_v41  ;;  %v222_v48 = vmul.f32 %v220_v38, %v180_v41 }
  0x31   :  { %v181_v49 = vmul.f32 %v180_v41, %v164_v39  ;;  %v182_v50 = vmul.f32 %v180_v41, %v165_v40 }
  0x32   :  { %v205_v51 = vadd.f32 %v204_v43, %v201_v45  ;;  %v206_v52 = vadd.f32 %v204_v43, %v202_v46  ;;  %v225_v53 = vadd.f32 %v224_v44, %v221_v47  ;;  %v226_v54 = vadd.f32 %v224_v44, %v222_v48 }
  0x33   :  { %v185_v55 = vadd.f32 %v184_v42, %v181_v49  ;;  %v186_v56 = vadd.f32 %v184_v42, %v182_v50 }
  0x34   :  { %v230_v57 = vmul.f32 %v206_v52, %v206_v52  ;;  %v233_v58 = vmul.f32 %v225_v53, %v225_v53  ;;  %v283_v59 = vadd.f32 %v206_v52, %v205_v51  ;;  %v234_v60 = vmul.f32 %v226_v54, %v226_v54 }
  0x35   :  { %v227_v61 = vmul.f32 %v185_v55, %v185_v55  ;;  %v228_v62 = vmul.f32 %v186_v56, %v186_v56  ;;  %v229_v63 = vmul.f32 %v205_v51, %v205_v51  ;;  %v294_v5 = vadd.f32 %v226_v54, %v225_v53 }
  0x36   :  { %284 = vadd.xlane.f32.xlu1 %v283_v59  ;;  %v272_v28 = vadd.f32 %v186_v56, %v185_v55  ;;  %v371_v55 = vld [vmem:[%s1219_s6 + $0x78] sm:$0xff]  ;;  %v370_v59 = vld [vmem:[%s1219_s6 + $0x70] sm:$0xff] }
  0x37   :  { %v231_v0 = vadd.f32 %v229_v63, %v227_v61  ;;  %v232_v1 = vadd.f32 %v230_v57, %v228_v62  ;;  %v387_v56 = vld [vmem:[%s1219_s6 + $0xf8] sm:$0xff]  ;;  %394 = vmatpush.msra.mxu0 %v371_v55  ;;  %v449_v61 = vld [vmem:[%s1223_s10 + $0x70] sm:$0xff]  ;;  %v369_v63 = vld [vmem:[%s1219_s6 + $0x68] sm:$0xff] }
  0x38   :  { %v450_v57 = vld [vmem:[%s1223_s10 + $0x78] sm:$0xff]  ;;  %414 = vmatpush.msra.mxu1 %v387_v56  ;;  %v465_v62 = vld [vmem:[%s1223_s10 + $0xf0] sm:$0xff]  ;;  %v521_v55 = vld [vmem:[%s1221_s8 + $0x60] sm:$0xf] }
  0x39   :  { %v235_v2 = vadd.f32 %v233_v58, %v231_v0  ;;  %v236_v3 = vadd.f32 %v234_v60, %v232_v1  ;;  %v466_v58 = vld [vmem:[%s1223_s10 + $0xf8] sm:$0xff]  ;;  %v386_v60 = vld [vmem:[%s1219_s6 + $0xf0] sm:$0xff]  ;;  %468 = vmatpush.msra.mxu2 %v450_v57  ;;  %395 = vmatpush.msra.mxu0 %v370_v59  ;;  %v385_v0 = vld [vmem:[%s1219_s6 + $0xe8] sm:$0xff] }
  0x3a   :  { %488 = vmatpush.msra.mxu3 %v466_v58  ;;  %415 = vmatpush.msra.mxu1 %v386_v60  ;;  %v448_v1 = vld [vmem:[%s1223_s10 + $0x68] sm:$0xff]  ;;  %v520_v56 = vld [vmem:[%s1221_s8 + $0x58] sm:$0xff]  ;;  %v563_v57 = vld [vmem:[%s1225_s12 + $0x60] sm:$0xf] }
  0x3b   :  { %659 = vrsqrt.f32 %v235_v2  ;;  %vm244_vm4 = vcmp.eq.f32.partialorder %v235_v2, inf  ;;  %v247_v20 = vand.u32 2147483648, %v235_v2  ;;  %vm246_vm5 = vcmp.eq.f32.partialorder %v235_v2, 0.0  ;;  %469 = vmatpush.msra.mxu2 %v449_v61  ;;  %396 = vmatpush.msra.mxu0 %v369_v63  ;;  %v562_v58 = vld [vmem:[%s1225_s12 + $0x58] sm:$0xff]  ;;  %v519_v60 = vld [vmem:[%s1221_s8 + $0x50] sm:$0xff] }
  0x3c   :  { %661 = vrsqrt.f32 %v236_v3  ;;  %vm256_vm6 = vcmp.eq.f32.partialorder %v236_v3, inf  ;;  %v259_v23 = vand.u32 2147483648, %v236_v3  ;;  %vm258_vm7 = vcmp.eq.f32.partialorder %v236_v3, 0.0  ;;  %489 = vmatpush.msra.mxu3 %v465_v62  ;;  %416 = vmatpush.msra.mxu1 %v385_v0  ;;  %v305_v59 = vld [vmem:[%s1217_s4] ss:$8 sm:$0x3] }
  0x3d   :  { %470 = vmatpush.msra.mxu2 %v448_v1  ;;  %v630_v62 = vld [vmem:[%s1217_s4 + $0x1] ss:$8 sm:$0x3]  ;;  %v561_v63 = vld [vmem:[%s1225_s12 + $0x50] sm:$0xff] }
  0x3e   :  { %295 = vadd.xlane.f32.xlu1 %v294_v5  ;;  %v384_v5 = vld [vmem:[%s1219_s6 + $0xe0] sm:$0xff]  ;;  %v518_v0 = vld [vmem:[%s1221_s8 + $0x48] sm:$0xff] }
  0x3f   :  { %417 = vmatpush.msra.mxu1 %v384_v5 }
  0x41   :  { %v660_v6 = vpop.eup %659 }
  0x42   :  { %v662_v7 = vpop.eup %661  ;;  %v238_v8 = vmul.f32 %v660_v6, %v235_v2 }
  0x43   :  { %v250_v10 = vmul.f32 %v662_v7, %v236_v3 }
  0x44   :  { %v239_v11 = vmul.f32 %v660_v6, %v238_v8  ;;  %v367_v8 = vld [vmem:[%s1219_s6 + $0x58] sm:$0xff] }
  0x45   :  { %v251_v13 = vmul.f32 %v662_v7, %v250_v10  ;;  %v383_v10 = vld [vmem:[%s1219_s6 + $0xd8] sm:$0xff] }
  0x46   :  { %v240_v14 = vmul.f32 0.5, %v239_v11  ;;  %v446_v11 = vld [vmem:[%s1223_s10 + $0x58] sm:$0xff]  ;;  %418 = vmatpush.msra.mxu1 %v383_v10  ;;  %v517_v10 = vld [vmem:[%s1221_s8 + $0x40] sm:$0xff] }
  0x47   :  { %v252_v15 = vmul.f32 0.5, %v251_v13  ;;  %v462_v13 = vld [vmem:[%s1223_s10 + $0xd8] sm:$0xff] }
  0x48   :  { %v241_v17 = vsub.f32 1.5, %v240_v14  ;;  %v366_v14 = vld [vmem:[%s1219_s6 + $0x50] sm:$0xff] }
  0x49   :  { %v253_v18 = vsub.f32 1.5, %v252_v15  ;;  %v382_v15 = vld [vmem:[%s1219_s6 + $0xd0] sm:$0xff] }
  0x4a   :  { %v242_v19 = vmul.f32 %v660_v6, %v241_v17  ;;  %v447_v6 = vld [vmem:[%s1223_s10 + $0x60] sm:$0xff]  ;;  %v445_v17 = vld [vmem:[%s1223_s10 + $0x50] sm:$0xff]  ;;  %419 = vmatpush.msra.mxu1 %v382_v15 }
  0x4b   :  { %v254_v21 = vmul.f32 %v662_v7, %v253_v18  ;;  %471 = vmatpush.msra.mxu2 %v447_v6  ;;  %v463_v7 = vld [vmem:[%s1223_s10 + $0xe0] sm:$0xff]  ;;  %v461_v18 = vld [vmem:[%s1223_s10 + $0xd0] sm:$0xff] }
  0x4c   :  { %v243_v22 = vmul.f32 %v242_v19, %v235_v2  ;;  %v365_v19 = vld [vmem:[%s1219_s6 + $0x48] sm:$0xff]  ;;  %v559_v15 = vld [vmem:[%s1225_s12 + $0x40] sm:$0xff] }
  0x4d   :  { %v255_v16 = vmul.f32 %v254_v21, %v236_v3  ;;  %472 = vmatpush.msra.mxu2 %v446_v11  ;;  %v444_v21 = vld [vmem:[%s1223_s10 + $0x48] sm:$0xff] }
  0x4e   :  { %v245_v24 = vsel %vm244_vm4, %v235_v2, %v243_v22  ;;  %v464_v2 = vld [vmem:[%s1223_s10 + $0xe8] sm:$0xff] }
  0x4f   :  { %v248_v25 = vsel %vm246_vm5, %v247_v20, %v245_v24  ;;  %v257_v26 = vsel %vm256_vm6, %v236_v3, %v255_v16  ;;  %490 = vmatpush.msra.mxu3 %v464_v2  ;;  %v368_v3 = vld [vmem:[%s1219_s6 + $0x60] sm:$0xff]  ;;  %473 = vmatpush.msra.mxu2 %v445_v17  ;;  %v381_v20 = vld [vmem:[%s1219_s6 + $0xc8] sm:$0xff] }
  0x50   :  { %v260_v27 = vsel %vm258_vm7, %v259_v23, %v257_v26  ;;  %397 = vmatpush.msra.mxu0 %v368_v3  ;;  %v460_v22 = vld [vmem:[%s1223_s10 + $0xc8] sm:$0xff]  ;;  %420 = vmatpush.msra.mxu1 %v381_v20  ;;  %v364_v23 = vld [vmem:[%s1219_s6 + $0x40] sm:$0xff]  ;;  %v363_v26 = vld [vmem:[%s1219_s6 + $0x38] sm:$0xff] }
  0x51   :  { %v261_v9 = vadd.f32 %v260_v27, %v248_v25  ;;  %491 = vmatpush.msra.mxu3 %v463_v7  ;;  %474 = vmatpush.msra.mxu2 %v444_v21  ;;  %v380_v16 = vld [vmem:[%s1219_s6 + $0xc0] sm:$0xff]  ;;  %v379_v27 = vld [vmem:[%s1219_s6 + $0xb8] sm:$0xff]  ;;  %v560_v3 = vld [vmem:[%s1225_s12 + $0x48] sm:$0xff] }
  0x52   :  { %398 = vmatpush.msra.mxu0 %v367_v8  ;;  %v443_v24 = vld [vmem:[%s1223_s10 + $0x40] sm:$0xff]  ;;  %421 = vmatpush.msra.mxu1 %v380_v16 }
  0x53   :  { %262 = vadd.xlane.f32.xlu0 %v261_v9  ;;  %492 = vmatpush.msra.mxu3 %v462_v13  ;;  %v459_v25 = vld [vmem:[%s1223_s10 + $0xc0] sm:$0xff]  ;;  %v442_v9 = vld [vmem:[%s1223_s10 + $0x38] sm:$0xff] }
  0x54   :  { %399 = vmatpush.msra.mxu0 %v366_v14  ;;  %475 = vmatpush.msra.mxu2 %v443_v24  ;;  %v631_v2 = vld [vmem:[%s1217_s4 + $0x2] ss:$8 sm:$0x3]  ;;  %v632_v8 = vld [vmem:[%s1217_s4 + $0x3] ss:$8 sm:$0x3]  ;;  %v326_v14 = vstv %s1070_s16 }
  0x55   :  { %493 = vmatpush.msra.mxu3 %v461_v18  ;;  %422 = vmatpush.msra.mxu1 %v379_v27  ;;  %v633_v13 = vld [vmem:[%s1217_s4 + $0x5] ss:$8 sm:$0x3]  ;;  %v635_v20 = vld [vmem:[%s1217_s4 + $0x6] ss:$8 sm:$0x3]  ;;  %v338_v27 = vstv %s1083_s23 }
  0x56   :  { %400 = vmatpush.msra.mxu0 %v365_v19  ;;  %476 = vmatpush.msra.mxu2 %v442_v9  ;;  %v516_v19 = vld [vmem:[%s1221_s8 + $0x38] sm:$0xff]  ;;  %v327_v24 = vmul.f32 %v633_v13, %v326_v14 }
  0x57   :  { %494 = vmatpush.msra.mxu3 %v460_v22  ;;  %v558_v22 = vld [vmem:[%s1225_s12 + $0x38] sm:$0xff] }
  0x58   :  { %401 = vmatpush.msra.mxu0 %v364_v23 }
  0x59   :  { %495 = vmatpush.msra.mxu3 %v459_v25  ;;  %v515_v25 = vld [vmem:[%s1221_s8 + $0x30] sm:$0xff] }
  0x5a   :  { %402 = vmatpush.msra.mxu0 %v363_v26  ;;  %v637_v26 = vld [vmem:[%s1217_s4 + $0x7] ss:$8 sm:$0x3] }
  0x5b   :  { %273 = vadd.xlane.f32.xlu0 %v272_v28  ;;  %v458_v28 = vld [vmem:[%s1223_s10 + $0xb8] sm:$0xff] }
  0x5c   :  { %496 = vmatpush.msra.mxu3 %v458_v28 }
  0xa9   :  { %v285_v29 = vpop.xlane.xlu1 %284 }
  0xaa   :  { %v286_v31 = vrot.slane %v285_v29, 4 }
  0xac   :  { %v287_v35 = vadd.f32 %v286_v31, %v285_v29  ;;  %v362_v29 = vld [vmem:[%s1219_s6 + $0x30] sm:$0xff] }
  0xad   :  { %v441_v31 = vld [vmem:[%s1223_s10 + $0x30] sm:$0xff]  ;;  %403 = vmatpush.msra.mxu0 %v362_v29  ;;  %v514_v29 = vld [vmem:[%s1221_s8 + $0x28] sm:$0xff] }
  0xae   :  { %v288_v39 = vrot.slane %v287_v35, 2  ;;  %477 = vmatpush.msra.mxu2 %v441_v31  ;;  %v344_v31 = vstv %s1091_s29 }
  0xb0   :  { %v289_v45 = vadd.f32 %v288_v39, %v287_v35  ;;  %v456_v35 = vld [vmem:[%s1223_s10 + $0xa8] sm:$0xff]  ;;  %v455_v39 = vld [vmem:[%s1223_s10 + $0xa0] sm:$0xff] }
  0xb1   :  { %v296_v30 = vpop.xlane.xlu1 %295 }
  0xb2   :  { %v297_v33 = vrot.slane %v296_v30, 4  ;;  %v290_v49 = vrot.slane %v289_v45, 1 }
  0xb4   :  { %v298_v37 = vadd.f32 %v297_v33, %v296_v30  ;;  %v291_v53 = vadd.f32 %v290_v49, %v289_v45  ;;  %v378_v30 = vld [vmem:[%s1219_s6 + $0xb0] sm:$0xff]  ;;  %v377_v33 = vld [vmem:[%s1219_s6 + $0xa8] sm:$0xff] }
  0xb5   :  { %423 = vmatpush.msra.mxu1 %v378_v30  ;;  %v437_v45 = vld [vmem:[%s1223_s10 + $0x10] sm:$0xff]  ;;  %v436_v49 = vld [vmem:[%s1223_s10 + $0x8] sm:$0xff] }
  0xb6   :  { %v299_v4 = vrot.slane %v298_v37, 2  ;;  %v639_v30 = vld [vmem:[%s1217_s4 + $0x10] ss:$8 sm:$0x3] }
  0xb7   :  { %424 = vmatpush.msra.mxu1 %v377_v33  ;;  %v513_v33 = vld [vmem:[%s1221_s8 + $0x20] sm:$0xff] }
  0xb8   :  { %v300_v46 = vadd.f32 %v299_v4, %v298_v37  ;;  %v376_v37 = vld [vmem:[%s1219_s6 + $0xa0] sm:$0xff]  ;;  %v375_v4 = vld [vmem:[%s1219_s6 + $0x98] sm:$0xff] }
  0xb9   :  { %425 = vmatpush.msra.mxu1 %v376_v37  ;;  %v345_v37 = vmul.f32 %v639_v30, %v344_v31 }
  0xba   :  { %v301_v51 = vrot.slane %v300_v46, 1 }
  0xbb   :  { %426 = vmatpush.msra.mxu1 %v375_v4  ;;  %v353_v4 = vld [vmem:[%s1218_s5] sm:$0x3] }
  0xbc   :  { %v302_v54 = vadd.f32 %v301_v51, %v300_v46  ;;  %v453_v46 = vld [vmem:[%s1223_s10 + $0x90] sm:$0xff]  ;;  %v356_v51 = vld [vmem:[%s1219_s6] sm:$0xff] }
  0xc6   :  { %v263_v12 = vpop.xlane.xlu0 %262 }
  0xc7   :  { %v264_v32 = vrot.slane %v263_v12, 4 }
  0xc9   :  { %v265_v34 = vadd.f32 %v264_v32, %v263_v12  ;;  %v457_v12 = vld [vmem:[%s1223_s10 + $0xb0] sm:$0xff]  ;;  %v361_v32 = vld [vmem:[%s1219_s6 + $0x28] sm:$0xff] }
  0xca   :  { %497 = vmatpush.msra.mxu3 %v457_v12  ;;  %404 = vmatpush.msra.mxu0 %v361_v32  ;;  %v339_v32 = vmul.f32 %v637_v26, %v338_v27 }
  0xcb   :  { %v266_v36 = vrot.slane %v265_v34, 2 }
  0xcc   :  { %498 = vmatpush.msra.mxu3 %v456_v35  ;;  %v350_v35 = vstv %s1121_s19 }
  0xcd   :  { %v267_v38 = vadd.f32 %v266_v36, %v265_v34  ;;  %v440_v34 = vld [vmem:[%s1223_s10 + $0x28] sm:$0xff]  ;;  %v360_v36 = vld [vmem:[%s1219_s6 + $0x20] sm:$0xff] }
  0xce   :  { %v274_v40 = vpop.xlane.xlu0 %273  ;;  %478 = vmatpush.msra.mxu2 %v440_v34  ;;  %405 = vmatpush.msra.mxu0 %v360_v36  ;;  %v641_v34 = vld [vmem:[%s1217_s4 + $0x11] ss:$8 sm:$0x3] }
  0xcf   :  { %v275_v41 = vrot.slane %v274_v40, 4  ;;  %v268_v42 = vrot.slane %v267_v38, 1  ;;  %499 = vmatpush.msra.mxu3 %v455_v39  ;;  %v351_v39 = vmul.f32 %v641_v34, %v350_v35 }
  0xd1   :  { %v276_v43 = vadd.f32 %v275_v41, %v274_v40  ;;  %v269_v44 = vadd.f32 %v268_v42, %v267_v38  ;;  %v439_v38 = vld [vmem:[%s1223_s10 + $0x20] sm:$0xff]  ;;  %v359_v40 = vld [vmem:[%s1219_s6 + $0x18] sm:$0xff] }
  0xd2   :  { %v438_v41 = vld [vmem:[%s1223_s10 + $0x18] sm:$0xff]  ;;  %479 = vmatpush.msra.mxu2 %v439_v38  ;;  %406 = vmatpush.msra.mxu0 %v359_v40 }
  0xd3   :  { %v277_v47 = vrot.slane %v276_v43, 2  ;;  %646 = vpush %v269_v44  ;;  %v454_v42 = vld [vmem:[%s1223_s10 + $0x98] sm:$0xff]  ;;  %v374_v44 = vld [vmem:[%s1219_s6 + $0x90] sm:$0xff] }
  0xd4   :  { %480 = vmatpush.msra.mxu2 %v438_v41  ;;  %500 = vmatpush.msra.mxu3 %v454_v42 }
  0xd5   :  { %v278_v48 = vadd.f32 %v277_v47, %v276_v43  ;;  %v358_v43 = vld [vmem:[%s1219_s6 + $0x10] sm:$0xff]  ;;  %v357_v47 = vld [vmem:[%s1219_s6 + $0x8] sm:$0xff]  ;;  %427 = vmatpush.msra.mxu1 %v374_v44 }
  0xd6   :  { %407 = vmatpush.msra.mxu0 %v358_v43  ;;  %481 = vmatpush.msra.mxu2 %v437_v45 }
  0xd7   :  { %v279_v50 = vrot.slane %v278_v48, 1  ;;  %501 = vmatpush.msra.mxu3 %v453_v46  ;;  %v512_v46 = vld [vmem:[%s1221_s8 + $0x18] sm:$0xff] }
  0xd8   :  { %408 = vmatpush.msra.mxu0 %v357_v47  ;;  %482 = vmatpush.msra.mxu2 %v436_v49  ;;  %v557_v47 = vld [vmem:[%s1225_s12 + $0x30] sm:$0xff]  ;;  %v556_v49 = vld [vmem:[%s1225_s12 + $0x28] sm:$0xff] }
  0xd9   :  { %v280_v52 = vadd.f32 %v279_v50, %v278_v48  ;;  %v373_v48 = vld [vmem:[%s1219_s6 + $0x88] sm:$0xff] }
  0xda   :  { %v452_v50 = vld [vmem:[%s1223_s10 + $0x88] sm:$0xff]  ;;  %428 = vmatpush.msra.mxu1 %v373_v48  ;;  %409 = vmatpush.msra.mxu0 %v356_v51  ;;  %v511_v48 = vld [vmem:[%s1221_s8 + $0x10] sm:$0xff]  ;;  %v555_v51 = vld [vmem:[%s1225_s12 + $0x20] sm:$0xff] }
  0xdb   :  { %648 = vpush %v280_v52  ;;  %v372_v52 = vld [vmem:[%s1219_s6 + $0x80] sm:$0xff]  ;;  %502 = vmatpush.msra.mxu3 %v452_v50  ;;  %s1075_s6 = sld [smem:[#allocation6 + $0x1]]  ;;  %v510_v50 = vld [vmem:[%s1221_s8 + $0x8] sm:$0xff] }
  0xdc   :  { %650 = vpush %v291_v53  ;;  %v435_v53 = vld [vmem:[%s1223_s10] sm:$0xff]  ;;  %429 = vmatpush.msra.mxu1 %v372_v52  ;;  %642 = vmatpush.msk.msrb.mxu0 %vm527_vm8, %v521_v55  ;;  %v552_v55 = vld [vmem:[%s1225_s12 + $0x8] sm:$0xff] }
  0xdd   :  { %652 = vpush %v302_v54  ;;  %v451_v54 = vld [vmem:[%s1223_s10 + $0x80] sm:$0xff]  ;;  %483 = vmatpush.msra.mxu2 %v435_v53  ;;  %v554_v53 = vld [vmem:[%s1225_s12 + $0x18] sm:$0xff] }
  0xde   :  { %503 = vmatpush.msra.mxu3 %v451_v54  ;;  %644 = vmatpush.msk.msrb.mxu1 %vm527_vm8, %v563_v57  ;;  %v509_v52 = vld [vmem:[%s1221_s8] sm:$0xff]  ;;  %v553_v54 = vld [vmem:[%s1225_s12 + $0x10] sm:$0xff] }
  0xdf   :  { %535 = vmatpush.msrb.mxu0 %v520_v56  ;;  %v551_v56 = vld [vmem:[%s1225_s12] sm:$0xff] }
  0xe0   :  { %575 = vmatpush.msrb.mxu1 %v562_v58  ;;  %v388_v57 = vld [vmem:[%s1220_s7] sm:$0x1] }
  0xe1   :  { %536 = vmatpush.msrb.mxu0 %v519_v60  ;;  %v332_v21 = vstv %s1075_s6 }
  0xe2   :  { %576 = vmatpush.msrb.mxu1 %v561_v63  ;;  %v333_v28 = vmul.f32 %v635_v20, %v332_v21  ;;  %v467_v63 = vld [vmem:[%s1224_s11] sm:$0x1] }
  0xe3   :  { %537 = vmatpush.msrb.mxu0 %v518_v0 }
  0xe4   :  { %577 = vmatpush.msrb.mxu1 %v560_v3 }
  0xe5   :  { %538 = vmatpush.msrb.mxu0 %v517_v10 }
  0xe6   :  { %578 = vmatpush.msrb.mxu1 %v559_v15 }
  0xe7   :  { %539 = vmatpush.msrb.mxu0 %v516_v19 }
  0xe8   :  { %579 = vmatpush.msrb.mxu1 %v558_v22 }
  0xe9   :  { %540 = vmatpush.msrb.mxu0 %v515_v25 }
  0xea   :  { %580 = vmatpush.msrb.mxu1 %v557_v47 }
  0xeb   :  { %541 = vmatpush.msrb.mxu0 %v514_v29 }
  0xec   :  { %581 = vmatpush.msrb.mxu1 %v556_v49 }
  0xed   :  { %542 = vmatpush.msrb.mxu0 %v513_v33 }
  0xee   :  { %582 = vmatpush.msrb.mxu1 %v555_v51 }
  0xef   :  { %543 = vmatpush.msrb.mxu0 %v512_v46 }
  0xf0   :  { %583 = vmatpush.msrb.mxu1 %v554_v53 }
  0xf1   :  { %544 = vmatpush.msrb.mxu0 %v511_v48 }
  0xf2   :  { %584 = vmatpush.msrb.mxu1 %v553_v54 }
  0xf3   :  { %545 = vmatpush.msrb.mxu0 %v510_v50 }
  0xf4   :  { %585 = vmatpush.msrb.mxu1 %v552_v55 }
  0xf5   :  { %546 = vmatpush.msrb.mxu0 %v509_v52 }
  0xf6   :  { %586 = vmatpush.msrb.mxu1 %v551_v56 }
 0x104   :  { %s1052_s24 = spop %646 }
 0x105   :  { %s271_s0 = smul.f32 0.00048828125, %s1052_s24 }
 0x107   :  { %v306_v61 = vstv %s271_s0 }
 0x108   :  { %v307_v5 = vmul.f32 %v306_v61, %v305_v59 }
 0x10c   :  { %s649_s28 = spop %648 }
 0x10d   :  { %s282_s1 = smul.f32 0.00048828125, %s649_s28  ;;  %s651_s2 = spop %650 }
 0x10e   :  { %s293_s21 = smul.f32 0.00048828125, %s651_s2  ;;  %s653_s22 = spop %652 }
 0x10f   :  { %v310_v1 = vstv %s282_s1  ;;  %s304_s26 = smul.f32 0.00048828125, %s653_s22 }
 0x110   :  { %v311_v6 = vmul.f32 %v630_v62, %v310_v1  ;;  %v315_v7 = vstv %s293_s21 }
 0x111   :  { %v320_v11 = vstv %s304_s26  ;;  %v316_v18 = vmul.f32 %v631_v2, %v315_v7 }
 0x112   :  { %v312_v17 = vadd.f32 %v311_v6, %v307_v5  ;;  %v321_v16 = vmul.f32 %v632_v8, %v320_v11  ;;  %v522_v6 = vld [vmem:[%s1222_s9] sm:$0x1] }
 0x113   :  { %v564_v11 = vld [vmem:[%s1226_s13] sm:$0x1] }
 0x114   :  { %v317_v23 = vadd.f32 %v316_v18, %v312_v17 }
 0x116   :  { %v322_v9 = vadd.f32 %v321_v16, %v317_v23 }
 0x118   :  { %v328_v12 = vadd.f32 %v327_v24, %v322_v9 }
 0x11a   :  { %v334_v36 = vadd.f32 %v333_v28, %v328_v12 }
 0x11c   :  { %v340_v38 = vadd.f32 %v339_v32, %v334_v36 }
 0x11e   :  { %v346_v40 = vadd.f32 %v345_v37, %v340_v38 }
 0x120   :  { %v352_v41 = vadd.f32 %v351_v39, %v346_v40 }
 0x122   :  { %v354_v42 = vadd.f32 %v353_v4, %v352_v41 }
 0x124   :  { %v355_v43 = vmax.f32 %v354_v42, 0.0 }
 0x126   :  { %v390_v44 = vperm.slane %v355_v43, 0  ;;  %v391_v45 = vperm.slane %v355_v43, 1 }
 0x128   :  { %410 = vmatmul.f32.vlgmr.msra.gmra.mxu0 %v390_v44  ;;  %430 = vmatmul.f32.vlgmr.msra.gmra.mxu1 %v391_v45 }
 0x129   :  { %484 = vmatmul.f32.vlgmr.msra.gmra.mxu2 %v390_v44  ;;  %504 = vmatmul.f32.vlgmr.msra.gmra.mxu3 %v391_v45 }
 0x1a5   :  { %v411_v58 = vpop.f32.mrf.mxu0  ;;  %v431_v60 = vpop.f32.mrf.mxu1 }
 0x1a6   :  { %v412_v59 = vadd.f32 %v411_v58, %v388_v57 }
 0x1a8   :  { %v432_v61 = vadd.f32 %v431_v60, %v412_v59 }
 0x1aa   :  { %v434_v62 = vmax.f32 %v432_v61, 0.0 }
 0x1ac   :  { %v485_v0 = vpop.f32.mrf.mxu2  ;;  %643 = vmatmul.msk.f32.vlgmr.msrb.gmra.mxu0 %vm523_vm9, %v434_v62  ;;  %v505_v2 = vpop.f32.mrf.mxu3 }
 0x1ad   :  { %v486_v1 = vadd.f32 %v485_v0, %v467_v63 }
 0x1af   :  { %v506_v3 = vadd.f32 %v505_v2, %v486_v1 }
 0x1b1   :  { %v508_v5 = vmax.f32 %v506_v3, 0.0 }
 0x1b3   :  { %645 = vmatmul.msk.f32.vlgmr.msrb.gmra.mxu1 %vm523_vm9, %v508_v5 }
 0x229   :  { %v548_v7 = vpop.f32.mrf.mxu0 }
 0x22a   :  { %v549_v8 = vadd.f32 %v548_v7, %v522_v6 }
 0x22c   :  { %v591_v10 = vmul.f32 %v549_v8, %v549_v8 }
 0x22e   :  { %v593_v13 = vsel %vm592_vm10, %v591_v10, 0.0 }
 0x22f   :  { %594 = vadd.xlane.f32.xlu2 %v593_v13 }
 0x230   :  { %v588_v14 = vpop.f32.mrf.mxu1 }
 0x231   :  { %v589_v15 = vadd.f32 %v588_v14, %v564_v11 }
 0x233   :  { %610 = vst.msk [vmem:[%s1228_s15] sm:$0x1] %vm609_vm11, %v589_v15 }
 0x2a2   :  { %v595_v17 = vpop.xlane.xlu2 %594 }
 0x2a3   :  { %v596_v18 = vadd.f32 1e-12, %v595_v17 }
 0x2a5   :  { %663 = vrsqrt.f32 %v596_v18  ;;  %vm603_vm13 = vweird.f32 %v596_v18 }
 0x2ab   :  { %v664_v19 = vpop.eup %663 }
 0x2ac   :  { %v598_v20 = vmul.f32 %v664_v19, %v596_v18  ;;  %vm604_vm12 = vweird.f32 %v664_v19 }
 0x2ad   :  { %vm605_vm14 = vmor %vm603_vm13, %vm604_vm12 }
 0x2ae   :  { %v599_v21 = vmul.f32 %v664_v19, %v598_v20 }
 0x2b0   :  { %v600_v22 = vmul.f32 0.5, %v599_v21 }
 0x2b2   :  { %v601_v23 = vsub.f32 1.5, %v600_v22 }
 0x2b4   :  { %v602_v16 = vmul.f32 %v664_v19, %v601_v23 }
 0x2b6   :  { %v606_v24 = vsel %vm605_vm14, %v664_v19, %v602_v16 }
 0x2b7   :  { %v607_v25 = vmul.f32 %v606_v24, %v549_v8 }
 0x2b9   :  { %608 = vst.msk [vmem:[%s1227_s14] sm:$0x1] %vm592_vm10, %v607_v25 }
 0x2ba   :  { %619 = vsyncpa [#allocation3], 1 }
 0x2bb   :  { %620 = vsyncpa [#allocation5], 1 }

// kernel: odometry_forward.9
= control target key start
LH: loop header
LB: loop body
LE: loop exit
PB: predicated region body
PF: predicated region fallthrough
CT: control target
= control target key end

     0   :  { %21 = vsyncpa [#allocation3], 0  ;;  %s1553_s0 = inlined_call_operand.vmem [shape: f32[1,4], index: 0, kind: input, shape index: {}]   ;;  %s1554_s1 = inlined_call_operand.vmem [shape: f32[1,3], index: 1, kind: input, shape index: {}]   ;;  %s1555_s2 = inlined_call_operand.vmem [shape: f32[1,5], index: 2, kind: input, shape index: {}]   ;;  %s1556_s3 = inlined_call_operand.vmem [shape: f32[1,3,16,128], index: 3, kind: input, shape index: {}]   ;;  %s1557_s4 = inlined_call_operand.vmem [shape: f32[10,512], index: 4, kind: input, shape index: {}]   ;;  %s1558_s5 = inlined_call_operand.vmem [shape: f32[1,512], index: 5, kind: input, shape index: {}]   ;;  %s1559_s6 = inlined_call_operand.vmem [shape: f32[512,100], index: 6, kind: input, shape index: {}]   ;;  %s1560_s7 = inlined_call_operand.vmem [shape: f32[1,100], index: 7, kind: input, shape index: {}]   ;;  %s1561_s8 = inlined_call_operand.vmem [shape: f32[100,4], index: 8, kind: input, shape index: {}]   ;;  %s1562_s9 = inlined_call_operand.vmem [shape: f32[1,4], index: 9, kind: input, shape index: {}]   ;;  %s1563_s10 = inlined_call_operand.vmem [shape: f32[512,100], index: 10, kind: input, shape index: {}]   ;;  %s1564_s11 = inlined_call_operand.vmem [shape: f32[1,100], index: 11, kind: input, shape index: {}]   ;;  %s1565_s12 = inlined_call_operand.vmem [shape: f32[100,3], index: 12, kind: input, shape index: {}]   ;;  %s1566_s13 = inlined_call_operand.vmem [shape: f32[1,3], index: 13, kind: input, shape index: {}]   ;;  %s1567_s14 = inlined_call_operand.vmem [shape: f32[1,4], index: 14, kind: output, shape index: {0}]   ;;  %s1568_s15 = inlined_call_operand.vmem [shape: f32[1,3], index: 15, kind: output, shape index: {1}]  }
   0x1   :  { %22 = vsyncpa [#allocation5], 0  ;;  %s37_s20 = sshll.u32 %s1554_s1, 4  ;;  %s28_s23 = sshll.u32 %s1553_s0, 4  ;;  %s38_s20 = int_to_ptr.vmem [resolvable:$true] %s37_s20  ;;  %s29_s23 = int_to_ptr.vmem [resolvable:$true] %s28_s23 }
   0x2   :  { %s853_s24 = smov [#allocation4]   ;;  %s854_s25 = smov [#allocation2]  }
   0x3   :  { %40 = dma.vmem_to_smem %s38_s20, 16, %s853_s24, [#allocation5]  }
   0x4   :  { %31 = dma.vmem_to_smem %s29_s23, 16, %s854_s25, [#allocation3]  }
   0x5   :  { %s46_s28 = sshll.u32 %s1555_s2, 4  ;;  %s855_s29 = smov [#allocation6]   ;;  %s47_s28 = int_to_ptr.vmem [resolvable:$true] %s46_s28 }
   0x6   :  { %49 = dma.vmem_to_smem %s47_s28, 16, %s855_s29, [#allocation5]  }
   0x7   :  { %849 = dma.done.wait [#allocation3], 16  }
   0x8   :  { %850 = vsyncadd [#allocation3], 4294967280 }
   0x9   :  { %851 = dma.done.wait [#allocation5], 32  }
   0xa   :  { %852 = vsyncadd [#allocation5], 4294967264 }
   0xb   :  { %84 = sfence }
   0xc   :  { %s85_s1 = sld [smem:[#allocation2]]  ;;  %v96_v0 = vld [vmem:[%s1556_s3] sm:$0xff]  ;;  %v97_v1 = vld [vmem:[%s1556_s3 + $0x8] sm:$0xff]  ;;  %v772_v2 = vld [vmem:[%s1556_s3 + $0x10] sm:$0xff]  ;;  %vm675_vm8 = vcmask 1043456   ;;  %vm671_vm9 = vcmask 818176  }
   0xd   :  { %s769_s30 = sld [smem:[#allocation2 + $0x1]]  ;;  %v773_v3 = vld [vmem:[%s1556_s3 + $0x18] sm:$0xff]  ;;  %v774_v5 = vld [vmem:[%s1556_s3 + $0x20] sm:$0xff]  ;;  %v775_v6 = vld [vmem:[%s1556_s3 + $0x28] sm:$0xff]  ;;  %vm740_vm10 = vcmask 24576   ;;  %vm757_vm11 = vcmask 16384  }
   0xe   :  { %s945_s0 = sld [smem:[#allocation2 + $0x2]] }
   0xf   :  { %s947_s16 = sld [smem:[#allocation2 + $0x3]] }
  0x10   :  { %s1015_s19 = sld [smem:[#allocation4 + $0x2]] }
  0x11   :  { %s1358_s29 = sld [smem:[#allocation6 + $0x1]] }
  0x12   :  { %s89_s2 = smul.f32 %s85_s1, %s85_s1  ;;  %v961_v4 = vstv %s85_s1  ;;  %s1374_s20 = sld [smem:[#allocation6 + $0x3]] }
  0x13   :  { %s90_s25 = smul.f32 %s769_s30, %s769_s30  ;;  %s104_s17 = ssub.f32 0.0, %s769_s30  ;;  %v119_v7 = vmul.f32 %v961_v4, %v96_v0  ;;  %v120_v8 = vmul.f32 %v961_v4, %v97_v1  ;;  %v129_v10 = vmul.f32 %v772_v2, %v961_v4  ;;  %v130_v11 = vmul.f32 %v773_v3, %v961_v4 }
  0x14   :  { %s92_s18 = smul.f32 %s945_s0, %s945_s0  ;;  %v974_v9 = vstv %s945_s0  ;;  %v978_v12 = vstv %s769_s30  ;;  %v140_v31 = vmul.f32 %v774_v5, %v961_v4  ;;  %v141_v34 = vmul.f32 %v775_v6, %v961_v4 }
  0x15   :  { %s91_s1 = sadd.f32 %s90_s25, %s89_s2  ;;  %v105_v13 = vstv %s104_s17  ;;  %v109_v14 = vmul.f32 %v772_v2, %v974_v9  ;;  %v110_v15 = vmul.f32 %v773_v3, %v974_v9  ;;  %v113_v16 = vstv %s947_s16  ;;  %s94_s30 = smul.f32 %s947_s16, %s947_s16 }
  0x16   :  { %v106_v17 = vmul.f32 %v105_v13, %v96_v0  ;;  %v107_v18 = vmul.f32 %v105_v13, %v97_v1  ;;  %v114_v19 = vmul.f32 %v774_v5, %v113_v16  ;;  %v115_v20 = vmul.f32 %v775_v6, %v113_v16  ;;  %s1006_s16 = sld [smem:[#allocation4]] }
  0x17   :  { %v121_v21 = vmul.f32 %v774_v5, %v974_v9  ;;  %v122_v22 = vmul.f32 %v775_v6, %v974_v9  ;;  %v125_v23 = vmul.f32 %v772_v2, %v113_v16  ;;  %v126_v24 = vmul.f32 %v773_v3, %v113_v16  ;;  %s93_s3 = sadd.f32 %s92_s18, %s91_s1 }
  0x18   :  { %v111_v25 = vsub.f32 %v106_v17, %v109_v14  ;;  %v112_v26 = vsub.f32 %v107_v18, %v110_v15  ;;  %v131_v27 = vmul.f32 %v113_v16, %v96_v0  ;;  %v132_v28 = vmul.f32 %v113_v16, %v97_v1  ;;  %s1013_s2 = sld [smem:[#allocation4 + $0x1]] }
  0x19   :  { %v123_v29 = vadd.f32 %v121_v21, %v119_v7  ;;  %v124_v30 = vadd.f32 %v122_v22, %v120_v8  ;;  %v136_v35 = vmul.f32 %v774_v5, %v978_v12  ;;  %v137_v36 = vmul.f32 %v775_v6, %v978_v12  ;;  %s95_s0 = sadd.f32 %s94_s30, %s93_s3 }
  0x1a   :  { %v116_v32 = vsub.f32 %v111_v25, %v114_v19  ;;  %v117_v33 = vsub.f32 %v112_v26, %v115_v20  ;;  %v142_v37 = vmul.f32 %v772_v2, %v978_v12  ;;  %v143_v38 = vmul.f32 %v773_v3, %v978_v12  ;;  %s1428_s1 = sld [smem:[#allocation6 + $0x4]] }
  0x1b   :  { %v127_v39 = vsub.f32 %v123_v29, %v125_v23  ;;  %v128_v40 = vsub.f32 %v124_v30, %v126_v24  ;;  %v133_v41 = vadd.f32 %v131_v27, %v129_v10  ;;  %v134_v42 = vadd.f32 %v132_v28, %v130_v11 }
  0x1c   :  { %v144_v43 = vadd.f32 %v142_v37, %v140_v31  ;;  %v146_v44 = vmul.f32 %v974_v9, %v96_v0  ;;  %v150_v45 = vsub.f32 0.0, %v116_v32  ;;  %v151_v46 = vsub.f32 0.0, %v117_v33 }
  0x1d   :  { %v145_v47 = vadd.f32 %v143_v38, %v141_v34  ;;  %v147_v48 = vmul.f32 %v974_v9, %v97_v1  ;;  %v138_v49 = vsub.f32 %v133_v41, %v136_v35  ;;  %v139_v50 = vsub.f32 %v134_v42, %v137_v36 }
  0x1e   :  { %v154_v51 = vmul.f32 %v127_v39, %v961_v4  ;;  %v166_v52 = vstv %s95_s0  ;;  %v148_v53 = vsub.f32 %v144_v43, %v146_v44  ;;  %v152_v54 = vmul.f32 %v150_v45, %v978_v12  ;;  %s1366_s0 = sld [smem:[#allocation6 + $0x2]] }
  0x1f   :  { %v153_v55 = vmul.f32 %v151_v46, %v978_v12  ;;  %v155_v56 = vmul.f32 %v128_v40, %v961_v4  ;;  %805 = vrcp.f32 %v166_v52  ;;  %v187_v57 = vmul.f32 %v150_v45, %v974_v9 }
  0x20   :  { %v188_v58 = vmul.f32 %v151_v46, %v974_v9  ;;  %v149_v59 = vsub.f32 %v145_v47, %v147_v48  ;;  %v189_v60 = vmul.f32 %v127_v39, %v113_v16  ;;  %v190_v61 = vmul.f32 %v128_v40, %v113_v16 }
  0x21   :  { %v158_v62 = vmul.f32 %v138_v49, %v113_v16  ;;  %v159_v63 = vmul.f32 %v139_v50, %v113_v16  ;;  %v156_v0 = vadd.f32 %v154_v51, %v152_v54  ;;  %v157_v1 = vadd.f32 %v155_v56, %v153_v55 }
  0x22   :  { %v162_v2 = vmul.f32 %v148_v53, %v974_v9  ;;  %v193_v3 = vmul.f32 %v138_v49, %v961_v4  ;;  %v191_v5 = vadd.f32 %v189_v60, %v187_v57  ;;  %v192_v6 = vadd.f32 %v190_v61, %v188_v58 }
  0x23   :  { %v194_v7 = vmul.f32 %v139_v50, %v961_v4  ;;  %v207_v8 = vmul.f32 %v150_v45, %v113_v16  ;;  %v163_v10 = vmul.f32 %v149_v59, %v974_v9  ;;  %vm172_vm0 = vweird.f32 %v166_v52 }
  0x24   :  { %v208_v11 = vmul.f32 %v151_v46, %v113_v16  ;;  %v209_v13 = vmul.f32 %v127_v39, %v974_v9  ;;  %v176_v15 = vand.u32 2147483647, %v166_v52  ;;  %v210_v17 = vmul.f32 %v128_v40, %v974_v9 }
  0x25   :  { %v806_v14 = vpop.eup %805  ;;  %v213_v18 = vmul.f32 %v138_v49, %v978_v12  ;;  %v214_v19 = vmul.f32 %v139_v50, %v978_v12  ;;  %v178_v21 = vand.u32 2147483648, %v166_v52  ;;  %v197_v22 = vmul.f32 %v148_v53, %v978_v12 }
  0x26   :  { %v168_v20 = vmul.f32 %v806_v14, %v166_v52  ;;  %v198_v23 = vmul.f32 %v149_v59, %v978_v12  ;;  %v195_v16 = vadd.f32 %v193_v3, %v191_v5  ;;  %v196_v24 = vadd.f32 %v194_v7, %v192_v6 }
  0x27   :  { %v211_v25 = vsub.f32 %v207_v8, %v209_v13  ;;  %v212_v26 = vsub.f32 %v208_v11, %v210_v17  ;;  %vm173_vm1 = vweird.f32 %v806_v14  ;;  %v217_v9 = vmul.f32 %v148_v53, %v961_v4 }
  0x28   :  { %v169_v27 = vsub.f32 1.0, %v168_v20  ;;  %v218_v28 = vmul.f32 %v149_v59, %v961_v4  ;;  %v160_v29 = vsub.f32 %v156_v0, %v158_v62  ;;  %v161_v30 = vsub.f32 %v157_v1, %v159_v63  ;;  %vm174_vm2 = vmor %vm172_vm0, %vm173_vm1 }
  0x29   :  { %v215_v31 = vadd.f32 %v213_v18, %v211_v25  ;;  %v216_v12 = vadd.f32 %v214_v19, %v212_v26  ;;  %vm177_vm3 = vcmp.eq.f32.partialorder %v176_v15, 8.507059e+37  ;;  %v179_v33 = vor.u32 1.1754944e-38, %v178_v21 }
  0x2a   :  { %v170_v32 = vmul.f32 %v806_v14, %v169_v27  ;;  %v199_v34 = vsub.f32 %v195_v16, %v197_v22  ;;  %v200_v36 = vsub.f32 %v196_v24, %v198_v23  ;;  %v164_v39 = vadd.f32 %v162_v2, %v160_v29 }
  0x2b   :  { %v219_v37 = vadd.f32 %v217_v9, %v215_v31  ;;  %v220_v38 = vadd.f32 %v218_v28, %v216_v12  ;;  %v165_v40 = vadd.f32 %v163_v10, %v161_v30  ;;  %v184_v42 = vstv %s1006_s16  ;;  %v371_v30 = vld [vmem:[%s1559_s6 + $0x78] sm:$0xff] }
  0x2c   :  { %v171_v35 = vadd.f32 %v806_v14, %v170_v32  ;;  %v204_v43 = vstv %s1013_s2  ;;  %v224_v44 = vstv %s1015_s19  ;;  %v387_v31 = vld [vmem:[%s1559_s6 + $0xf8] sm:$0xff]  ;;  %430 = vmatpush.msra.mxu0 %v371_v30  ;;  %v378_v30 = vld [vmem:[%s1559_s6 + $0xb0] sm:$0xff] }
  0x2d   :  { %v403_v12 = vld [vmem:[%s1559_s6 + $0x178] sm:$0xff]  ;;  %450 = vmatpush.msra.mxu1 %v387_v31  ;;  %v394_v31 = vld [vmem:[%s1559_s6 + $0x130] sm:$0xff] }
  0x2e   :  { %v175_v4 = vsel %vm174_vm2, %v806_v14, %v171_v35  ;;  %v419_v32 = vld [vmem:[%s1559_s6 + $0x1f8] sm:$0xff]  ;;  %470 = vmatpush.msra.mxu2 %v403_v12  ;;  %v402_v35 = vld [vmem:[%s1559_s6 + $0x170] sm:$0xff] }
  0x2f   :  { %v180_v41 = vsel %vm177_vm3, %v179_v33, %v175_v4  ;;  %v370_v33 = vld [vmem:[%s1559_s6 + $0x70] sm:$0xff]  ;;  %490 = vmatpush.msra.mxu3 %v419_v32  ;;  %v368_v4 = vld [vmem:[%s1559_s6 + $0x60] sm:$0xff]  ;;  %v361_v32 = vld [vmem:[%s1559_s6 + $0x28] sm:$0xff] }
  0x30   :  { %v201_v45 = vmul.f32 %v199_v34, %v180_v41  ;;  %v202_v46 = vmul.f32 %v200_v36, %v180_v41  ;;  %v221_v47 = vmul.f32 %v219_v37, %v180_v41  ;;  %v222_v48 = vmul.f32 %v220_v38, %v180_v41  ;;  %v386_v34 = vld [vmem:[%s1559_s6 + $0xf0] sm:$0xff]  ;;  %v369_v37 = vld [vmem:[%s1559_s6 + $0x68] sm:$0xff]  ;;  %431 = vmatpush.msra.mxu0 %v370_v33 }
  0x31   :  { %v181_v49 = vmul.f32 %v180_v41, %v164_v39  ;;  %v182_v50 = vmul.f32 %v180_v41, %v165_v40  ;;  %v418_v36 = vld [vmem:[%s1559_s6 + $0x1f0] sm:$0xff]  ;;  %451 = vmatpush.msra.mxu1 %v386_v34  ;;  %v385_v38 = vld [vmem:[%s1559_s6 + $0xe8] sm:$0xff]  ;;  %471 = vmatpush.msra.mxu2 %v402_v35  ;;  %v384_v41 = vld [vmem:[%s1559_s6 + $0xe0] sm:$0xff] }
  0x32   :  { %v205_v51 = vadd.f32 %v204_v43, %v201_v45  ;;  %v206_v52 = vadd.f32 %v204_v43, %v202_v46  ;;  %v225_v53 = vadd.f32 %v224_v44, %v221_v47  ;;  %v226_v54 = vadd.f32 %v224_v44, %v222_v48  ;;  %v401_v39 = vld [vmem:[%s1559_s6 + $0x168] sm:$0xff]  ;;  %491 = vmatpush.msra.mxu3 %v418_v36  ;;  %v416_v43 = vld [vmem:[%s1559_s6 + $0x1e0] sm:$0xff]  ;;  %v367_v44 = vld [vmem:[%s1559_s6 + $0x58] sm:$0xff] }
  0x33   :  { %v185_v55 = vadd.f32 %v184_v42, %v181_v49  ;;  %v186_v56 = vadd.f32 %v184_v42, %v182_v50  ;;  %v417_v40 = vld [vmem:[%s1559_s6 + $0x1e8] sm:$0xff]  ;;  %432 = vmatpush.msra.mxu0 %v369_v37  ;;  %452 = vmatpush.msra.mxu1 %v385_v38  ;;  %v400_v42 = vld [vmem:[%s1559_s6 + $0x160] sm:$0xff]  ;;  %v383_v45 = vld [vmem:[%s1559_s6 + $0xd8] sm:$0xff] }
  0x34   :  { %v230_v57 = vmul.f32 %v206_v52, %v206_v52  ;;  %v233_v58 = vmul.f32 %v225_v53, %v225_v53  ;;  %v283_v59 = vadd.f32 %v206_v52, %v205_v51  ;;  %v234_v60 = vmul.f32 %v226_v54, %v226_v54  ;;  %472 = vmatpush.msra.mxu2 %v401_v39  ;;  %v399_v47 = vld [vmem:[%s1559_s6 + $0x158] sm:$0xff]  ;;  %v366_v49 = vld [vmem:[%s1559_s6 + $0x50] sm:$0xff]  ;;  %v377_v33 = vld [vmem:[%s1559_s6 + $0xa8] sm:$0xff] }
  0x35   :  { %v227_v61 = vmul.f32 %v185_v55, %v185_v55  ;;  %v228_v62 = vmul.f32 %v186_v56, %v186_v56  ;;  %v229_v63 = vmul.f32 %v205_v51, %v205_v51  ;;  %v294_v5 = vadd.f32 %v226_v54, %v225_v53  ;;  %492 = vmatpush.msra.mxu3 %v417_v40  ;;  %v415_v48 = vld [vmem:[%s1559_s6 + $0x1d8] sm:$0xff]  ;;  %v382_v50 = vld [vmem:[%s1559_s6 + $0xd0] sm:$0xff]  ;;  %v393_v34 = vld [vmem:[%s1559_s6 + $0x128] sm:$0xff] }
  0x36   :  { %284 = vadd.xlane.f32.xlu1 %v283_v59  ;;  %v272_v28 = vadd.f32 %v186_v56, %v185_v55  ;;  %433 = vmatpush.msra.mxu0 %v368_v4  ;;  %v398_v53 = vld [vmem:[%s1559_s6 + $0x150] sm:$0xff]  ;;  %v397_v59 = vld [vmem:[%s1559_s6 + $0x148] sm:$0xff]  ;;  %v360_v36 = vld [vmem:[%s1559_s6 + $0x20] sm:$0xff] }
  0x37   :  { %v231_v0 = vadd.f32 %v229_v63, %v227_v61  ;;  %v232_v1 = vadd.f32 %v230_v57, %v228_v62  ;;  %453 = vmatpush.msra.mxu1 %v384_v41  ;;  %473 = vmatpush.msra.mxu2 %v400_v42  ;;  %v414_v54 = vld [vmem:[%s1559_s6 + $0x1d0] sm:$0xff]  ;;  %v365_v57 = vld [vmem:[%s1559_s6 + $0x48] sm:$0xff]  ;;  %v364_v62 = vld [vmem:[%s1559_s6 + $0x40] sm:$0xff] }
  0x38   :  { %493 = vmatpush.msra.mxu3 %v416_v43  ;;  %434 = vmatpush.msra.mxu0 %v367_v44  ;;  %v380_v63 = vld [vmem:[%s1559_s6 + $0xc0] sm:$0xff]  ;;  %v410_v12 = vld [vmem:[%s1559_s6 + $0x1b0] sm:$0xff]  ;;  %v409_v35 = vld [vmem:[%s1559_s6 + $0x1a8] sm:$0xff] }
  0x39   :  { %v235_v2 = vadd.f32 %v233_v58, %v231_v0  ;;  %v236_v3 = vadd.f32 %v234_v60, %v232_v1  ;;  %454 = vmatpush.msra.mxu1 %v383_v45  ;;  %474 = vmatpush.msra.mxu2 %v399_v47  ;;  %v381_v58 = vld [vmem:[%s1559_s6 + $0xc8] sm:$0xff]  ;;  %v396_v1 = vld [vmem:[%s1559_s6 + $0x140] sm:$0xff]  ;;  %v359_v40 = vld [vmem:[%s1559_s6 + $0x18] sm:$0xff] }
  0x3a   :  { %494 = vmatpush.msra.mxu3 %v415_v48  ;;  %435 = vmatpush.msra.mxu0 %v366_v49  ;;  %v413_v60 = vld [vmem:[%s1559_s6 + $0x1c8] sm:$0xff]  ;;  %v376_v37 = vld [vmem:[%s1559_s6 + $0xa0] sm:$0xff]  ;;  %v375_v4 = vld [vmem:[%s1559_s6 + $0x98] sm:$0xff] }
  0x3b   :  { %807 = vrsqrt.f32 %v235_v2  ;;  %vm244_vm4 = vcmp.eq.f32.partialorder %v235_v2, inf  ;;  %v247_v20 = vand.u32 2147483648, %v235_v2  ;;  %vm246_vm5 = vcmp.eq.f32.partialorder %v235_v2, 0.0  ;;  %455 = vmatpush.msra.mxu1 %v382_v50  ;;  %475 = vmatpush.msra.mxu2 %v398_v53  ;;  %v392_v38 = vld [vmem:[%s1559_s6 + $0x120] sm:$0xff]  ;;  %v391_v41 = vld [vmem:[%s1559_s6 + $0x118] sm:$0xff]  ;;  %v358_v43 = vld [vmem:[%s1559_s6 + $0x10] sm:$0xff] }
  0x3c   :  { %809 = vrsqrt.f32 %v236_v3  ;;  %vm256_vm6 = vcmp.eq.f32.partialorder %v236_v3, inf  ;;  %v259_v23 = vand.u32 2147483648, %v236_v3  ;;  %vm258_vm7 = vcmp.eq.f32.partialorder %v236_v3, 0.0  ;;  %495 = vmatpush.msra.mxu3 %v414_v54  ;;  %436 = vmatpush.msra.mxu0 %v365_v57  ;;  %v408_v39 = vld [vmem:[%s1559_s6 + $0x1a0] sm:$0xff]  ;;  %v407_v42 = vld [vmem:[%s1559_s6 + $0x198] sm:$0xff]  ;;  %v374_v44 = vld [vmem:[%s1559_s6 + $0x90] sm:$0xff] }
  0x3d   :  { %456 = vmatpush.msra.mxu1 %v381_v58  ;;  %476 = vmatpush.msra.mxu2 %v397_v59  ;;  %v390_v45 = vld [vmem:[%s1559_s6 + $0x110] sm:$0xff]  ;;  %v357_v47 = vld [vmem:[%s1559_s6 + $0x8] sm:$0xff]  ;;  %v388_v53 = vld [vmem:[%s1559_s6 + $0x100] sm:$0xff] }
  0x3e   :  { %295 = vadd.xlane.f32.xlu1 %v294_v5  ;;  %496 = vmatpush.msra.mxu3 %v413_v60  ;;  %v373_v48 = vld [vmem:[%s1559_s6 + $0x88] sm:$0xff]  ;;  %v404_v54 = vld [vmem:[%s1559_s6 + $0x180] sm:$0xff]  ;;  %v558_v57 = vld [vmem:[%s1563_s10 + $0x178] sm:$0xff] }
  0x3f   :  { %437 = vmatpush.msra.mxu0 %v364_v62  ;;  %457 = vmatpush.msra.mxu1 %v380_v63  ;;  %v389_v49 = vld [vmem:[%s1559_s6 + $0x108] sm:$0xff]  ;;  %v574_v58 = vld [vmem:[%s1563_s10 + $0x1f8] sm:$0xff]  ;;  %v525_v59 = vld [vmem:[%s1563_s10 + $0x70] sm:$0xff] }
  0x40   :  { %477 = vmatpush.msra.mxu2 %v396_v1  ;;  %v405_v50 = vld [vmem:[%s1559_s6 + $0x188] sm:$0xff]  ;;  %v541_v60 = vld [vmem:[%s1563_s10 + $0xf0] sm:$0xff] }
  0x41   :  { %v808_v6 = vpop.eup %807  ;;  %v573_v62 = vld [vmem:[%s1563_s10 + $0x1f0] sm:$0xff]  ;;  %v524_v63 = vld [vmem:[%s1563_s10 + $0x68] sm:$0xff] }
  0x42   :  { %v810_v7 = vpop.eup %809  ;;  %v238_v8 = vmul.f32 %v808_v6, %v235_v2  ;;  %v556_v1 = vld [vmem:[%s1563_s10 + $0x168] sm:$0xff] }
  0x43   :  { %v250_v10 = vmul.f32 %v810_v7, %v236_v3 }
  0x44   :  { %v239_v11 = vmul.f32 %v808_v6, %v238_v8  ;;  %v395_v8 = vld [vmem:[%s1559_s6 + $0x138] sm:$0xff] }
  0x45   :  { %v251_v13 = vmul.f32 %v810_v7, %v250_v10  ;;  %v411_v10 = vld [vmem:[%s1559_s6 + $0x1b8] sm:$0xff]  ;;  %478 = vmatpush.msra.mxu2 %v395_v8 }
  0x46   :  { %v240_v14 = vmul.f32 0.5, %v239_v11  ;;  %v522_v8 = vld [vmem:[%s1563_s10 + $0x58] sm:$0xff] }
  0x47   :  { %v252_v15 = vmul.f32 0.5, %v251_v13  ;;  %479 = vmatpush.msra.mxu2 %v394_v31  ;;  %v549_v31 = vld [vmem:[%s1563_s10 + $0x130] sm:$0xff] }
  0x48   :  { %v241_v17 = vsub.f32 1.5, %v240_v14 }
  0x49   :  { %v253_v18 = vsub.f32 1.5, %v252_v15  ;;  %480 = vmatpush.msra.mxu2 %v393_v34  ;;  %v548_v34 = vld [vmem:[%s1563_s10 + $0x128] sm:$0xff] }
  0x4a   :  { %v242_v19 = vmul.f32 %v808_v6, %v241_v17  ;;  %v363_v6 = vld [vmem:[%s1559_s6 + $0x38] sm:$0xff] }
  0x4b   :  { %v254_v21 = vmul.f32 %v810_v7, %v253_v18  ;;  %v379_v7 = vld [vmem:[%s1559_s6 + $0xb8] sm:$0xff]  ;;  %438 = vmatpush.msra.mxu0 %v363_v6  ;;  %481 = vmatpush.msra.mxu2 %v392_v38  ;;  %v555_v6 = vld [vmem:[%s1563_s10 + $0x160] sm:$0xff] }
  0x4c   :  { %v243_v22 = vmul.f32 %v242_v19, %v235_v2  ;;  %458 = vmatpush.msra.mxu1 %v379_v7  ;;  %v571_v7 = vld [vmem:[%s1563_s10 + $0x1e0] sm:$0xff] }
  0x4d   :  { %v255_v16 = vmul.f32 %v254_v21, %v236_v3  ;;  %482 = vmatpush.msra.mxu2 %v391_v41  ;;  %v547_v38 = vld [vmem:[%s1563_s10 + $0x120] sm:$0xff]  ;;  %v546_v41 = vld [vmem:[%s1563_s10 + $0x118] sm:$0xff] }
  0x4e   :  { %v245_v24 = vsel %vm244_vm4, %v235_v2, %v243_v22  ;;  %v412_v2 = vld [vmem:[%s1559_s6 + $0x1c0] sm:$0xff]  ;;  %459 = vmatpush.msra.mxu1 %v378_v30  ;;  %v533_v30 = vld [vmem:[%s1563_s10 + $0xb0] sm:$0xff] }
  0x4f   :  { %v248_v25 = vsel %vm246_vm5, %v247_v20, %v245_v24  ;;  %v257_v26 = vsel %vm256_vm6, %v236_v3, %v255_v16  ;;  %497 = vmatpush.msra.mxu3 %v412_v2  ;;  %483 = vmatpush.msra.mxu2 %v390_v45  ;;  %v572_v2 = vld [vmem:[%s1563_s10 + $0x1e8] sm:$0xff]  ;;  %v529_v45 = vld [vmem:[%s1563_s10 + $0x90] sm:$0xff] }
  0x50   :  { %v260_v27 = vsel %vm258_vm7, %v259_v23, %v257_v26  ;;  %460 = vmatpush.msra.mxu1 %v377_v33  ;;  %v532_v33 = vld [vmem:[%s1563_s10 + $0xa8] sm:$0xff] }
  0x51   :  { %v261_v9 = vadd.f32 %v260_v27, %v248_v25  ;;  %498 = vmatpush.msra.mxu3 %v411_v10  ;;  %484 = vmatpush.msra.mxu2 %v389_v49  ;;  %v538_v10 = vld [vmem:[%s1563_s10 + $0xd8] sm:$0xff]  ;;  %v561_v49 = vld [vmem:[%s1563_s10 + $0x190] sm:$0xff] }
  0x52   :  { %461 = vmatpush.msra.mxu1 %v376_v37  ;;  %v531_v37 = vld [vmem:[%s1563_s10 + $0xa0] sm:$0xff] }
  0x53   :  { %262 = vadd.xlane.f32.xlu0 %v261_v9  ;;  %499 = vmatpush.msra.mxu3 %v410_v12  ;;  %v565_v12 = vld [vmem:[%s1563_s10 + $0x1b0] sm:$0xff] }
  0x54   :  { %462 = vmatpush.msra.mxu1 %v375_v4  ;;  %485 = vmatpush.msra.mxu2 %v388_v53  ;;  %v530_v4 = vld [vmem:[%s1563_s10 + $0x98] sm:$0xff] }
  0x55   :  { %500 = vmatpush.msra.mxu3 %v409_v35  ;;  %v564_v35 = vld [vmem:[%s1563_s10 + $0x1a8] sm:$0xff] }
  0x56   :  { %463 = vmatpush.msra.mxu1 %v374_v44  ;;  %616 = vmatpush.msrb.mxu2 %v558_v57  ;;  %v513_v44 = vld [vmem:[%s1563_s10 + $0x10] sm:$0xff] }
  0x57   :  { %501 = vmatpush.msra.mxu3 %v408_v39  ;;  %v563_v39 = vld [vmem:[%s1563_s10 + $0x1a0] sm:$0xff] }
  0x58   :  { %464 = vmatpush.msra.mxu1 %v373_v48  ;;  %v545_v48 = vld [vmem:[%s1563_s10 + $0x110] sm:$0xff] }
  0x59   :  { %502 = vmatpush.msra.mxu3 %v407_v42  ;;  %v562_v42 = vld [vmem:[%s1563_s10 + $0x198] sm:$0xff] }
  0x5b   :  { %273 = vadd.xlane.f32.xlu0 %v272_v28 }
  0xa9   :  { %v285_v29 = vpop.xlane.xlu1 %284 }
  0xaa   :  { %v286_v51 = vrot.slane %v285_v29, 4 }
  0xac   :  { %v287_v0 = vadd.f32 %v286_v51, %v285_v29  ;;  %v362_v29 = vld [vmem:[%s1559_s6 + $0x30] sm:$0xff]  ;;  %v356_v51 = vld [vmem:[%s1559_s6] sm:$0xff] }
  0xad   :  { %439 = vmatpush.msra.mxu0 %v362_v29  ;;  %v517_v29 = vld [vmem:[%s1563_s10 + $0x30] sm:$0xff] }
  0xae   :  { %v288_v13 = vrot.slane %v287_v0, 2 }
  0xaf   :  { %440 = vmatpush.msra.mxu0 %v361_v32  ;;  %v516_v32 = vld [vmem:[%s1563_s10 + $0x28] sm:$0xff] }
  0xb0   :  { %v289_v21 = vadd.f32 %v288_v13, %v287_v0  ;;  %v540_v0 = vld [vmem:[%s1563_s10 + $0xe8] sm:$0xff]  ;;  %v570_v13 = vld [vmem:[%s1563_s10 + $0x1d8] sm:$0xff] }
  0xb1   :  { %v296_v46 = vpop.xlane.xlu1 %295  ;;  %441 = vmatpush.msra.mxu0 %v360_v36  ;;  %v515_v36 = vld [vmem:[%s1563_s10 + $0x20] sm:$0xff] }
  0xb2   :  { %v297_v56 = vrot.slane %v296_v46, 4  ;;  %v290_v24 = vrot.slane %v289_v21, 1 }
  0xb3   :  { %442 = vmatpush.msra.mxu0 %v359_v40  ;;  %v514_v40 = vld [vmem:[%s1563_s10 + $0x18] sm:$0xff] }
  0xb4   :  { %v298_v5 = vadd.f32 %v297_v56, %v296_v46  ;;  %v291_v9 = vadd.f32 %v290_v24, %v289_v21  ;;  %v406_v46 = vld [vmem:[%s1559_s6 + $0x190] sm:$0xff]  ;;  %v542_v56 = vld [vmem:[%s1563_s10 + $0xf8] sm:$0xff]  ;;  %v552_v21 = vld [vmem:[%s1563_s10 + $0x148] sm:$0xff] }
  0xb5   :  { %443 = vmatpush.msra.mxu0 %v358_v43  ;;  %503 = vmatpush.msra.mxu3 %v406_v46  ;;  %v551_v24 = vld [vmem:[%s1563_s10 + $0x140] sm:$0xff] }
  0xb6   :  { %v299_v15 = vrot.slane %v298_v5, 2  ;;  %v305_v43 = vld [vmem:[%s1557_s4] ss:$8 sm:$0xf] }
  0xb7   :  { %444 = vmatpush.msra.mxu0 %v357_v47  ;;  %504 = vmatpush.msra.mxu3 %v405_v50  ;;  %v778_v47 = vld [vmem:[%s1557_s4 + $0x1] ss:$8 sm:$0xf]  ;;  %v779_v50 = vld [vmem:[%s1557_s4 + $0x2] ss:$8 sm:$0xf] }
  0xb8   :  { %v300_v22 = vadd.f32 %v299_v15, %v298_v5  ;;  %v539_v5 = vld [vmem:[%s1563_s10 + $0xe0] sm:$0xff]  ;;  %v537_v15 = vld [vmem:[%s1563_s10 + $0xd0] sm:$0xff] }
  0xb9   :  { %445 = vmatpush.msra.mxu0 %v356_v51  ;;  %505 = vmatpush.msra.mxu3 %v404_v54  ;;  %v512_v51 = vld [vmem:[%s1563_s10 + $0x8] sm:$0xff] }
  0xba   :  { %v301_v26 = vrot.slane %v300_v22, 1  ;;  %v780_v54 = vld [vmem:[%s1557_s4 + $0x3] ss:$8 sm:$0xf] }
  0xbb   :  { %636 = vmatpush.msrb.mxu3 %v574_v58 }
  0xbc   :  { %v302_v28 = vadd.f32 %v301_v26, %v300_v22  ;;  %v568_v22 = vld [vmem:[%s1563_s10 + $0x1c8] sm:$0xff]  ;;  %v518_v26 = vld [vmem:[%s1563_s10 + $0x38] sm:$0xff] }
  0xbd   :  { %637 = vmatpush.msrb.mxu3 %v573_v62  ;;  %v527_v62 = vld [vmem:[%s1563_s10 + $0x80] sm:$0xff] }
  0xbf   :  { %638 = vmatpush.msrb.mxu3 %v572_v2  ;;  %v559_v2 = vld [vmem:[%s1563_s10 + $0x180] sm:$0xff] }
  0xc1   :  { %639 = vmatpush.msrb.mxu3 %v571_v7  ;;  %v332_v7 = vstv %s1358_s29 }
  0xc3   :  { %640 = vmatpush.msrb.mxu3 %v570_v13  ;;  %v785_v13 = vld [vmem:[%s1557_s4 + $0x7] ss:$8 sm:$0xf] }
  0xc6   :  { %v263_v52 = vpop.xlane.xlu0 %262 }
  0xc7   :  { %v264_v55 = vrot.slane %v263_v52, 4 }
  0xc9   :  { %v265_v61 = vadd.f32 %v264_v55, %v263_v52  ;;  %v372_v52 = vld [vmem:[%s1559_s6 + $0x80] sm:$0xff]  ;;  %v526_v55 = vld [vmem:[%s1563_s10 + $0x78] sm:$0xff]  ;;  %s1349_s6 = sld [smem:[#allocation6]] }
  0xca   :  { %465 = vmatpush.msra.mxu1 %v372_v52  ;;  %576 = vmatpush.msrb.mxu0 %v526_v55  ;;  %v528_v52 = vld [vmem:[%s1563_s10 + $0x88] sm:$0xff] }
  0xcb   :  { %v266_v3 = vrot.slane %v265_v61, 2  ;;  %v544_v55 = vld [vmem:[%s1563_s10 + $0x108] sm:$0xff] }
  0xcc   :  { %596 = vmatpush.msrb.mxu1 %v542_v56  ;;  %577 = vmatpush.msrb.mxu0 %v525_v59  ;;  %v560_v56 = vld [vmem:[%s1563_s10 + $0x188] sm:$0xff] }
  0xcd   :  { %v267_v11 = vadd.f32 %v266_v3, %v265_v61  ;;  %v557_v61 = vld [vmem:[%s1563_s10 + $0x170] sm:$0xff]  ;;  %v523_v3 = vld [vmem:[%s1563_s10 + $0x60] sm:$0xff] }
  0xce   :  { %v274_v14 = vpop.xlane.xlu0 %273  ;;  %597 = vmatpush.msrb.mxu1 %v541_v60  ;;  %617 = vmatpush.msrb.mxu2 %v557_v61  ;;  %v781_v60 = vld [vmem:[%s1557_s4 + $0x5] ss:$8 sm:$0xf] }
  0xcf   :  { %v275_v17 = vrot.slane %v274_v14, 4  ;;  %v268_v18 = vrot.slane %v267_v11, 1  ;;  %578 = vmatpush.msrb.mxu0 %v524_v63  ;;  %v511_v61 = vld [vmem:[%s1563_s10] sm:$0xff] }
  0xd0   :  { %598 = vmatpush.msrb.mxu1 %v540_v0  ;;  %618 = vmatpush.msrb.mxu2 %v556_v1  ;;  %v326_v0 = vstv %s1349_s6  ;;  %v543_v1 = vld [vmem:[%s1563_s10 + $0x100] sm:$0xff] }
  0xd1   :  { %v276_v19 = vadd.f32 %v275_v17, %v274_v14  ;;  %v269_v20 = vadd.f32 %v268_v18, %v267_v11  ;;  %579 = vmatpush.msrb.mxu0 %v523_v3  ;;  %v554_v11 = vld [vmem:[%s1563_s10 + $0x158] sm:$0xff]  ;;  %v521_v14 = vld [vmem:[%s1563_s10 + $0x50] sm:$0xff] }
  0xd2   :  { %599 = vmatpush.msrb.mxu1 %v539_v5  ;;  %619 = vmatpush.msrb.mxu2 %v555_v6  ;;  %v553_v17 = vld [vmem:[%s1563_s10 + $0x150] sm:$0xff] }
  0xd3   :  { %v277_v23 = vrot.slane %v276_v19, 2  ;;  %794 = vpush %v269_v20  ;;  %580 = vmatpush.msrb.mxu0 %v522_v8  ;;  %v569_v18 = vld [vmem:[%s1563_s10 + $0x1d0] sm:$0xff]  ;;  %v536_v20 = vld [vmem:[%s1563_s10 + $0xc8] sm:$0xff] }
  0xd4   :  { %600 = vmatpush.msrb.mxu1 %v538_v10  ;;  %620 = vmatpush.msrb.mxu2 %v554_v11  ;;  %v783_v6 = vld [vmem:[%s1557_s4 + $0x6] ss:$8 sm:$0xf]  ;;  %v327_v11 = vmul.f32 %v781_v60, %v326_v0 }
  0xd5   :  { %v278_v16 = vadd.f32 %v277_v23, %v276_v19  ;;  %v520_v19 = vld [vmem:[%s1563_s10 + $0x48] sm:$0xff]  ;;  %581 = vmatpush.msrb.mxu0 %v521_v14  ;;  %641 = vmatpush.msrb.mxu3 %v569_v18  ;;  %v519_v23 = vld [vmem:[%s1563_s10 + $0x40] sm:$0xff]  ;;  %v338_v14 = vstv %s1366_s0 }
  0xd6   :  { %601 = vmatpush.msrb.mxu1 %v537_v15  ;;  %621 = vmatpush.msrb.mxu2 %v553_v17  ;;  %v333_v17 = vmul.f32 %v783_v6, %v332_v7  ;;  %v787_v18 = vld [vmem:[%s1557_s4 + $0x20] ss:$8 sm:$0xf] }
  0xd7   :  { %v279_v25 = vrot.slane %v278_v16, 1  ;;  %582 = vmatpush.msrb.mxu0 %v520_v19  ;;  %642 = vmatpush.msrb.mxu3 %v568_v22  ;;  %v344_v19 = vstv %s1374_s20  ;;  %v789_v22 = vld [vmem:[%s1557_s4 + $0x21] ss:$8 sm:$0xf] }
  0xd8   :  { %602 = vmatpush.msrb.mxu1 %v536_v20  ;;  %622 = vmatpush.msrb.mxu2 %v552_v21  ;;  %v339_v21 = vmul.f32 %v785_v13, %v338_v14 }
  0xd9   :  { %v280_v27 = vadd.f32 %v279_v25, %v278_v16  ;;  %v535_v16 = vld [vmem:[%s1563_s10 + $0xc0] sm:$0xff]  ;;  %583 = vmatpush.msrb.mxu0 %v519_v23  ;;  %v350_v23 = vstv %s1428_s1 }
  0xda   :  { %v567_v25 = vld [vmem:[%s1563_s10 + $0x1c0] sm:$0xff]  ;;  %603 = vmatpush.msrb.mxu1 %v535_v16  ;;  %623 = vmatpush.msrb.mxu2 %v551_v24  ;;  %v345_v24 = vmul.f32 %v787_v18, %v344_v19 }
  0xdb   :  { %796 = vpush %v280_v27  ;;  %v534_v27 = vld [vmem:[%s1563_s10 + $0xb8] sm:$0xff]  ;;  %643 = vmatpush.msrb.mxu3 %v567_v25  ;;  %584 = vmatpush.msrb.mxu0 %v518_v26  ;;  %v351_v26 = vmul.f32 %v789_v22, %v350_v23  ;;  %v670_v19 = vld [vmem:[%s1562_s9] sm:$0x1] }
  0xdc   :  { %798 = vpush %v291_v9  ;;  %v550_v9 = vld [vmem:[%s1563_s10 + $0x138] sm:$0xff]  ;;  %604 = vmatpush.msrb.mxu1 %v534_v27 }
  0xdd   :  { %800 = vpush %v302_v28  ;;  %v566_v28 = vld [vmem:[%s1563_s10 + $0x1b8] sm:$0xff]  ;;  %624 = vmatpush.msrb.mxu2 %v550_v9  ;;  %585 = vmatpush.msrb.mxu0 %v517_v29  ;;  %v353_v9 = vld [vmem:[%s1558_s5] sm:$0xf] }
  0xde   :  { %644 = vmatpush.msrb.mxu3 %v566_v28  ;;  %605 = vmatpush.msrb.mxu1 %v533_v30 }
  0xdf   :  { %625 = vmatpush.msrb.mxu2 %v549_v31  ;;  %586 = vmatpush.msrb.mxu0 %v516_v32 }
  0xe0   :  { %645 = vmatpush.msrb.mxu3 %v565_v12  ;;  %606 = vmatpush.msrb.mxu1 %v532_v33 }
  0xe1   :  { %626 = vmatpush.msrb.mxu2 %v548_v34  ;;  %587 = vmatpush.msrb.mxu0 %v515_v36  ;;  %v669_v34 = vld [vmem:[%s1561_s8 + $0x60] sm:$0xf]  ;;  %v668_v36 = vld [vmem:[%s1561_s8 + $0x58] sm:$0xff] }
  0xe2   :  { %646 = vmatpush.msrb.mxu3 %v564_v35  ;;  %607 = vmatpush.msrb.mxu1 %v531_v37  ;;  %v711_v35 = vld [vmem:[%s1565_s12 + $0x60] sm:$0xf]  ;;  %v710_v37 = vld [vmem:[%s1565_s12 + $0x58] sm:$0xff] }
  0xe3   :  { %627 = vmatpush.msrb.mxu2 %v547_v38  ;;  %588 = vmatpush.msrb.mxu0 %v514_v40  ;;  %v667_v38 = vld [vmem:[%s1561_s8 + $0x50] sm:$0xff]  ;;  %v665_v40 = vld [vmem:[%s1561_s8 + $0x40] sm:$0xff] }
  0xe4   :  { %647 = vmatpush.msrb.mxu3 %v563_v39  ;;  %608 = vmatpush.msrb.mxu1 %v530_v4  ;;  %v666_v39 = vld [vmem:[%s1561_s8 + $0x48] sm:$0xff]  ;;  %v664_v4 = vld [vmem:[%s1561_s8 + $0x38] sm:$0xff] }
  0xe5   :  { %628 = vmatpush.msrb.mxu2 %v546_v41  ;;  %589 = vmatpush.msrb.mxu0 %v513_v44  ;;  %v663_v41 = vld [vmem:[%s1561_s8 + $0x30] sm:$0xff]  ;;  %v708_v44 = vld [vmem:[%s1565_s12 + $0x48] sm:$0xff] }
  0xe6   :  { %648 = vmatpush.msrb.mxu3 %v562_v42  ;;  %609 = vmatpush.msrb.mxu1 %v529_v45  ;;  %v709_v42 = vld [vmem:[%s1565_s12 + $0x50] sm:$0xff]  ;;  %v661_v45 = vld [vmem:[%s1561_s8 + $0x20] sm:$0xff] }
  0xe7   :  { %629 = vmatpush.msrb.mxu2 %v545_v48  ;;  %590 = vmatpush.msrb.mxu0 %v512_v51  ;;  %v706_v48 = vld [vmem:[%s1565_s12 + $0x38] sm:$0xff]  ;;  %v658_v51 = vld [vmem:[%s1561_s8 + $0x8] sm:$0xff] }
  0xe8   :  { %649 = vmatpush.msrb.mxu3 %v561_v49  ;;  %610 = vmatpush.msrb.mxu1 %v528_v52  ;;  %v659_v49 = vld [vmem:[%s1561_s8 + $0x10] sm:$0xff]  ;;  %v704_v52 = vld [vmem:[%s1565_s12 + $0x28] sm:$0xff] }
  0xe9   :  { %630 = vmatpush.msrb.mxu2 %v544_v55  ;;  %591 = vmatpush.msrb.mxu0 %v511_v61  ;;  %v702_v55 = vld [vmem:[%s1565_s12 + $0x18] sm:$0xff] }
  0xea   :  { %650 = vmatpush.msrb.mxu3 %v560_v56  ;;  %611 = vmatpush.msrb.mxu1 %v527_v62  ;;  %v701_v56 = vld [vmem:[%s1565_s12 + $0x10] sm:$0xff] }
  0xeb   :  { %631 = vmatpush.msrb.mxu2 %v543_v1 }
  0xec   :  { %651 = vmatpush.msrb.mxu3 %v559_v2  ;;  %v575_v2 = vld [vmem:[%s1564_s11] sm:$0x1] }
 0x104   :  { %s1335_s30 = spop %794 }
 0x105   :  { %s271_s28 = smul.f32 0.00048828125, %s1335_s30 }
 0x107   :  { %v306_v46 = vstv %s271_s28 }
 0x108   :  { %v307_v57 = vmul.f32 %v306_v46, %v305_v43  ;;  %v662_v43 = vld [vmem:[%s1561_s8 + $0x28] sm:$0xff]  ;;  %v707_v46 = vld [vmem:[%s1565_s12 + $0x40] sm:$0xff] }
 0x10c   :  { %s797_s27 = spop %796 }
 0x10d   :  { %s282_s16 = smul.f32 0.00048828125, %s797_s27  ;;  %s799_s19 = spop %798 }
 0x10e   :  { %s293_s25 = smul.f32 0.00048828125, %s799_s19  ;;  %s801_s28 = spop %800 }
 0x10f   :  { %v310_v53 = vstv %s282_s16  ;;  %s304_s2 = smul.f32 0.00048828125, %s801_s28 }
 0x110   :  { %v311_v58 = vmul.f32 %v778_v47, %v310_v53  ;;  %v315_v59 = vstv %s293_s25  ;;  %v660_v47 = vld [vmem:[%s1561_s8 + $0x18] sm:$0xff]  ;;  %v657_v53 = vld [vmem:[%s1561_s8] sm:$0xff] }
 0x111   :  { %v320_v63 = vstv %s304_s2  ;;  %v316_v5 = vmul.f32 %v779_v50, %v315_v59  ;;  %v705_v50 = vld [vmem:[%s1565_s12 + $0x30] sm:$0xff]  ;;  %v420_v59 = vld [vmem:[%s1560_s7] sm:$0x1] }
 0x112   :  { %v312_v3 = vadd.f32 %v311_v58, %v307_v57  ;;  %v321_v10 = vmul.f32 %v780_v54, %v320_v63  ;;  %v703_v54 = vld [vmem:[%s1565_s12 + $0x20] sm:$0xff]  ;;  %v700_v57 = vld [vmem:[%s1565_s12 + $0x8] sm:$0xff] }
 0x113   :  { %v699_v58 = vld [vmem:[%s1565_s12] sm:$0xff] }
 0x114   :  { %v317_v8 = vadd.f32 %v316_v5, %v312_v3 }
 0x116   :  { %v322_v15 = vadd.f32 %v321_v10, %v317_v8 }
 0x118   :  { %v328_v20 = vadd.f32 %v327_v11, %v322_v15 }
 0x11a   :  { %v334_v16 = vadd.f32 %v333_v17, %v328_v20 }
 0x11c   :  { %v340_v25 = vadd.f32 %v339_v21, %v334_v16  ;;  %v712_v16 = vld [vmem:[%s1566_s13] sm:$0x1] }
 0x11e   :  { %v346_v27 = vadd.f32 %v345_v24, %v340_v25 }
 0x120   :  { %v352_v28 = vadd.f32 %v351_v26, %v346_v27 }
 0x122   :  { %v354_v29 = vadd.f32 %v353_v9, %v352_v28 }
 0x124   :  { %v355_v30 = vmax.f32 %v354_v29, 0.0 }
 0x126   :  { %v422_v31 = vperm.slane %v355_v30, 0  ;;  %v423_v12 = vperm.slane %v355_v30, 1  ;;  %v424_v32 = vperm.slane %v355_v30, 2  ;;  %v425_v33 = vperm.slane %v355_v30, 3 }
 0x128   :  { %446 = vmatmul.f32.vlgmr.msra.gmra.mxu0 %v422_v31  ;;  %466 = vmatmul.f32.vlgmr.msra.gmra.mxu1 %v423_v12 }
 0x129   :  { %486 = vmatmul.f32.vlgmr.msra.gmra.mxu2 %v424_v32  ;;  %506 = vmatmul.f32.vlgmr.msra.gmra.mxu3 %v425_v33 }
 0x12a   :  { %790 = vmatpush.msk.msra.mxu0 %vm675_vm8, %v669_v34  ;;  %792 = vmatpush.msk.msra.mxu1 %vm675_vm8, %v711_v35 }
 0x12c   :  { %683 = vmatpush.msra.mxu0 %v668_v36  ;;  %723 = vmatpush.msra.mxu1 %v710_v37 }
 0x12e   :  { %684 = vmatpush.msra.mxu0 %v667_v38  ;;  %724 = vmatpush.msra.mxu1 %v709_v42 }
 0x130   :  { %592 = vmatmul.f32.vlgmr.msrb.gmra.mxu0 %v422_v31  ;;  %612 = vmatmul.f32.vlgmr.msrb.gmra.mxu1 %v423_v12 }
 0x131   :  { %632 = vmatmul.f32.vlgmr.msrb.gmra.mxu2 %v424_v32  ;;  %652 = vmatmul.f32.vlgmr.msrb.gmra.mxu3 %v425_v33 }
 0x132   :  { %685 = vmatpush.msra.mxu0 %v666_v39  ;;  %725 = vmatpush.msra.mxu1 %v708_v44 }
 0x134   :  { %686 = vmatpush.msra.mxu0 %v665_v40  ;;  %726 = vmatpush.msra.mxu1 %v707_v46 }
 0x136   :  { %687 = vmatpush.msra.mxu0 %v664_v4  ;;  %727 = vmatpush.msra.mxu1 %v706_v48 }
 0x138   :  { %688 = vmatpush.msra.mxu0 %v663_v41  ;;  %728 = vmatpush.msra.mxu1 %v705_v50 }
 0x13a   :  { %689 = vmatpush.msra.mxu0 %v662_v43  ;;  %729 = vmatpush.msra.mxu1 %v704_v52 }
 0x13c   :  { %690 = vmatpush.msra.mxu0 %v661_v45  ;;  %730 = vmatpush.msra.mxu1 %v703_v54 }
 0x13e   :  { %691 = vmatpush.msra.mxu0 %v660_v47  ;;  %731 = vmatpush.msra.mxu1 %v702_v55 }
 0x140   :  { %692 = vmatpush.msra.mxu0 %v659_v49  ;;  %732 = vmatpush.msra.mxu1 %v701_v56 }
 0x142   :  { %693 = vmatpush.msra.mxu0 %v658_v51  ;;  %733 = vmatpush.msra.mxu1 %v700_v57 }
 0x144   :  { %694 = vmatpush.msra.mxu0 %v657_v53  ;;  %734 = vmatpush.msra.mxu1 %v699_v58 }
 0x1a5   :  { %v447_v60 = vpop.f32.mrf.mxu0  ;;  %v467_v62 = vpop.f32.mrf.mxu1 }
 0x1a6   :  { %v448_v61 = vadd.f32 %v447_v60, %v420_v59 }
 0x1a8   :  { %v468_v63 = vadd.f32 %v467_v62, %v448_v61 }
 0x1ac   :  { %v487_v0 = vpop.f32.mrf.mxu2  ;;  %v507_v1 = vpop.f32.mrf.mxu3 }
 0x1ad   :  { %v488_v3 = vadd.f32 %v487_v0, %v468_v63  ;;  %v593_v5 = vpop.f32.mrf.mxu0  ;;  %v613_v10 = vpop.f32.mrf.mxu1 }
 0x1ae   :  { %v594_v7 = vadd.f32 %v593_v5, %v575_v2 }
 0x1af   :  { %v508_v6 = vadd.f32 %v507_v1, %v488_v3 }
 0x1b0   :  { %v614_v11 = vadd.f32 %v613_v10, %v594_v7 }
 0x1b1   :  { %v510_v8 = vmax.f32 %v508_v6, 0.0 }
 0x1b3   :  { %791 = vmatmul.msk.f32.vlgmr.msra.gmra.mxu0 %vm671_vm9, %v510_v8 }
 0x1b4   :  { %v633_v13 = vpop.f32.mrf.mxu2  ;;  %v653_v15 = vpop.f32.mrf.mxu3 }
 0x1b5   :  { %v634_v14 = vadd.f32 %v633_v13, %v614_v11 }
 0x1b7   :  { %v654_v17 = vadd.f32 %v653_v15, %v634_v14 }
 0x1b9   :  { %v656_v18 = vmax.f32 %v654_v17, 0.0 }
 0x1bb   :  { %793 = vmatmul.msk.f32.vlgmr.msra.gmra.mxu1 %vm671_vm9, %v656_v18 }
 0x230   :  { %v696_v20 = vpop.f32.mrf.mxu0 }
 0x231   :  { %v697_v21 = vadd.f32 %v696_v20, %v670_v19 }
 0x233   :  { %v739_v22 = vmul.f32 %v697_v21, %v697_v21 }
 0x235   :  { %v741_v23 = vsel %vm740_vm10, %v739_v22, 0.0 }
 0x236   :  { %742 = vadd.xlane.f32.xlu2 %v741_v23 }
 0x238   :  { %v736_v24 = vpop.f32.mrf.mxu1 }
 0x239   :  { %v737_v25 = vadd.f32 %v736_v24, %v712_v16 }
 0x23b   :  { %758 = vst.msk [vmem:[%s1568_s15] sm:$0x1] %vm757_vm11, %v737_v25 }
 0x2a9   :  { %v743_v26 = vpop.xlane.xlu2 %742 }
 0x2aa   :  { %v744_v27 = vadd.f32 1e-12, %v743_v26 }
 0x2ac   :  { %811 = vrsqrt.f32 %v744_v27  ;;  %vm751_vm13 = vweird.f32 %v744_v27 }
 0x2b2   :  { %v812_v9 = vpop.eup %811 }
 0x2b3   :  { %v746_v28 = vmul.f32 %v812_v9, %v744_v27  ;;  %vm752_vm12 = vweird.f32 %v812_v9 }
 0x2b4   :  { %vm753_vm14 = vmor %vm751_vm13, %vm752_vm12 }
 0x2b5   :  { %v747_v29 = vmul.f32 %v812_v9, %v746_v28 }
 0x2b7   :  { %v748_v30 = vmul.f32 0.5, %v747_v29 }
 0x2b9   :  { %v749_v31 = vsub.f32 1.5, %v748_v30 }
 0x2bb   :  { %v750_v12 = vmul.f32 %v812_v9, %v749_v31 }
 0x2bd   :  { %v754_v32 = vsel %vm753_vm14, %v812_v9, %v750_v12 }
 0x2be   :  { %v755_v33 = vmul.f32 %v754_v32, %v697_v21 }
 0x2c0   :  { %756 = vst.msk [vmem:[%s1567_s14] sm:$0x1] %vm740_vm10, %v755_v33 }
 0x2c1   :  { %767 = vsyncpa [#allocation3], 1 }
 0x2c2   :  { %768 = vsyncpa [#allocation5], 1 }

</bundles_post_ra>
